<compile_context>
chip_gen: v5e
topology: v5e:2x2
jax: 0.10.0
libtpu: 0.0.40
codegen_flags: <defaults>
</compile_context>

<pallas_src>
import functools

import jax
import jax.numpy as jnp
from jax.experimental import pallas as pl
from jax.experimental.pallas import tpu as pltpu


# ---------------------------------------------------------------------------
# small helpers
# ---------------------------------------------------------------------------
def _round_up(x, m):
    return (x + m - 1) // m * m


def _pad2d(x, rows, cols, value=0.0):
    pr, pc = rows - x.shape[0], cols - x.shape[1]
    if pr == 0 and pc == 0:
        return x
    return jnp.pad(x, ((0, pr), (0, pc)), constant_values=value)


def _pad1d(v, n, value=0.0):
    p = n - v.shape[0]
    if p == 0:
        return v
    return jnp.pad(v, (0, p), constant_values=value)


def _pick_m_tile(M):
    """Largest M tile (<=512, multiple of 16 for bf16 sublane packing) that
    still yields >=2 M blocks (feeds both v7x TensorCores / megacore) with at
    most ~12.5% zero-row padding."""
    for tm in (512, 256, 128, 64, 32, 16):
        Mp = _round_up(M, tm)
        if Mp // tm >= 2 and (Mp - M) * 8 <= Mp:
            return tm, Mp
    tm = max(16, min(512, _round_up(M, 16)))
    return tm, _round_up(M, tm)


def _pick_k_tile(K):
    """Largest K tile (<=512, multiple of 128) that divides the 128-rounded K
    exactly (no extra zero-column traffic)."""
    Kp = _round_up(K, 128)
    for tk in (512, 384, 256, 128):
        if Kp % tk == 0:
            return tk, Kp
    return 512, _round_up(K, 512)


# ---------------------------------------------------------------------------
# Pallas kernels
# ---------------------------------------------------------------------------
def _mm_stats_kernel(x_ref, w_ref, y_ref, st_ref, acc_ref):
    """Tiled bf16 matmul with f32 VMEM accumulation.  On the last K step it
    writes the conv output tile in bf16 and the per-M-tile per-channel sum /
    sum-of-squares (rows 0 / 1 of the stats block, taken from the f32
    accumulator) for training-mode BatchNorm statistics."""
    k = pl.program_id(2)

    @pl.when(k == 0)
    def _():
        acc_ref[...] = jnp.zeros_like(acc_ref)

    acc_ref[...] += jnp.dot(x_ref[...], w_ref[...],
                            preferred_element_type=jnp.float32)

    @pl.when(k == pl.num_programs(2) - 1)
    def _():
        acc = acc_ref[...]
        y_ref[...] = acc.astype(y_ref.dtype)                     # bf16 writeback
        st_ref[0, 0:1, :] = jnp.sum(acc, axis=0, keepdims=True)  # sum
        st_ref[0, 1:2, :] = jnp.sum(acc * acc, axis=0, keepdims=True)  # sumsq


def _bn_act_kernel(y_ref, sc_ref, sh_ref, o_ref, *, relu):
    """BN scale/shift (+ optional ReLU) epilogue, bf16 in / bf16 out."""
    y = y_ref[...].astype(jnp.float32) * sc_ref[...] + sh_ref[...]
    if relu:
        y = jnp.maximum(y, 0.0)
    o_ref[...] = y.astype(o_ref.dtype)


def _bn_add_relu_kernel(y_ref, sc_ref, sh_ref, r_ref, o_ref):
    """BN scale/shift + residual add + ReLU epilogue, bf16 in / bf16 out."""
    y = y_ref[...].astype(jnp.float32) * sc_ref[...] + sh_ref[...]
    y = y + r_ref[...].astype(jnp.float32)
    o_ref[...] = jnp.maximum(y, 0.0).astype(o_ref.dtype)


def _fc_kernel(x_ref, w_ref, b_ref, o_ref):
    """Small linear head: matmul + bias (no BN, no ReLU)."""
    y = jnp.dot(x_ref[...], w_ref[...], preferred_element_type=jnp.float32)
    o_ref[...] = (y + b_ref[...]).astype(o_ref.dtype)


# ---------------------------------------------------------------------------
# Pallas call wrappers
# ---------------------------------------------------------------------------
def matmul_with_stats(x, w, *, tm, tn, tk):
    Mp, Kp = x.shape
    _, Np = w.shape
    mt, nt, kt = Mp // tm, Np // tn, Kp // tk
    cost = pl.CostEstimate(
        flops=2 * Mp * Np * Kp,
        transcendentals=0,
        bytes_accessed=Mp * Kp * 2 + Kp * Np * 2 + Mp * Np * 2)
    return pl.pallas_call(
        _mm_stats_kernel,
        out_shape=(jax.ShapeDtypeStruct((Mp, Np), jnp.bfloat16),
                   jax.ShapeDtypeStruct((mt, 8, Np), jnp.float32)),
        grid=(mt, nt, kt),
        in_specs=[
            pl.BlockSpec((tm, tk), lambda i, j, k: (i, k)),
            pl.BlockSpec((tk, tn), lambda i, j, k: (k, j)),
        ],
        out_specs=(
            pl.BlockSpec((tm, tn), lambda i, j, k: (i, j)),
            pl.BlockSpec((1, 8, tn), lambda i, j, k: (i, 0, j)),
        ),
        scratch_shapes=[pltpu.VMEM((tm, tn), jnp.float32)],
        compiler_params=pltpu.CompilerParams(
            dimension_semantics=("parallel", "parallel", "arbitrary")),
        cost_estimate=cost,
    )(x, w)


def bn_act(y, scale, shift, residual=None, *, relu, tm, tn):
    Mp, Np = y.shape
    tile_spec = pl.BlockSpec((tm, tn), lambda i, j: (i, j))
    vec_spec = pl.BlockSpec((1, tn), lambda i, j: (0, j))
    if residual is None:
        kern = functools.partial(_bn_act_kernel, relu=relu)
        in_specs = [tile_spec, vec_spec, vec_spec]
        args = (y, scale, shift)
    else:
        kern = _bn_add_relu_kernel
        in_specs = [tile_spec, vec_spec, vec_spec, tile_spec]
        args = (y, scale, shift, residual)
    return pl.pallas_call(
        kern,
        out_shape=jax.ShapeDtypeStruct((Mp, Np), jnp.bfloat16),
        grid=(Mp // tm, Np // tn),
        in_specs=in_specs,
        out_specs=tile_spec,
        compiler_params=pltpu.CompilerParams(
            dimension_semantics=("parallel", "parallel")),
    )(*args)


def fc_layer(feat, w, b):
    """Linear head on (N, Cp) channel-padded features; single lane-dense block."""
    N, Cp = feat.shape
    ncls, C = w.shape
    Mp = _round_up(N, 16)
    Kp = _round_up(Cp, 128)
    Np = _round_up(ncls, 128)
    xp = _pad2d(feat.astype(jnp.bfloat16), Mp, Kp)
    wt = jnp.transpose(w)                       # (C, ncls)
    if Cp > C:
        wt = jnp.pad(wt, ((0, Cp - C), (0, 0)))  # padded features hit zero rows
    wp = _pad2d(wt.astype(jnp.bfloat16), Kp, Np)
    bp = _pad1d(b.astype(jnp.float32), Np).reshape(1, Np)
    out = pl.pallas_call(
        _fc_kernel,
        out_shape=jax.ShapeDtypeStruct((Mp, Np), jnp.float32),
        grid=(1,),
        in_specs=[pl.BlockSpec((Mp, Kp), lambda i: (0, 0)),
                  pl.BlockSpec((Kp, Np), lambda i: (0, 0)),
                  pl.BlockSpec((1, Np), lambda i: (0, 0))],
        out_specs=pl.BlockSpec((Mp, Np), lambda i: (0, 0)),
        compiler_params=pltpu.CompilerParams(
            dimension_semantics=("arbitrary",)),
    )(xp, wp, bp)
    return out[:N, :ncls]


# ---------------------------------------------------------------------------
# Plain-JAX glue (layout plumbing + tiny per-channel BN finalize)
# ---------------------------------------------------------------------------
def _im2col(x_nhwc, kh, kw, stride, pad):
    """Return (patches[M, kh*kw*C], (N, Ho, Wo)); order matches HWIO weight."""
    x = jnp.pad(x_nhwc, ((0, 0), (pad, pad), (pad, pad), (0, 0)))
    N, Hp, Wp, C = x.shape
    Ho = (Hp - kh) // stride + 1
    Wo = (Wp - kw) // stride + 1
    cols = []
    for i in range(kh):
        for j in range(kw):
            cols.append(x[:, i:i + stride * (Ho - 1) + 1:stride,
                          j:j + stride * (Wo - 1) + 1:stride, :])
    patches = jnp.concatenate(cols, axis=-1)          # (N, Ho, Wo, kh*kw*C)
    return patches.reshape(N * Ho * Wo, kh * kw * C), (N, Ho, Wo)


def conv_bn_act(x_nhwc, cp, *, stride, pad, relu, residual=None, eps=1e-5):
    """conv (im2col + tiled Pallas matmul) + training-mode BN + optional
    residual add + optional ReLU.  Input and output activations are bf16 NHWC
    with channels padded to a multiple of 128 (padded channels stay zero)."""
    cout, cin, kh, kw = cp["w"].shape
    C = x_nhwc.shape[-1]                  # carried (possibly padded) channels
    patches, (N, Ho, Wo) = _im2col(x_nhwc, kh, kw, stride, pad)
    M, K = patches.shape                  # K = kh*kw*C

    tm, Mp = _pick_m_tile(M)
    tk, Kp = _pick_k_tile(K)
    Np = _round_up(cout, 128)
    tn = 256 if Np % 256 == 0 else 128

    xp = _pad2d(patches.astype(jnp.bfloat16), Mp, Kp)

    # HWIO weight; zero-pad the input-channel axis to the carried width so the
    # carried (all-zero) padded channels contribute exactly nothing.
    w = jnp.transpose(cp["w"], (2, 3, 1, 0))          # (kh, kw, cin, cout)
    if C > cin:
        w = jnp.pad(w, ((0, 0), (0, 0), (0, C - cin), (0, 0)))
    w2d = w.reshape(kh * kw * C, cout)
    wp = _pad2d(w2d.astype(jnp.bfloat16), Kp, Np)

    y, stats = matmul_with_stats(xp, wp, tm=tm, tn=tn, tk=tk)

    # Training-mode BN finalize (per-channel, tiny, plain JAX).  Conv bias is
    # dropped: the batch-mean subtraction cancels any per-channel constant.
    # Padded M rows / K cols / out channels are exactly zero, so dividing by
    # the true M keeps the statistics exact.
    ssum = jnp.sum(stats[:, 0, :], axis=0)
    ssq = jnp.sum(stats[:, 1, :], axis=0)
    mean = ssum / M
    var = jnp.maximum(ssq / M - mean * mean, 0.0)
    gamma = _pad1d(cp["g"], Np, 1.0)
    beta = _pad1d(cp["be"], Np, 0.0)
    scale_v = gamma * jax.lax.rsqrt(var + eps)
    shift_v = beta - mean * scale_v
    scale = scale_v.reshape(1, Np)
    shift = shift_v.reshape(1, Np)

    res2d = None
    if residual is not None:
        # residual already carries Np channel-padded bf16 NHWC activations
        res2d = residual.reshape(M, Np).astype(jnp.bfloat16)
        if Mp != M:
            res2d = jnp.pad(res2d, ((0, Mp - M), (0, 0)))

    out = bn_act(y, scale, shift, res2d, relu=relu, tm=tm, tn=tn)
    # Keep channel-padded (lane-dense) activations flowing to the next layer.
    return out[:M].reshape(N, Ho, Wo, Np)


def maxpool_3x3_s2_p1(x_nhwc):
    """3x3 stride-2 pad-1 max pool as a plain-JAX maximum over 9 shifted
    strided views (no 9x stacked tensor, no extra HBM round trip)."""
    N, H, W, C = x_nhwc.shape
    neg = jnp.finfo(x_nhwc.dtype).min
    xp = jnp.pad(x_nhwc, ((0, 0), (1, 1), (1, 1), (0, 0)), constant_values=neg)
    Ho = (H - 1) // 2 + 1
    Wo = (W - 1) // 2 + 1
    out = None
    for i in range(3):
        for j in range(3):
            win = xp[:, i:i + 2 * (Ho - 1) + 1:2,
                     j:j + 2 * (Wo - 1) + 1:2, :]
            out = win if out is None else jnp.maximum(out, win)
    return out


def residual_block(x_nhwc, blk):
    h = conv_bn_act(x_nhwc, blk["conv1"], stride=blk["stride"], pad=1,
                    relu=True)
    if blk["bypass"] is not None:
        byp = conv_bn_act(x_nhwc, blk["bypass"], stride=blk["stride"], pad=0,
                          relu=False)
    else:
        byp = x_nhwc
    # conv2 -> BN -> (+ bypass) -> ReLU, fused in the epilogue kernel.
    return conv_bn_act(h, blk["conv2"], stride=1, pad=1, relu=True,
                       residual=byp)


def resnet_forward(params, x_nchw):
    x = jnp.transpose(x_nchw, (0, 2, 3, 1)).astype(jnp.bfloat16)  # NCHW->NHWC
    # block1: 7x7 s2 conv + BN + ReLU + 3x3 s2 maxpool
    x = conv_bn_act(x, params["stem"], stride=2, pad=3, relu=True)
    x = maxpool_3x3_s2_p1(x)
    # residual stages
    for stage in params["stages"]:
        for blk in stage:
            x = residual_block(x, blk)
    # head: AdaptiveMaxPool2d((1,1)) + Flatten (tiny -> plain jnp) + Linear
    feat = jnp.max(x, axis=(1, 2))                                # (N, Cp)
    return fc_layer(feat, params["fc_w"], params["fc_b"])


# ---------------------------------------------------------------------------
# Deterministic parameter construction (shapes mirror the PyTorch module)
# ---------------------------------------------------------------------------
def init_params(key, in_ch, arch, num_classes):
    keys = iter(jax.random.split(key, 512))

    def conv_p(cin, cout, k):
        return {
            "w": 0.1 * jax.random.normal(next(keys), (cout, cin, k, k),
                                         jnp.float32),
            "b": 0.05 * jax.random.normal(next(keys), (cout,), jnp.float32),
            "g": jnp.ones((cout,), jnp.float32),    # BN gamma (default init)
            "be": jnp.zeros((cout,), jnp.float32),  # BN beta  (default init)
        }

    params = {"stem": conv_p(in_ch, 64, 7), "stages": []}
    cin = 64
    for i, (num_residuals, cout) in enumerate(arch):
        stage = []
        for j in range(num_residuals):
            downsample = (j == 0 and i != 0)
            blk = {
                "stride": 2 if downsample else 1,
                "conv1": conv_p(cin if j == 0 else cout, cout, 3),
                "conv2": conv_p(cout, cout, 3),
                "bypass": conv_p(cin, cout, 1) if downsample else None,
            }
            stage.append(blk)
        params["stages"].append(stage)
        cin = cout
    params["fc_w"] = 0.1 * jax.random.normal(next(keys), (num_classes, cin),
                                             jnp.float32)
    params["fc_b"] = 0.05 * jax.random.normal(next(keys), (num_classes,),
                                              jnp.float32)
    return params


# ---------------------------------------------------------------------------
if __name__ == "__main__":
    key = jax.random.PRNGKey(0)
    k_param, k_input = jax.random.split(key)

    arch = [(2, 64), (2, 128)]   # small ResNet-ish: 2 stages of 2 blocks
    num_classes = 10
    batch, in_ch, hw = 2, 3, 32

    params = init_params(k_param, in_ch, arch, num_classes)
    x = jax.random.normal(k_input, (batch, in_ch, hw, hw), jnp.float32)

    fwd = jax.jit(lambda inp: resnet_forward(params, inp))
    logits = fwd(x)
    jax.block_until_ready(logits)

    assert logits.shape == (batch, num_classes)
    assert bool(jnp.all(jnp.isfinite(logits)))
    print("KERNEL_OK")
</pallas_src>

<mosaic_0001>
module attributes {stable_mosaic.version = 11 : i64} {
  func.func @_mm_stats_kernel(%arg0: i32, %arg1: i32, %arg2: i32, %arg3: memref<256x256xbf16, #tpu.memory_space<vmem>>, %arg4: memref<256x128xbf16, #tpu.memory_space<vmem>>, %arg5: memref<256x128xbf16, #tpu.memory_space<vmem>>, %arg6: memref<1x8x128xf32, #tpu.memory_space<vmem>>, %arg7: memref<256x128xf32, #tpu.memory_space<vmem>>) attributes {dimension_semantics = [#tpu.dimension_semantics<parallel>, #tpu.dimension_semantics<parallel>, #tpu.dimension_semantics<arbitrary>], iteration_bounds = array<i64: 2, 1, 1>, scalar_prefetch = 0 : i64, scratch_operands = 1 : i64, tpu.core_type = #tpu.core_type<tc>, window_params = [{transform_indices = @transform_0, window_bounds = array<i64: 256, 256>}, {transform_indices = @transform_1, window_bounds = array<i64: 256, 128>}, {transform_indices = @transform_2, window_bounds = array<i64: 256, 128>}, {transform_indices = @transform_3, window_bounds = array<i64: 1, 8, 128>}]} {
    %c0_i32 = arith.constant 0 : i32
    %0 = arith.cmpi eq, %arg2, %c0_i32 : i32
    %1 = arith.extui %0 : i1 to i32
    %c0_i32_0 = arith.constant 0 : i32
    %2 = arith.cmpi ne, %1, %c0_i32_0 : i32
    scf.if %2 {
      %cst_10 = arith.constant 0.000000e+00 : f32
      %12 = vector.broadcast %cst_10 : f32 to vector<256x128xf32>
      %c0_11 = arith.constant 0 : index
      %c0_12 = arith.constant 0 : index
      %13 = vector.load %arg7[%c0_11, %c0_12] : memref<256x128xf32, #tpu.memory_space<vmem>>, vector<256x128xf32>
      tpu.vector_store %arg7[%c0_11, %c0_12], %12 {strides = array<i32>} : memref<256x128xf32, #tpu.memory_space<vmem>>, vector<256x128xf32>,
    } else {
    }
    %c0 = arith.constant 0 : index
    %c0_1 = arith.constant 0 : index
    %3 = vector.load %arg7[%c0, %c0_1] : memref<256x128xf32, #tpu.memory_space<vmem>>, vector<256x128xf32>
    %c0_2 = arith.constant 0 : index
    %c0_3 = arith.constant 0 : index
    %4 = vector.load %arg3[%c0_2, %c0_3] : memref<256x256xbf16, #tpu.memory_space<vmem>>, vector<256x256xbf16>
    %c0_4 = arith.constant 0 : index
    %c0_5 = arith.constant 0 : index
    %5 = vector.load %arg4[%c0_4, %c0_5] : memref<256x128xbf16, #tpu.memory_space<vmem>>, vector<256x128xbf16>
    %cst = arith.constant dense<0.000000e+00> : vector<256x128xf32>
    %6 = tpu.matmul %4, %5, %cst {dimension_numbers = #tpu.dot_dimension_numbers<[1], [0], [0], [1], [0, 0, 1, 1], [], []>} : vector<256x256xbf16>, vector<256x128xbf16>, vector<256x128xf32> -> vector<256x128xf32>
    %7 = arith.addf %3, %6 : vector<256x128xf32>
    %c0_6 = arith.constant 0 : index
    %c0_7 = arith.constant 0 : index
    %8 = vector.load %arg7[%c0_6, %c0_7] : memref<256x128xf32, #tpu.memory_space<vmem>>, vector<256x128xf32>
    tpu.vector_store %arg7[%c0_6, %c0_7], %7 {strides = array<i32>} : memref<256x128xf32, #tpu.memory_space<vmem>>, vector<256x128xf32>,
    %c0_i32_8 = arith.constant 0 : i32
    %9 = arith.cmpi eq, %arg2, %c0_i32_8 : i32
    %10 = arith.extui %9 : i1 to i32
    %c0_i32_9 = arith.constant 0 : i32
    %11 = arith.cmpi ne, %10, %c0_i32_9 : i32
    scf.if %11 {
      %c0_10 = arith.constant 0 : index
      %c0_11 = arith.constant 0 : index
      %12 = vector.load %arg7[%c0_10, %c0_11] : memref<256x128xf32, #tpu.memory_space<vmem>>, vector<256x128xf32>
      %13 = arith.truncf %12 : vector<256x128xf32> to vector<256x128xbf16>
      %c0_12 = arith.constant 0 : index
      %c0_13 = arith.constant 0 : index
      %14 = vector.load %arg5[%c0_12, %c0_13] : memref<256x128xbf16, #tpu.memory_space<vmem>>, vector<256x128xbf16>
      tpu.vector_store %arg5[%c0_12, %c0_13], %13 {strides = array<i32>} : memref<256x128xbf16, #tpu.memory_space<vmem>>, vector<256x128xbf16>,
      %cst_14 = arith.constant dense<0.000000e+00> : vector<128xf32>
      %15 = vector.multi_reduction <add>, %12, %cst_14 [0] : vector<256x128xf32> to vector<128xf32>
      %16 = vector.shape_cast %15 : vector<128xf32> to vector<1x128xf32>
      %c0_15 = arith.constant 0 : index
      %c0_16 = arith.constant 0 : index
      %c0_17 = arith.constant 0 : index
      %17 = vector.load %arg6[%c0_15, %c0_16, %c0_17] : memref<1x8x128xf32, #tpu.memory_space<vmem>>, vector<1x1x128xf32>
      %18 = vector.shape_cast %17 : vector<1x1x128xf32> to vector<1x128xf32>
      %19 = vector.shape_cast %16 : vector<1x128xf32> to vector<1x1x128xf32>
      tpu.vector_store %arg6[%c0_15, %c0_16, %c0_17], %19 {strides = array<i32>} : memref<1x8x128xf32, #tpu.memory_space<vmem>>, vector<1x1x128xf32>,
      %20 = arith.mulf %12, %12 : vector<256x128xf32>
      %cst_18 = arith.constant dense<0.000000e+00> : vector<128xf32>
      %21 = vector.multi_reduction <add>, %20, %cst_18 [0] : vector<256x128xf32> to vector<128xf32>
      %22 = vector.shape_cast %21 : vector<128xf32> to vector<1x128xf32>
      %c0_19 = arith.constant 0 : index
      %c1 = arith.constant 1 : index
      %c0_20 = arith.constant 0 : index
      %23 = vector.load %arg6[%c0_19, %c1, %c0_20] : memref<1x8x128xf32, #tpu.memory_space<vmem>>, vector<1x1x128xf32>
      %24 = vector.shape_cast %23 : vector<1x1x128xf32> to vector<1x128xf32>
      %25 = vector.shape_cast %22 : vector<1x128xf32> to vector<1x1x128xf32>
      tpu.vector_store %arg6[%c0_19, %c1, %c0_20], %25 {strides = array<i32>} : memref<1x8x128xf32, #tpu.memory_space<vmem>>, vector<1x1x128xf32>,
    } else {
    }
    return
  }
  func.func @transform_0(%arg0: i32, %arg1: i32, %arg2: i32) -> (i32, i32) {
    %c0_i32 = arith.constant 0 : i32
    return %arg0, %arg2 : i32, i32
  }
  func.func @transform_1(%arg0: i32, %arg1: i32, %arg2: i32) -> (i32, i32) {
    %c0_i32 = arith.constant 0 : i32
    return %arg2, %arg1 : i32, i32
  }
  func.func @transform_2(%arg0: i32, %arg1: i32, %arg2: i32) -> (i32, i32) {
    %c0_i32 = arith.constant 0 : i32
    return %arg0, %arg1 : i32, i32
  }
  func.func @transform_3(%arg0: i32, %arg1: i32, %arg2: i32) -> (i32, i32, i32) {
    %c0_i32 = arith.constant 0 : i32
    %c0_i32_0 = arith.constant 0 : i32
    return %arg0, %c0_i32, %arg1 : i32, i32, i32
  }
}

module attributes {stable_mosaic.version = 11 : i64} {
  func.func @_bn_act_kernel(%arg0: i32, %arg1: i32, %arg2: memref<256x128xbf16, #tpu.memory_space<vmem>>, %arg3: memref<1x128xf32, #tpu.memory_space<vmem>>, %arg4: memref<1x128xf32, #tpu.memory_space<vmem>>, %arg5: memref<256x128xbf16, #tpu.memory_space<vmem>>) attributes {dimension_semantics = [#tpu.dimension_semantics<parallel>, #tpu.dimension_semantics<parallel>], iteration_bounds = array<i64: 2, 1>, scalar_prefetch = 0 : i64, scratch_operands = 0 : i64, tpu.core_type = #tpu.core_type<tc>, window_params = [{transform_indices = @transform_0, window_bounds = array<i64: 256, 128>}, {transform_indices = @transform_1, window_bounds = array<i64: 1, 128>}, {transform_indices = @transform_2, window_bounds = array<i64: 1, 128>}, {transform_indices = @transform_3, window_bounds = array<i64: 256, 128>}]} {
    %c0 = arith.constant 0 : index
    %c0_0 = arith.constant 0 : index
    %0 = vector.load %arg2[%c0, %c0_0] : memref<256x128xbf16, #tpu.memory_space<vmem>>, vector<256x128xbf16>
    %1 = arith.extf %0 : vector<256x128xbf16> to vector<256x128xf32>
    %c0_1 = arith.constant 0 : index
    %c0_2 = arith.constant 0 : index
    %2 = vector.load %arg3[%c0_1, %c0_2] : memref<1x128xf32, #tpu.memory_space<vmem>>, vector<1x128xf32>
    %3 = vector.broadcast %2 : vector<1x128xf32> to vector<256x128xf32>
    %4 = arith.mulf %1, %3 : vector<256x128xf32>
    %c0_3 = arith.constant 0 : index
    %c0_4 = arith.constant 0 : index
    %5 = vector.load %arg4[%c0_3, %c0_4] : memref<1x128xf32, #tpu.memory_space<vmem>>, vector<1x128xf32>
    %6 = vector.broadcast %5 : vector<1x128xf32> to vector<256x128xf32>
    %7 = arith.addf %4, %6 : vector<256x128xf32>
    %cst = arith.constant 0.000000e+00 : f32
    %8 = vector.broadcast %cst : f32 to vector<256x128xf32>
    %9 = arith.maximumf %7, %8 : vector<256x128xf32>
    %10 = arith.truncf %9 : vector<256x128xf32> to vector<256x128xbf16>
    %c0_5 = arith.constant 0 : index
    %c0_6 = arith.constant 0 : index
    %11 = vector.load %arg5[%c0_5, %c0_6] : memref<256x128xbf16, #tpu.memory_space<vmem>>, vector<256x128xbf16>
    tpu.vector_store %arg5[%c0_5, %c0_6], %10 {strides = array<i32>} : memref<256x128xbf16, #tpu.memory_space<vmem>>, vector<256x128xbf16>,
    return
  }
  func.func @transform_0(%arg0: i32, %arg1: i32) -> (i32, i32) {
    %c0_i32 = arith.constant 0 : i32
    return %arg0, %arg1 : i32, i32
  }
  func.func @transform_1(%arg0: i32, %arg1: i32) -> (i32, i32) {
    %c0_i32 = arith.constant 0 : i32
    %c0_i32_0 = arith.constant 0 : i32
    return %c0_i32, %arg1 : i32, i32
  }
  func.func @transform_2(%arg0: i32, %arg1: i32) -> (i32, i32) {
    %c0_i32 = arith.constant 0 : i32
    %c0_i32_0 = arith.constant 0 : i32
    return %c0_i32, %arg1 : i32, i32
  }
  func.func @transform_3(%arg0: i32, %arg1: i32) -> (i32, i32) {
    %c0_i32 = arith.constant 0 : i32
    return %arg0, %arg1 : i32, i32
  }
}

module attributes {stable_mosaic.version = 11 : i64} {
  func.func @_mm_stats_kernel(%arg0: i32, %arg1: i32, %arg2: i32, %arg3: memref<64x384xbf16, #tpu.memory_space<vmem>>, %arg4: memref<384x128xbf16, #tpu.memory_space<vmem>>, %arg5: memref<64x128xbf16, #tpu.memory_space<vmem>>, %arg6: memref<1x8x128xf32, #tpu.memory_space<vmem>>, %arg7: memref<64x128xf32, #tpu.memory_space<vmem>>) attributes {dimension_semantics = [#tpu.dimension_semantics<parallel>, #tpu.dimension_semantics<parallel>, #tpu.dimension_semantics<arbitrary>], iteration_bounds = array<i64: 2, 1, 3>, scalar_prefetch = 0 : i64, scratch_operands = 1 : i64, tpu.core_type = #tpu.core_type<tc>, window_params = [{transform_indices = @transform_0, window_bounds = array<i64: 64, 384>}, {transform_indices = @transform_1, window_bounds = array<i64: 384, 128>}, {transform_indices = @transform_2, window_bounds = array<i64: 64, 128>}, {transform_indices = @transform_3, window_bounds = array<i64: 1, 8, 128>}]} {
    %c0_i32 = arith.constant 0 : i32
    %0 = arith.cmpi eq, %arg2, %c0_i32 : i32
    %1 = arith.extui %0 : i1 to i32
    %c0_i32_0 = arith.constant 0 : i32
    %2 = arith.cmpi ne, %1, %c0_i32_0 : i32
    scf.if %2 {
      %cst_9 = arith.constant 0.000000e+00 : f32
      %12 = vector.broadcast %cst_9 : f32 to vector<64x128xf32>
      %c0_10 = arith.constant 0 : index
      %c0_11 = arith.constant 0 : index
      %13 = vector.load %arg7[%c0_10, %c0_11] : memref<64x128xf32, #tpu.memory_space<vmem>>, vector<64x128xf32>
      tpu.vector_store %arg7[%c0_10, %c0_11], %12 {strides = array<i32>} : memref<64x128xf32, #tpu.memory_space<vmem>>, vector<64x128xf32>,
    } else {
    }
    %c0 = arith.constant 0 : index
    %c0_1 = arith.constant 0 : index
    %3 = vector.load %arg7[%c0, %c0_1] : memref<64x128xf32, #tpu.memory_space<vmem>>, vector<64x128xf32>
    %c0_2 = arith.constant 0 : index
    %c0_3 = arith.constant 0 : index
    %4 = vector.load %arg3[%c0_2, %c0_3] : memref<64x384xbf16, #tpu.memory_space<vmem>>, vector<64x384xbf16>
    %c0_4 = arith.constant 0 : index
    %c0_5 = arith.constant 0 : index
    %5 = vector.load %arg4[%c0_4, %c0_5] : memref<384x128xbf16, #tpu.memory_space<vmem>>, vector<384x128xbf16>
    %cst = arith.constant dense<0.000000e+00> : vector<64x128xf32>
    %6 = tpu.matmul %4, %5, %cst {dimension_numbers = #tpu.dot_dimension_numbers<[1], [0], [0], [1], [0, 0, 1, 1], [], []>} : vector<64x384xbf16>, vector<384x128xbf16>, vector<64x128xf32> -> vector<64x128xf32>
    %7 = arith.addf %3, %6 : vector<64x128xf32>
    %c0_6 = arith.constant 0 : index
    %c0_7 = arith.constant 0 : index
    %8 = vector.load %arg7[%c0_6, %c0_7] : memref<64x128xf32, #tpu.memory_space<vmem>>, vector<64x128xf32>
    tpu.vector_store %arg7[%c0_6, %c0_7], %7 {strides = array<i32>} : memref<64x128xf32, #tpu.memory_space<vmem>>, vector<64x128xf32>,
    %c2_i32 = arith.constant 2 : i32
    %9 = arith.cmpi eq, %arg2, %c2_i32 : i32
    %10 = arith.extui %9 : i1 to i32
    %c0_i32_8 = arith.constant 0 : i32
    %11 = arith.cmpi ne, %10, %c0_i32_8 : i32
    scf.if %11 {
      %c0_9 = arith.constant 0 : index
      %c0_10 = arith.constant 0 : index
      %12 = vector.load %arg7[%c0_9, %c0_10] : memref<64x128xf32, #tpu.memory_space<vmem>>, vector<64x128xf32>
      %13 = arith.truncf %12 : vector<64x128xf32> to vector<64x128xbf16>
      %c0_11 = arith.constant 0 : index
      %c0_12 = arith.constant 0 : index
      %14 = vector.load %arg5[%c0_11, %c0_12] : memref<64x128xbf16, #tpu.memory_space<vmem>>, vector<64x128xbf16>
      tpu.vector_store %arg5[%c0_11, %c0_12], %13 {strides = array<i32>} : memref<64x128xbf16, #tpu.memory_space<vmem>>, vector<64x128xbf16>,
      %cst_13 = arith.constant dense<0.000000e+00> : vector<128xf32>
      %15 = vector.multi_reduction <add>, %12, %cst_13 [0] : vector<64x128xf32> to vector<128xf32>
      %16 = vector.shape_cast %15 : vector<128xf32> to vector<1x128xf32>
      %c0_14 = arith.constant 0 : index
      %c0_15 = arith.constant 0 : index
      %c0_16 = arith.constant 0 : index
      %17 = vector.load %arg6[%c0_14, %c0_15, %c0_16] : memref<1x8x128xf32, #tpu.memory_space<vmem>>, vector<1x1x128xf32>
      %18 = vector.shape_cast %17 : vector<1x1x128xf32> to vector<1x128xf32>
      %19 = vector.shape_cast %16 : vector<1x128xf32> to vector<1x1x128xf32>
      tpu.vector_store %arg6[%c0_14, %c0_15, %c0_16], %19 {strides = array<i32>} : memref<1x8x128xf32, #tpu.memory_space<vmem>>, vector<1x1x128xf32>,
      %20 = arith.mulf %12, %12 : vector<64x128xf32>
      %cst_17 = arith.constant dense<0.000000e+00> : vector<128xf32>
      %21 = vector.multi_reduction <add>, %20, %cst_17 [0] : vector<64x128xf32> to vector<128xf32>
      %22 = vector.shape_cast %21 : vector<128xf32> to vector<1x128xf32>
      %c0_18 = arith.constant 0 : index
      %c1 = arith.constant 1 : index
      %c0_19 = arith.constant 0 : index
      %23 = vector.load %arg6[%c0_18, %c1, %c0_19] : memref<1x8x128xf32, #tpu.memory_space<vmem>>, vector<1x1x128xf32>
      %24 = vector.shape_cast %23 : vector<1x1x128xf32> to vector<1x128xf32>
      %25 = vector.shape_cast %22 : vector<1x128xf32> to vector<1x1x128xf32>
      tpu.vector_store %arg6[%c0_18, %c1, %c0_19], %25 {strides = array<i32>} : memref<1x8x128xf32, #tpu.memory_space<vmem>>, vector<1x1x128xf32>,
    } else {
    }
    return
  }
  func.func @transform_0(%arg0: i32, %arg1: i32, %arg2: i32) -> (i32, i32) {
    %c0_i32 = arith.constant 0 : i32
    return %arg0, %arg2 : i32, i32
  }
  func.func @transform_1(%arg0: i32, %arg1: i32, %arg2: i32) -> (i32, i32) {
    %c0_i32 = arith.constant 0 : i32
    return %arg2, %arg1 : i32, i32
  }
  func.func @transform_2(%arg0: i32, %arg1: i32, %arg2: i32) -> (i32, i32) {
    %c0_i32 = arith.constant 0 : i32
    return %arg0, %arg1 : i32, i32
  }
  func.func @transform_3(%arg0: i32, %arg1: i32, %arg2: i32) -> (i32, i32, i32) {
    %c0_i32 = arith.constant 0 : i32
    %c0_i32_0 = arith.constant 0 : i32
    return %arg0, %c0_i32, %arg1 : i32, i32, i32
  }
}

module attributes {stable_mosaic.version = 11 : i64} {
  func.func @_bn_act_kernel(%arg0: i32, %arg1: i32, %arg2: memref<64x128xbf16, #tpu.memory_space<vmem>>, %arg3: memref<1x128xf32, #tpu.memory_space<vmem>>, %arg4: memref<1x128xf32, #tpu.memory_space<vmem>>, %arg5: memref<64x128xbf16, #tpu.memory_space<vmem>>) attributes {dimension_semantics = [#tpu.dimension_semantics<parallel>, #tpu.dimension_semantics<parallel>], iteration_bounds = array<i64: 2, 1>, scalar_prefetch = 0 : i64, scratch_operands = 0 : i64, tpu.core_type = #tpu.core_type<tc>, window_params = [{transform_indices = @transform_0, window_bounds = array<i64: 64, 128>}, {transform_indices = @transform_1, window_bounds = array<i64: 1, 128>}, {transform_indices = @transform_2, window_bounds = array<i64: 1, 128>}, {transform_indices = @transform_3, window_bounds = array<i64: 64, 128>}]} {
    %c0 = arith.constant 0 : index
    %c0_0 = arith.constant 0 : index
    %0 = vector.load %arg2[%c0, %c0_0] : memref<64x128xbf16, #tpu.memory_space<vmem>>, vector<64x128xbf16>
    %1 = arith.extf %0 : vector<64x128xbf16> to vector<64x128xf32>
    %c0_1 = arith.constant 0 : index
    %c0_2 = arith.constant 0 : index
    %2 = vector.load %arg3[%c0_1, %c0_2] : memref<1x128xf32, #tpu.memory_space<vmem>>, vector<1x128xf32>
    %3 = vector.broadcast %2 : vector<1x128xf32> to vector<64x128xf32>
    %4 = arith.mulf %1, %3 : vector<64x128xf32>
    %c0_3 = arith.constant 0 : index
    %c0_4 = arith.constant 0 : index
    %5 = vector.load %arg4[%c0_3, %c0_4] : memref<1x128xf32, #tpu.memory_space<vmem>>, vector<1x128xf32>
    %6 = vector.broadcast %5 : vector<1x128xf32> to vector<64x128xf32>
    %7 = arith.addf %4, %6 : vector<64x128xf32>
    %cst = arith.constant 0.000000e+00 : f32
    %8 = vector.broadcast %cst : f32 to vector<64x128xf32>
    %9 = arith.maximumf %7, %8 : vector<64x128xf32>
    %10 = arith.truncf %9 : vector<64x128xf32> to vector<64x128xbf16>
    %c0_5 = arith.constant 0 : index
    %c0_6 = arith.constant 0 : index
    %11 = vector.load %arg5[%c0_5, %c0_6] : memref<64x128xbf16, #tpu.memory_space<vmem>>, vector<64x128xbf16>
    tpu.vector_store %arg5[%c0_5, %c0_6], %10 {strides = array<i32>} : memref<64x128xbf16, #tpu.memory_space<vmem>>, vector<64x128xbf16>,
    return
  }
  func.func @transform_0(%arg0: i32, %arg1: i32) -> (i32, i32) {
    %c0_i32 = arith.constant 0 : i32
    return %arg0, %arg1 : i32, i32
  }
  func.func @transform_1(%arg0: i32, %arg1: i32) -> (i32, i32) {
    %c0_i32 = arith.constant 0 : i32
    %c0_i32_0 = arith.constant 0 : i32
    return %c0_i32, %arg1 : i32, i32
  }
  func.func @transform_2(%arg0: i32, %arg1: i32) -> (i32, i32) {
    %c0_i32 = arith.constant 0 : i32
    %c0_i32_0 = arith.constant 0 : i32
    return %c0_i32, %arg1 : i32, i32
  }
  func.func @transform_3(%arg0: i32, %arg1: i32) -> (i32, i32) {
    %c0_i32 = arith.constant 0 : i32
    return %arg0, %arg1 : i32, i32
  }
}

module attributes {stable_mosaic.version = 11 : i64} {
  func.func @_mm_stats_kernel(%arg0: i32, %arg1: i32, %arg2: i32, %arg3: memref<16x128xbf16, #tpu.memory_space<vmem>>, %arg4: memref<128x128xbf16, #tpu.memory_space<vmem>>, %arg5: memref<16x128xbf16, #tpu.memory_space<vmem>>, %arg6: memref<1x8x128xf32, #tpu.memory_space<vmem>>, %arg7: memref<16x128xf32, #tpu.memory_space<vmem>>) attributes {dimension_semantics = [#tpu.dimension_semantics<parallel>, #tpu.dimension_semantics<parallel>, #tpu.dimension_semantics<arbitrary>], iteration_bounds = array<i64: 2, 1, 1>, scalar_prefetch = 0 : i64, scratch_operands = 1 : i64, tpu.core_type = #tpu.core_type<tc>, window_params = [{transform_indices = @transform_0, window_bounds = array<i64: 16, 128>}, {transform_indices = @transform_1, window_bounds = array<i64: 128, 128>}, {transform_indices = @transform_2, window_bounds = array<i64: 16, 128>}, {transform_indices = @transform_3, window_bounds = array<i64: 1, 8, 128>}]} {
    %c0_i32 = arith.constant 0 : i32
    %0 = arith.cmpi eq, %arg2, %c0_i32 : i32
    %1 = arith.extui %0 : i1 to i32
    %c0_i32_0 = arith.constant 0 : i32
    %2 = arith.cmpi ne, %1, %c0_i32_0 : i32
    scf.if %2 {
      %cst_10 = arith.constant 0.000000e+00 : f32
      %12 = vector.broadcast %cst_10 : f32 to vector<16x128xf32>
      %c0_11 = arith.constant 0 : index
      %c0_12 = arith.constant 0 : index
      %13 = vector.load %arg7[%c0_11, %c0_12] : memref<16x128xf32, #tpu.memory_space<vmem>>, vector<16x128xf32>
      tpu.vector_store %arg7[%c0_11, %c0_12], %12 {strides = array<i32>} : memref<16x128xf32, #tpu.memory_space<vmem>>, vector<16x128xf32>,
    } else {
    }
    %c0 = arith.constant 0 : index
    %c0_1 = arith.constant 0 : index
    %3 = vector.load %arg7[%c0, %c0_1] : memref<16x128xf32, #tpu.memory_space<vmem>>, vector<16x128xf32>
    %c0_2 = arith.constant 0 : index
    %c0_3 = arith.constant 0 : index
    %4 = vector.load %arg3[%c0_2, %c0_3] : memref<16x128xbf16, #tpu.memory_space<vmem>>, vector<16x128xbf16>
    %c0_4 = arith.constant 0 : index
    %c0_5 = arith.constant 0 : index
    %5 = vector.load %arg4[%c0_4, %c0_5] : memref<128x128xbf16, #tpu.memory_space<vmem>>, vector<128x128xbf16>
    %cst = arith.constant dense<0.000000e+00> : vector<16x128xf32>
    %6 = tpu.matmul %4, %5, %cst {dimension_numbers = #tpu.dot_dimension_numbers<[1], [0], [0], [1], [0, 0, 1, 1], [], []>} : vector<16x128xbf16>, vector<128x128xbf16>, vector<16x128xf32> -> vector<16x128xf32>
    %7 = arith.addf %3, %6 : vector<16x128xf32>
    %c0_6 = arith.constant 0 : index
    %c0_7 = arith.constant 0 : index
    %8 = vector.load %arg7[%c0_6, %c0_7] : memref<16x128xf32, #tpu.memory_space<vmem>>, vector<16x128xf32>
    tpu.vector_store %arg7[%c0_6, %c0_7], %7 {strides = array<i32>} : memref<16x128xf32, #tpu.memory_space<vmem>>, vector<16x128xf32>,
    %c0_i32_8 = arith.constant 0 : i32
    %9 = arith.cmpi eq, %arg2, %c0_i32_8 : i32
    %10 = arith.extui %9 : i1 to i32
    %c0_i32_9 = arith.constant 0 : i32
    %11 = arith.cmpi ne, %10, %c0_i32_9 : i32
    scf.if %11 {
      %c0_10 = arith.constant 0 : index
      %c0_11 = arith.constant 0 : index
      %12 = vector.load %arg7[%c0_10, %c0_11] : memref<16x128xf32, #tpu.memory_space<vmem>>, vector<16x128xf32>
      %13 = arith.truncf %12 : vector<16x128xf32> to vector<16x128xbf16>
      %c0_12 = arith.constant 0 : index
      %c0_13 = arith.constant 0 : index
      %14 = vector.load %arg5[%c0_12, %c0_13] : memref<16x128xbf16, #tpu.memory_space<vmem>>, vector<16x128xbf16>
      tpu.vector_store %arg5[%c0_12, %c0_13], %13 {strides = array<i32>} : memref<16x128xbf16, #tpu.memory_space<vmem>>, vector<16x128xbf16>,
      %cst_14 = arith.constant dense<0.000000e+00> : vector<128xf32>
      %15 = vector.multi_reduction <add>, %12, %cst_14 [0] : vector<16x128xf32> to vector<128xf32>
      %16 = vector.shape_cast %15 : vector<128xf32> to vector<1x128xf32>
      %c0_15 = arith.constant 0 : index
      %c0_16 = arith.constant 0 : index
      %c0_17 = arith.constant 0 : index
      %17 = vector.load %arg6[%c0_15, %c0_16, %c0_17] : memref<1x8x128xf32, #tpu.memory_space<vmem>>, vector<1x1x128xf32>
      %18 = vector.shape_cast %17 : vector<1x1x128xf32> to vector<1x128xf32>
      %19 = vector.shape_cast %16 : vector<1x128xf32> to vector<1x1x128xf32>
      tpu.vector_store %arg6[%c0_15, %c0_16, %c0_17], %19 {strides = array<i32>} : memref<1x8x128xf32, #tpu.memory_space<vmem>>, vector<1x1x128xf32>,
      %20 = arith.mulf %12, %12 : vector<16x128xf32>
      %cst_18 = arith.constant dense<0.000000e+00> : vector<128xf32>
      %21 = vector.multi_reduction <add>, %20, %cst_18 [0] : vector<16x128xf32> to vector<128xf32>
      %22 = vector.shape_cast %21 : vector<128xf32> to vector<1x128xf32>
      %c0_19 = arith.constant 0 : index
      %c1 = arith.constant 1 : index
      %c0_20 = arith.constant 0 : index
      %23 = vector.load %arg6[%c0_19, %c1, %c0_20] : memref<1x8x128xf32, #tpu.memory_space<vmem>>, vector<1x1x128xf32>
      %24 = vector.shape_cast %23 : vector<1x1x128xf32> to vector<1x128xf32>
      %25 = vector.shape_cast %22 : vector<1x128xf32> to vector<1x1x128xf32>
      tpu.vector_store %arg6[%c0_19, %c1, %c0_20], %25 {strides = array<i32>} : memref<1x8x128xf32, #tpu.memory_space<vmem>>, vector<1x1x128xf32>,
    } else {
    }
    return
  }
  func.func @transform_0(%arg0: i32, %arg1: i32, %arg2: i32) -> (i32, i32) {
    %c0_i32 = arith.constant 0 : i32
    return %arg0, %arg2 : i32, i32
  }
  func.func @transform_1(%arg0: i32, %arg1: i32, %arg2: i32) -> (i32, i32) {
    %c0_i32 = arith.constant 0 : i32
    return %arg2, %arg1 : i32, i32
  }
  func.func @transform_2(%arg0: i32, %arg1: i32, %arg2: i32) -> (i32, i32) {
    %c0_i32 = arith.constant 0 : i32
    return %arg0, %arg1 : i32, i32
  }
  func.func @transform_3(%arg0: i32, %arg1: i32, %arg2: i32) -> (i32, i32, i32) {
    %c0_i32 = arith.constant 0 : i32
    %c0_i32_0 = arith.constant 0 : i32
    return %arg0, %c0_i32, %arg1 : i32, i32, i32
  }
}

module attributes {stable_mosaic.version = 11 : i64} {
  func.func @_bn_add_relu_kernel(%arg0: i32, %arg1: i32, %arg2: memref<64x128xbf16, #tpu.memory_space<vmem>>, %arg3: memref<1x128xf32, #tpu.memory_space<vmem>>, %arg4: memref<1x128xf32, #tpu.memory_space<vmem>>, %arg5: memref<64x128xbf16, #tpu.memory_space<vmem>>, %arg6: memref<64x128xbf16, #tpu.memory_space<vmem>>) attributes {dimension_semantics = [#tpu.dimension_semantics<parallel>, #tpu.dimension_semantics<parallel>], iteration_bounds = array<i64: 2, 1>, scalar_prefetch = 0 : i64, scratch_operands = 0 : i64, tpu.core_type = #tpu.core_type<tc>, window_params = [{transform_indices = @transform_0, window_bounds = array<i64: 64, 128>}, {transform_indices = @transform_1, window_bounds = array<i64: 1, 128>}, {transform_indices = @transform_2, window_bounds = array<i64: 1, 128>}, {transform_indices = @transform_3, window_bounds = array<i64: 64, 128>}, {transform_indices = @transform_4, window_bounds = array<i64: 64, 128>}]} {
    %c0 = arith.constant 0 : index
    %c0_0 = arith.constant 0 : index
    %0 = vector.load %arg2[%c0, %c0_0] : memref<64x128xbf16, #tpu.memory_space<vmem>>, vector<64x128xbf16>
    %1 = arith.extf %0 : vector<64x128xbf16> to vector<64x128xf32>
    %c0_1 = arith.constant 0 : index
    %c0_2 = arith.constant 0 : index
    %2 = vector.load %arg3[%c0_1, %c0_2] : memref<1x128xf32, #tpu.memory_space<vmem>>, vector<1x128xf32>
    %3 = vector.broadcast %2 : vector<1x128xf32> to vector<64x128xf32>
    %4 = arith.mulf %1, %3 : vector<64x128xf32>
    %c0_3 = arith.constant 0 : index
    %c0_4 = arith.constant 0 : index
    %5 = vector.load %arg4[%c0_3, %c0_4] : memref<1x128xf32, #tpu.memory_space<vmem>>, vector<1x128xf32>
    %6 = vector.broadcast %5 : vector<1x128xf32> to vector<64x128xf32>
    %7 = arith.addf %4, %6 : vector<64x128xf32>
    %c0_5 = arith.constant 0 : index
    %c0_6 = arith.constant 0 : index
    %8 = vector.load %arg5[%c0_5, %c0_6] : memref<64x128xbf16, #tpu.memory_space<vmem>>, vector<64x128xbf16>
    %9 = arith.extf %8 : vector<64x128xbf16> to vector<64x128xf32>
    %10 = arith.addf %7, %9 : vector<64x128xf32>
    %cst = arith.constant 0.000000e+00 : f32
    %11 = vector.broadcast %cst : f32 to vector<64x128xf32>
    %12 = arith.maximumf %10, %11 : vector<64x128xf32>
    %13 = arith.truncf %12 : vector<64x128xf32> to vector<64x128xbf16>
    %c0_7 = arith.constant 0 : index
    %c0_8 = arith.constant 0 : index
    %14 = vector.load %arg6[%c0_7, %c0_8] : memref<64x128xbf16, #tpu.memory_space<vmem>>, vector<64x128xbf16>
    tpu.vector_store %arg6[%c0_7, %c0_8], %13 {strides = array<i32>} : memref<64x128xbf16, #tpu.memory_space<vmem>>, vector<64x128xbf16>,
    return
  }
  func.func @transform_0(%arg0: i32, %arg1: i32) -> (i32, i32) {
    %c0_i32 = arith.constant 0 : i32
    return %arg0, %arg1 : i32, i32
  }
  func.func @transform_1(%arg0: i32, %arg1: i32) -> (i32, i32) {
    %c0_i32 = arith.constant 0 : i32
    %c0_i32_0 = arith.constant 0 : i32
    return %c0_i32, %arg1 : i32, i32
  }
  func.func @transform_2(%arg0: i32, %arg1: i32) -> (i32, i32) {
    %c0_i32 = arith.constant 0 : i32
    %c0_i32_0 = arith.constant 0 : i32
    return %c0_i32, %arg1 : i32, i32
  }
  func.func @transform_3(%arg0: i32, %arg1: i32) -> (i32, i32) {
    %c0_i32 = arith.constant 0 : i32
    return %arg0, %arg1 : i32, i32
  }
  func.func @transform_4(%arg0: i32, %arg1: i32) -> (i32, i32) {
    %c0_i32 = arith.constant 0 : i32
    return %arg0, %arg1 : i32, i32
  }
}

module attributes {stable_mosaic.version = 11 : i64} {
  func.func @_bn_act_kernel(%arg0: i32, %arg1: i32, %arg2: memref<16x128xbf16, #tpu.memory_space<vmem>>, %arg3: memref<1x128xf32, #tpu.memory_space<vmem>>, %arg4: memref<1x128xf32, #tpu.memory_space<vmem>>, %arg5: memref<16x128xbf16, #tpu.memory_space<vmem>>) attributes {dimension_semantics = [#tpu.dimension_semantics<parallel>, #tpu.dimension_semantics<parallel>], iteration_bounds = array<i64: 2, 1>, scalar_prefetch = 0 : i64, scratch_operands = 0 : i64, tpu.core_type = #tpu.core_type<tc>, window_params = [{transform_indices = @transform_0, window_bounds = array<i64: 16, 128>}, {transform_indices = @transform_1, window_bounds = array<i64: 1, 128>}, {transform_indices = @transform_2, window_bounds = array<i64: 1, 128>}, {transform_indices = @transform_3, window_bounds = array<i64: 16, 128>}]} {
    %c0 = arith.constant 0 : index
    %c0_0 = arith.constant 0 : index
    %0 = vector.load %arg2[%c0, %c0_0] : memref<16x128xbf16, #tpu.memory_space<vmem>>, vector<16x128xbf16>
    %1 = arith.extf %0 : vector<16x128xbf16> to vector<16x128xf32>
    %c0_1 = arith.constant 0 : index
    %c0_2 = arith.constant 0 : index
    %2 = vector.load %arg3[%c0_1, %c0_2] : memref<1x128xf32, #tpu.memory_space<vmem>>, vector<1x128xf32>
    %3 = vector.broadcast %2 : vector<1x128xf32> to vector<16x128xf32>
    %4 = arith.mulf %1, %3 : vector<16x128xf32>
    %c0_3 = arith.constant 0 : index
    %c0_4 = arith.constant 0 : index
    %5 = vector.load %arg4[%c0_3, %c0_4] : memref<1x128xf32, #tpu.memory_space<vmem>>, vector<1x128xf32>
    %6 = vector.broadcast %5 : vector<1x128xf32> to vector<16x128xf32>
    %7 = arith.addf %4, %6 : vector<16x128xf32>
    %8 = arith.truncf %7 : vector<16x128xf32> to vector<16x128xbf16>
    %c0_5 = arith.constant 0 : index
    %c0_6 = arith.constant 0 : index
    %9 = vector.load %arg5[%c0_5, %c0_6] : memref<16x128xbf16, #tpu.memory_space<vmem>>, vector<16x128xbf16>
    tpu.vector_store %arg5[%c0_5, %c0_6], %8 {strides = array<i32>} : memref<16x128xbf16, #tpu.memory_space<vmem>>, vector<16x128xbf16>,
    return
  }
  func.func @transform_0(%arg0: i32, %arg1: i32) -> (i32, i32) {
    %c0_i32 = arith.constant 0 : i32
    return %arg0, %arg1 : i32, i32
  }
  func.func @transform_1(%arg0: i32, %arg1: i32) -> (i32, i32) {
    %c0_i32 = arith.constant 0 : i32
    %c0_i32_0 = arith.constant 0 : i32
    return %c0_i32, %arg1 : i32, i32
  }
  func.func @transform_2(%arg0: i32, %arg1: i32) -> (i32, i32) {
    %c0_i32 = arith.constant 0 : i32
    %c0_i32_0 = arith.constant 0 : i32
    return %c0_i32, %arg1 : i32, i32
  }
  func.func @transform_3(%arg0: i32, %arg1: i32) -> (i32, i32) {
    %c0_i32 = arith.constant 0 : i32
    return %arg0, %arg1 : i32, i32
  }
}

module attributes {stable_mosaic.version = 11 : i64} {
  func.func @_bn_act_kernel(%arg0: i32, %arg1: i32, %arg2: memref<16x128xbf16, #tpu.memory_space<vmem>>, %arg3: memref<1x128xf32, #tpu.memory_space<vmem>>, %arg4: memref<1x128xf32, #tpu.memory_space<vmem>>, %arg5: memref<16x128xbf16, #tpu.memory_space<vmem>>) attributes {dimension_semantics = [#tpu.dimension_semantics<parallel>, #tpu.dimension_semantics<parallel>], iteration_bounds = array<i64: 2, 1>, scalar_prefetch = 0 : i64, scratch_operands = 0 : i64, tpu.core_type = #tpu.core_type<tc>, window_params = [{transform_indices = @transform_0, window_bounds = array<i64: 16, 128>}, {transform_indices = @transform_1, window_bounds = array<i64: 1, 128>}, {transform_indices = @transform_2, window_bounds = array<i64: 1, 128>}, {transform_indices = @transform_3, window_bounds = array<i64: 16, 128>}]} {
    %c0 = arith.constant 0 : index
    %c0_0 = arith.constant 0 : index
    %0 = vector.load %arg2[%c0, %c0_0] : memref<16x128xbf16, #tpu.memory_space<vmem>>, vector<16x128xbf16>
    %1 = arith.extf %0 : vector<16x128xbf16> to vector<16x128xf32>
    %c0_1 = arith.constant 0 : index
    %c0_2 = arith.constant 0 : index
    %2 = vector.load %arg3[%c0_1, %c0_2] : memref<1x128xf32, #tpu.memory_space<vmem>>, vector<1x128xf32>
    %3 = vector.broadcast %2 : vector<1x128xf32> to vector<16x128xf32>
    %4 = arith.mulf %1, %3 : vector<16x128xf32>
    %c0_3 = arith.constant 0 : index
    %c0_4 = arith.constant 0 : index
    %5 = vector.load %arg4[%c0_3, %c0_4] : memref<1x128xf32, #tpu.memory_space<vmem>>, vector<1x128xf32>
    %6 = vector.broadcast %5 : vector<1x128xf32> to vector<16x128xf32>
    %7 = arith.addf %4, %6 : vector<16x128xf32>
    %cst = arith.constant 0.000000e+00 : f32
    %8 = vector.broadcast %cst : f32 to vector<16x128xf32>
    %9 = arith.maximumf %7, %8 : vector<16x128xf32>
    %10 = arith.truncf %9 : vector<16x128xf32> to vector<16x128xbf16>
    %c0_5 = arith.constant 0 : index
    %c0_6 = arith.constant 0 : index
    %11 = vector.load %arg5[%c0_5, %c0_6] : memref<16x128xbf16, #tpu.memory_space<vmem>>, vector<16x128xbf16>
    tpu.vector_store %arg5[%c0_5, %c0_6], %10 {strides = array<i32>} : memref<16x128xbf16, #tpu.memory_space<vmem>>, vector<16x128xbf16>,
    return
  }
  func.func @transform_0(%arg0: i32, %arg1: i32) -> (i32, i32) {
    %c0_i32 = arith.constant 0 : i32
    return %arg0, %arg1 : i32, i32
  }
  func.func @transform_1(%arg0: i32, %arg1: i32) -> (i32, i32) {
    %c0_i32 = arith.constant 0 : i32
    %c0_i32_0 = arith.constant 0 : i32
    return %c0_i32, %arg1 : i32, i32
  }
  func.func @transform_2(%arg0: i32, %arg1: i32) -> (i32, i32) {
    %c0_i32 = arith.constant 0 : i32
    %c0_i32_0 = arith.constant 0 : i32
    return %c0_i32, %arg1 : i32, i32
  }
  func.func @transform_3(%arg0: i32, %arg1: i32) -> (i32, i32) {
    %c0_i32 = arith.constant 0 : i32
    return %arg0, %arg1 : i32, i32
  }
}

module attributes {stable_mosaic.version = 11 : i64} {
  func.func @_mm_stats_kernel(%arg0: i32, %arg1: i32, %arg2: i32, %arg3: memref<16x384xbf16, #tpu.memory_space<vmem>>, %arg4: memref<384x128xbf16, #tpu.memory_space<vmem>>, %arg5: memref<16x128xbf16, #tpu.memory_space<vmem>>, %arg6: memref<1x8x128xf32, #tpu.memory_space<vmem>>, %arg7: memref<16x128xf32, #tpu.memory_space<vmem>>) attributes {dimension_semantics = [#tpu.dimension_semantics<parallel>, #tpu.dimension_semantics<parallel>, #tpu.dimension_semantics<arbitrary>], iteration_bounds = array<i64: 2, 1, 3>, scalar_prefetch = 0 : i64, scratch_operands = 1 : i64, tpu.core_type = #tpu.core_type<tc>, window_params = [{transform_indices = @transform_0, window_bounds = array<i64: 16, 384>}, {transform_indices = @transform_1, window_bounds = array<i64: 384, 128>}, {transform_indices = @transform_2, window_bounds = array<i64: 16, 128>}, {transform_indices = @transform_3, window_bounds = array<i64: 1, 8, 128>}]} {
    %c0_i32 = arith.constant 0 : i32
    %0 = arith.cmpi eq, %arg2, %c0_i32 : i32
    %1 = arith.extui %0 : i1 to i32
    %c0_i32_0 = arith.constant 0 : i32
    %2 = arith.cmpi ne, %1, %c0_i32_0 : i32
    scf.if %2 {
      %cst_9 = arith.constant 0.000000e+00 : f32
      %12 = vector.broadcast %cst_9 : f32 to vector<16x128xf32>
      %c0_10 = arith.constant 0 : index
      %c0_11 = arith.constant 0 : index
      %13 = vector.load %arg7[%c0_10, %c0_11] : memref<16x128xf32, #tpu.memory_space<vmem>>, vector<16x128xf32>
      tpu.vector_store %arg7[%c0_10, %c0_11], %12 {strides = array<i32>} : memref<16x128xf32, #tpu.memory_space<vmem>>, vector<16x128xf32>,
    } else {
    }
    %c0 = arith.constant 0 : index
    %c0_1 = arith.constant 0 : index
    %3 = vector.load %arg7[%c0, %c0_1] : memref<16x128xf32, #tpu.memory_space<vmem>>, vector<16x128xf32>
    %c0_2 = arith.constant 0 : index
    %c0_3 = arith.constant 0 : index
    %4 = vector.load %arg3[%c0_2, %c0_3] : memref<16x384xbf16, #tpu.memory_space<vmem>>, vector<16x384xbf16>
    %c0_4 = arith.constant 0 : index
    %c0_5 = arith.constant 0 : index
    %5 = vector.load %arg4[%c0_4, %c0_5] : memref<384x128xbf16, #tpu.memory_space<vmem>>, vector<384x128xbf16>
    %cst = arith.constant dense<0.000000e+00> : vector<16x128xf32>
    %6 = tpu.matmul %4, %5, %cst {dimension_numbers = #tpu.dot_dimension_numbers<[1], [0], [0], [1], [0, 0, 1, 1], [], []>} : vector<16x384xbf16>, vector<384x128xbf16>, vector<16x128xf32> -> vector<16x128xf32>
    %7 = arith.addf %3, %6 : vector<16x128xf32>
    %c0_6 = arith.constant 0 : index
    %c0_7 = arith.constant 0 : index
    %8 = vector.load %arg7[%c0_6, %c0_7] : memref<16x128xf32, #tpu.memory_space<vmem>>, vector<16x128xf32>
    tpu.vector_store %arg7[%c0_6, %c0_7], %7 {strides = array<i32>} : memref<16x128xf32, #tpu.memory_space<vmem>>, vector<16x128xf32>,
    %c2_i32 = arith.constant 2 : i32
    %9 = arith.cmpi eq, %arg2, %c2_i32 : i32
    %10 = arith.extui %9 : i1 to i32
    %c0_i32_8 = arith.constant 0 : i32
    %11 = arith.cmpi ne, %10, %c0_i32_8 : i32
    scf.if %11 {
      %c0_9 = arith.constant 0 : index
      %c0_10 = arith.constant 0 : index
      %12 = vector.load %arg7[%c0_9, %c0_10] : memref<16x128xf32, #tpu.memory_space<vmem>>, vector<16x128xf32>
      %13 = arith.truncf %12 : vector<16x128xf32> to vector<16x128xbf16>
      %c0_11 = arith.constant 0 : index
      %c0_12 = arith.constant 0 : index
      %14 = vector.load %arg5[%c0_11, %c0_12] : memref<16x128xbf16, #tpu.memory_space<vmem>>, vector<16x128xbf16>
      tpu.vector_store %arg5[%c0_11, %c0_12], %13 {strides = array<i32>} : memref<16x128xbf16, #tpu.memory_space<vmem>>, vector<16x128xbf16>,
      %cst_13 = arith.constant dense<0.000000e+00> : vector<128xf32>
      %15 = vector.multi_reduction <add>, %12, %cst_13 [0] : vector<16x128xf32> to vector<128xf32>
      %16 = vector.shape_cast %15 : vector<128xf32> to vector<1x128xf32>
      %c0_14 = arith.constant 0 : index
      %c0_15 = arith.constant 0 : index
      %c0_16 = arith.constant 0 : index
      %17 = vector.load %arg6[%c0_14, %c0_15, %c0_16] : memref<1x8x128xf32, #tpu.memory_space<vmem>>, vector<1x1x128xf32>
      %18 = vector.shape_cast %17 : vector<1x1x128xf32> to vector<1x128xf32>
      %19 = vector.shape_cast %16 : vector<1x128xf32> to vector<1x1x128xf32>
      tpu.vector_store %arg6[%c0_14, %c0_15, %c0_16], %19 {strides = array<i32>} : memref<1x8x128xf32, #tpu.memory_space<vmem>>, vector<1x1x128xf32>,
      %20 = arith.mulf %12, %12 : vector<16x128xf32>
      %cst_17 = arith.constant dense<0.000000e+00> : vector<128xf32>
      %21 = vector.multi_reduction <add>, %20, %cst_17 [0] : vector<16x128xf32> to vector<128xf32>
      %22 = vector.shape_cast %21 : vector<128xf32> to vector<1x128xf32>
      %c0_18 = arith.constant 0 : index
      %c1 = arith.constant 1 : index
      %c0_19 = arith.constant 0 : index
      %23 = vector.load %arg6[%c0_18, %c1, %c0_19] : memref<1x8x128xf32, #tpu.memory_space<vmem>>, vector<1x1x128xf32>
      %24 = vector.shape_cast %23 : vector<1x1x128xf32> to vector<1x128xf32>
      %25 = vector.shape_cast %22 : vector<1x128xf32> to vector<1x1x128xf32>
      tpu.vector_store %arg6[%c0_18, %c1, %c0_19], %25 {strides = array<i32>} : memref<1x8x128xf32, #tpu.memory_space<vmem>>, vector<1x1x128xf32>,
    } else {
    }
    return
  }
  func.func @transform_0(%arg0: i32, %arg1: i32, %arg2: i32) -> (i32, i32) {
    %c0_i32 = arith.constant 0 : i32
    return %arg0, %arg2 : i32, i32
  }
  func.func @transform_1(%arg0: i32, %arg1: i32, %arg2: i32) -> (i32, i32) {
    %c0_i32 = arith.constant 0 : i32
    return %arg2, %arg1 : i32, i32
  }
  func.func @transform_2(%arg0: i32, %arg1: i32, %arg2: i32) -> (i32, i32) {
    %c0_i32 = arith.constant 0 : i32
    return %arg0, %arg1 : i32, i32
  }
  func.func @transform_3(%arg0: i32, %arg1: i32, %arg2: i32) -> (i32, i32, i32) {
    %c0_i32 = arith.constant 0 : i32
    %c0_i32_0 = arith.constant 0 : i32
    return %arg0, %c0_i32, %arg1 : i32, i32, i32
  }
}

module attributes {stable_mosaic.version = 11 : i64} {
  func.func @_fc_kernel(%arg0: i32, %arg1: memref<16x128xbf16, #tpu.memory_space<vmem>>, %arg2: memref<128x128xbf16, #tpu.memory_space<vmem>>, %arg3: memref<1x128xf32, #tpu.memory_space<vmem>>, %arg4: memref<16x128xf32, #tpu.memory_space<vmem>>) attributes {dimension_semantics = [#tpu.dimension_semantics<arbitrary>], iteration_bounds = array<i64: 1>, scalar_prefetch = 0 : i64, scratch_operands = 0 : i64, tpu.core_type = #tpu.core_type<tc>, window_params = [{pipeline_mode = #tpu.pipeline_mode<synchronous>, transform_indices = @transform_0, window_bounds = array<i64: 16, 128>}, {pipeline_mode = #tpu.pipeline_mode<synchronous>, transform_indices = @transform_1, window_bounds = array<i64: 128, 128>}, {pipeline_mode = #tpu.pipeline_mode<synchronous>, transform_indices = @transform_2, window_bounds = array<i64: 1, 128>}, {pipeline_mode = #tpu.pipeline_mode<synchronous>, transform_indices = @transform_3, window_bounds = array<i64: 16, 128>}]} {
    %c0 = arith.constant 0 : index
    %c0_0 = arith.constant 0 : index
    %0 = vector.load %arg1[%c0, %c0_0] : memref<16x128xbf16, #tpu.memory_space<vmem>>, vector<16x128xbf16>
    %c0_1 = arith.constant 0 : index
    %c0_2 = arith.constant 0 : index
    %1 = vector.load %arg2[%c0_1, %c0_2] : memref<128x128xbf16, #tpu.memory_space<vmem>>, vector<128x128xbf16>
    %cst = arith.constant dense<0.000000e+00> : vector<16x128xf32>
    %2 = tpu.matmul %0, %1, %cst {dimension_numbers = #tpu.dot_dimension_numbers<[1], [0], [0], [1], [0, 0, 1, 1], [], []>} : vector<16x128xbf16>, vector<128x128xbf16>, vector<16x128xf32> -> vector<16x128xf32>
    %c0_3 = arith.constant 0 : index
    %c0_4 = arith.constant 0 : index
    %3 = vector.load %arg3[%c0_3, %c0_4] : memref<1x128xf32, #tpu.memory_space<vmem>>, vector<1x128xf32>
    %4 = vector.broadcast %3 : vector<1x128xf32> to vector<16x128xf32>
    %5 = arith.addf %2, %4 : vector<16x128xf32>
    %c0_5 = arith.constant 0 : index
    %c0_6 = arith.constant 0 : index
    %6 = vector.load %arg4[%c0_5, %c0_6] : memref<16x128xf32, #tpu.memory_space<vmem>>, vector<16x128xf32>
    tpu.vector_store %arg4[%c0_5, %c0_6], %5 {strides = array<i32>} : memref<16x128xf32, #tpu.memory_space<vmem>>, vector<16x128xf32>,
    return
  }
  func.func @transform_0(%arg0: i32) -> (i32, i32) {
    %c0_i32 = arith.constant 0 : i32
    %c0_i32_0 = arith.constant 0 : i32
    %c0_i32_1 = arith.constant 0 : i32
    return %c0_i32, %c0_i32_0 : i32, i32
  }
  func.func @transform_1(%arg0: i32) -> (i32, i32) {
    %c0_i32 = arith.constant 0 : i32
    %c0_i32_0 = arith.constant 0 : i32
    %c0_i32_1 = arith.constant 0 : i32
    return %c0_i32, %c0_i32_0 : i32, i32
  }
  func.func @transform_2(%arg0: i32) -> (i32, i32) {
    %c0_i32 = arith.constant 0 : i32
    %c0_i32_0 = arith.constant 0 : i32
    %c0_i32_1 = arith.constant 0 : i32
    return %c0_i32, %c0_i32_0 : i32, i32
  }
  func.func @transform_3(%arg0: i32) -> (i32, i32) {
    %c0_i32 = arith.constant 0 : i32
    %c0_i32_0 = arith.constant 0 : i32
    %c0_i32_1 = arith.constant 0 : i32
    return %c0_i32, %c0_i32_0 : i32, i32
  }
}

module attributes {stable_mosaic.version = 11 : i64} {
  func.func @_bn_add_relu_kernel(%arg0: i32, %arg1: i32, %arg2: memref<16x128xbf16, #tpu.memory_space<vmem>>, %arg3: memref<1x128xf32, #tpu.memory_space<vmem>>, %arg4: memref<1x128xf32, #tpu.memory_space<vmem>>, %arg5: memref<16x128xbf16, #tpu.memory_space<vmem>>, %arg6: memref<16x128xbf16, #tpu.memory_space<vmem>>) attributes {dimension_semantics = [#tpu.dimension_semantics<parallel>, #tpu.dimension_semantics<parallel>], iteration_bounds = array<i64: 2, 1>, scalar_prefetch = 0 : i64, scratch_operands = 0 : i64, tpu.core_type = #tpu.core_type<tc>, window_params = [{transform_indices = @transform_0, window_bounds = array<i64: 16, 128>}, {transform_indices = @transform_1, window_bounds = array<i64: 1, 128>}, {transform_indices = @transform_2, window_bounds = array<i64: 1, 128>}, {transform_indices = @transform_3, window_bounds = array<i64: 16, 128>}, {transform_indices = @transform_4, window_bounds = array<i64: 16, 128>}]} {
    %c0 = arith.constant 0 : index
    %c0_0 = arith.constant 0 : index
    %0 = vector.load %arg2[%c0, %c0_0] : memref<16x128xbf16, #tpu.memory_space<vmem>>, vector<16x128xbf16>
    %1 = arith.extf %0 : vector<16x128xbf16> to vector<16x128xf32>
    %c0_1 = arith.constant 0 : index
    %c0_2 = arith.constant 0 : index
    %2 = vector.load %arg3[%c0_1, %c0_2] : memref<1x128xf32, #tpu.memory_space<vmem>>, vector<1x128xf32>
    %3 = vector.broadcast %2 : vector<1x128xf32> to vector<16x128xf32>
    %4 = arith.mulf %1, %3 : vector<16x128xf32>
    %c0_3 = arith.constant 0 : index
    %c0_4 = arith.constant 0 : index
    %5 = vector.load %arg4[%c0_3, %c0_4] : memref<1x128xf32, #tpu.memory_space<vmem>>, vector<1x128xf32>
    %6 = vector.broadcast %5 : vector<1x128xf32> to vector<16x128xf32>
    %7 = arith.addf %4, %6 : vector<16x128xf32>
    %c0_5 = arith.constant 0 : index
    %c0_6 = arith.constant 0 : index
    %8 = vector.load %arg5[%c0_5, %c0_6] : memref<16x128xbf16, #tpu.memory_space<vmem>>, vector<16x128xbf16>
    %9 = arith.extf %8 : vector<16x128xbf16> to vector<16x128xf32>
    %10 = arith.addf %7, %9 : vector<16x128xf32>
    %cst = arith.constant 0.000000e+00 : f32
    %11 = vector.broadcast %cst : f32 to vector<16x128xf32>
    %12 = arith.maximumf %10, %11 : vector<16x128xf32>
    %13 = arith.truncf %12 : vector<16x128xf32> to vector<16x128xbf16>
    %c0_7 = arith.constant 0 : index
    %c0_8 = arith.constant 0 : index
    %14 = vector.load %arg6[%c0_7, %c0_8] : memref<16x128xbf16, #tpu.memory_space<vmem>>, vector<16x128xbf16>
    tpu.vector_store %arg6[%c0_7, %c0_8], %13 {strides = array<i32>} : memref<16x128xbf16, #tpu.memory_space<vmem>>, vector<16x128xbf16>,
    return
  }
  func.func @transform_0(%arg0: i32, %arg1: i32) -> (i32, i32) {
    %c0_i32 = arith.constant 0 : i32
    return %arg0, %arg1 : i32, i32
  }
  func.func @transform_1(%arg0: i32, %arg1: i32) -> (i32, i32) {
    %c0_i32 = arith.constant 0 : i32
    %c0_i32_0 = arith.constant 0 : i32
    return %c0_i32, %arg1 : i32, i32
  }
  func.func @transform_2(%arg0: i32, %arg1: i32) -> (i32, i32) {
    %c0_i32 = arith.constant 0 : i32
    %c0_i32_0 = arith.constant 0 : i32
    return %c0_i32, %arg1 : i32, i32
  }
  func.func @transform_3(%arg0: i32, %arg1: i32) -> (i32, i32) {
    %c0_i32 = arith.constant 0 : i32
    return %arg0, %arg1 : i32, i32
  }
  func.func @transform_4(%arg0: i32, %arg1: i32) -> (i32, i32) {
    %c0_i32 = arith.constant 0 : i32
    return %arg0, %arg1 : i32, i32
  }
}

</mosaic_0001>

<bundles_post_ra>
// kernel: _lambda_.22
= control target key start
LH: loop header
LB: loop body
LE: loop exit
PB: predicated region body
PF: predicated region fallthrough
CT: control target
= control target key end

     0   :  { %s824_s12 = smov 0   ;;  %s826_s13 = smov 0   ;;  %s974_s0 = inlined_call_operand.vmem [shape: bf16[512,128], index: 0, kind: input, shape index: {}]   ;;  %s975_s1 = inlined_call_operand.vmem [shape: f32[1,128], index: 1, kind: input, shape index: {}]   ;;  %s976_s2 = inlined_call_operand.vmem [shape: f32[1,128], index: 2, kind: input, shape index: {}]   ;;  %s977_s3 = inlined_call_operand.vmem [shape: bf16[512,128], index: 3, kind: output, shape index: {}]  }
   0x1   :  { %s828_s14 = smov 0  }
   0x2 LB: > { %s25_s15 = sadd.s32 1, %s798_s13  ;;  %p573_p0 = scmp.ge.s32.totalorder %s802_s14, 1  ;;  %s802_s14 = sphi %s828_s14, %s13_s14   ;;  %s798_s13 = sphi %s826_s13, %s979_s13   ;;  %s794_s12 = sphi %s824_s12, %s978_s12  }
   0x3   : > { %p27_p1 = scmp.ge.s32.totalorder %s25_s15, 2  ;;  %p173_p2 = scmp.lt.s32.totalorder %s802_s14, 3 }
   0x5   : > { %s981_s15 = smov (%p27_p1, %s25_s15), 0  ;;  %p174_p3 = pnand %p573_p0, %p173_p2 }
   0x6   : > { %s574_s16 = sshll.u32 (!%p174_p3), %s794_s12, 5 }
   0x7   : > { %177 = sbr.rel (%p174_p3) target bundleno = 58 (0x3a), region = 32  ;;  %p210_p4 = scmp.lt.s32.totalorder (!%p174_p3), %s574_s16, 63 }
   0xc   : > { %s983_s16 = smov (!%p210_p4, %s574_s16), 63  ;;  %v855_v0 = vld [vmem:[%s975_s1] ss:$0 sm:$0xff] }
   0xd   : > { %s575_s17 = sshll.u32 %s983_s16, 2  ;;  %v863_v6 = vld [vmem:[%s976_s2] ss:$0 sm:$0xff] }
   0xe   : > { %s850_s20 = scalar_lea.vmem %s974_s0, %s575_s17  ;;  %s889_s27 = scalar_lea.vmem %s977_s3, %s575_s17 }
   0xf   : > { %v581_v1 = vld [vmem:[%s850_s20] sm:$0xff]   ;;  %v724_v2 = vld [vmem:[%s850_s20 + $0x8] sm:$0xff]   ;;  %v725_v3 = vld [vmem:[%s850_s20 + $0x10] sm:$0xff]  }
  0x10   : > { %v582_v4 = vunpack.c.l.bf16 %v581_v1  ;;  %v583_v5 = vunpack.c.h.bf16 %v581_v1  ;;  %v586_v7 = vunpack.c.l.bf16 %v724_v2  ;;  %v587_v8 = vunpack.c.h.bf16 %v724_v2  ;;  %v726_v9 = vld [vmem:[%s850_s20 + $0x18] sm:$0xff]   ;;  %v727_v30 = vld [vmem:[%s850_s20 + $0x20] sm:$0xff]   ;;  %v728_v35 = vld [vmem:[%s850_s20 + $0x28] sm:$0xff]  }
  0x11   : > { %v590_v10 = vunpack.c.l.bf16 %v725_v3  ;;  %v591_v11 = vunpack.c.h.bf16 %v725_v3  ;;  %v594_v12 = vunpack.c.l.bf16 %v726_v9  ;;  %v595_v13 = vunpack.c.h.bf16 %v726_v9  ;;  %v729_v40 = vld [vmem:[%s850_s20 + $0x30] sm:$0xff]   ;;  %v730_v45 = vld [vmem:[%s850_s20 + $0x38] sm:$0xff]   ;;  %v731_v3 = vld [vmem:[%s850_s20 + $0x40] sm:$0xff]  }
  0x12   : > { %v301_v14 = vmul.f32 %v855_v0, %v582_v4  ;;  %v302_v15 = vmul.f32 %v855_v0, %v583_v5  ;;  %v303_v16 = vmul.f32 %v855_v0, %v586_v7  ;;  %v304_v17 = vmul.f32 %v855_v0, %v587_v8 }
  0x13   : > { %v305_v18 = vmul.f32 %v855_v0, %v590_v10  ;;  %v306_v19 = vmul.f32 %v855_v0, %v591_v11  ;;  %v307_v20 = vmul.f32 %v855_v0, %v594_v12  ;;  %v308_v21 = vmul.f32 %v855_v0, %v595_v13  ;;  %v732_v13 = vld [vmem:[%s850_s20 + $0x48] sm:$0xff]  }
  0x14   : > { %v337_v22 = vadd.f32 %v863_v6, %v301_v14  ;;  %v338_v23 = vadd.f32 %v863_v6, %v302_v15  ;;  %v339_v24 = vadd.f32 %v863_v6, %v303_v16  ;;  %v340_v25 = vadd.f32 %v863_v6, %v304_v17 }
  0x15   : > { %v341_v26 = vadd.f32 %v863_v6, %v305_v18  ;;  %v342_v27 = vadd.f32 %v863_v6, %v306_v19  ;;  %v343_v28 = vadd.f32 %v863_v6, %v307_v20  ;;  %v344_v29 = vadd.f32 %v863_v6, %v308_v21  ;;  %v733_v18 = vld [vmem:[%s850_s20 + $0x50] sm:$0xff]  }
  0x16   : > { %v369_v31 = vmax.f32 %v337_v22, 0.0  ;;  %v370_v32 = vmax.f32 %v338_v23, 0.0  ;;  %v371_v33 = vmax.f32 %v339_v24, 0.0  ;;  %v372_v34 = vmax.f32 %v340_v25, 0.0  ;;  %v734_v23 = vld [vmem:[%s850_s20 + $0x58] sm:$0xff]  }
  0x17   : > { %v373_v36 = vmax.f32 %v341_v26, 0.0  ;;  %v374_v37 = vmax.f32 %v342_v27, 0.0  ;;  %v375_v38 = vmax.f32 %v343_v28, 0.0  ;;  %v376_v39 = vmax.f32 %v344_v29, 0.0 }
  0x18   : > { %v647_v41 = vpack.c.bf16 %v370_v32, %v369_v31  ;;  %v652_v42 = vpack.c.bf16 %v372_v34, %v371_v33  ;;  %v598_v43 = vunpack.c.l.bf16 %v727_v30  ;;  %v599_v44 = vunpack.c.h.bf16 %v727_v30 }
  0x19   : > { %v657_v46 = vpack.c.bf16 %v374_v37, %v373_v36  ;;  %v662_v47 = vpack.c.bf16 %v376_v39, %v375_v38  ;;  %v602_v48 = vunpack.c.l.bf16 %v728_v35  ;;  %v603_v49 = vunpack.c.h.bf16 %v728_v35 }
  0x1a   : > { %648 = vst [vmem:[%s889_s27] sm:$0xff] %v647_v41   ;;  %v309_v50 = vmul.f32 %v855_v0, %v598_v43  ;;  %v310_v51 = vmul.f32 %v855_v0, %v599_v44  ;;  %v606_v52 = vunpack.c.l.bf16 %v729_v40  ;;  %v607_v53 = vunpack.c.h.bf16 %v729_v40  ;;  %v735_v40 = vld [vmem:[%s850_s20 + $0x60] sm:$0xff]  }
  0x1b   : > { %739 = vst [vmem:[%s889_s27 + $0x8] sm:$0xff] %v652_v42   ;;  %v311_v54 = vmul.f32 %v855_v0, %v602_v48  ;;  %v312_v55 = vmul.f32 %v855_v0, %v603_v49  ;;  %v610_v56 = vunpack.c.l.bf16 %v730_v45  ;;  %v611_v57 = vunpack.c.h.bf16 %v730_v45 }
  0x1c   : > { %740 = vst [vmem:[%s889_s27 + $0x10] sm:$0xff] %v657_v46   ;;  %v345_v58 = vadd.f32 %v863_v6, %v309_v50  ;;  %v346_v59 = vadd.f32 %v863_v6, %v310_v51  ;;  %v313_v60 = vmul.f32 %v855_v0, %v606_v52  ;;  %v314_v61 = vmul.f32 %v855_v0, %v607_v53  ;;  %v736_v53 = vld [vmem:[%s850_s20 + $0x68] sm:$0xff]  }
  0x1d   : > { %741 = vst [vmem:[%s889_s27 + $0x18] sm:$0xff] %v662_v47   ;;  %v347_v62 = vadd.f32 %v863_v6, %v311_v54  ;;  %v348_v63 = vadd.f32 %v863_v6, %v312_v55  ;;  %v315_v1 = vmul.f32 %v855_v0, %v610_v56  ;;  %v316_v2 = vmul.f32 %v855_v0, %v611_v57 }
  0x1e   : > { %v377_v4 = vmax.f32 %v345_v58, 0.0  ;;  %v378_v5 = vmax.f32 %v346_v59, 0.0  ;;  %v349_v7 = vadd.f32 %v863_v6, %v313_v60  ;;  %v350_v8 = vadd.f32 %v863_v6, %v314_v61  ;;  %v737_v58 = vld [vmem:[%s850_s20 + $0x70] sm:$0xff]  }
  0x1f   : > { %v379_v9 = vmax.f32 %v347_v62, 0.0  ;;  %v380_v10 = vmax.f32 %v348_v63, 0.0  ;;  %v351_v11 = vadd.f32 %v863_v6, %v315_v1  ;;  %v352_v12 = vadd.f32 %v863_v6, %v316_v2  ;;  %v738_v63 = vld [vmem:[%s850_s20 + $0x78] sm:$0xff]  }
  0x20   : > { %v667_v14 = vpack.c.bf16 %v378_v5, %v377_v4  ;;  %v381_v15 = vmax.f32 %v349_v7, 0.0  ;;  %v382_v16 = vmax.f32 %v350_v8, 0.0  ;;  %v614_v17 = vunpack.c.l.bf16 %v731_v3 }
  0x21   : > { %v672_v19 = vpack.c.bf16 %v380_v10, %v379_v9  ;;  %v383_v20 = vmax.f32 %v351_v11, 0.0  ;;  %v384_v21 = vmax.f32 %v352_v12, 0.0  ;;  %v615_v22 = vunpack.c.h.bf16 %v731_v3 }
  0x22   : > { %742 = vst [vmem:[%s889_s27 + $0x20] sm:$0xff] %v667_v14   ;;  %v677_v24 = vpack.c.bf16 %v382_v16, %v381_v15  ;;  %v317_v25 = vmul.f32 %v855_v0, %v614_v17  ;;  %v618_v26 = vunpack.c.l.bf16 %v732_v13  ;;  %v619_v27 = vunpack.c.h.bf16 %v732_v13 }
  0x23   : > { %743 = vst [vmem:[%s889_s27 + $0x28] sm:$0xff] %v672_v19   ;;  %v682_v28 = vpack.c.bf16 %v384_v21, %v383_v20  ;;  %v318_v29 = vmul.f32 %v855_v0, %v615_v22  ;;  %v622_v30 = vunpack.c.l.bf16 %v733_v18  ;;  %v623_v31 = vunpack.c.h.bf16 %v733_v18 }
  0x24   : > { %744 = vst [vmem:[%s889_s27 + $0x30] sm:$0xff] %v677_v24   ;;  %v353_v32 = vadd.f32 %v863_v6, %v317_v25  ;;  %v319_v33 = vmul.f32 %v855_v0, %v618_v26  ;;  %v320_v34 = vmul.f32 %v855_v0, %v619_v27  ;;  %v626_v35 = vunpack.c.l.bf16 %v734_v23 }
  0x25   : > { %745 = vst [vmem:[%s889_s27 + $0x38] sm:$0xff] %v682_v28   ;;  %v354_v36 = vadd.f32 %v863_v6, %v318_v29  ;;  %v321_v37 = vmul.f32 %v855_v0, %v622_v30  ;;  %v322_v38 = vmul.f32 %v855_v0, %v623_v31  ;;  %v627_v39 = vunpack.c.h.bf16 %v734_v23 }
  0x26   : > { %v385_v41 = vmax.f32 %v353_v32, 0.0  ;;  %v355_v42 = vadd.f32 %v863_v6, %v319_v33  ;;  %v356_v43 = vadd.f32 %v863_v6, %v320_v34  ;;  %v323_v44 = vmul.f32 %v855_v0, %v626_v35 }
  0x27   : > { %v386_v45 = vmax.f32 %v354_v36, 0.0  ;;  %v357_v46 = vadd.f32 %v863_v6, %v321_v37  ;;  %v358_v47 = vadd.f32 %v863_v6, %v322_v38  ;;  %v324_v48 = vmul.f32 %v855_v0, %v627_v39 }
  0x28   : > { %v387_v49 = vmax.f32 %v355_v42, 0.0  ;;  %v388_v50 = vmax.f32 %v356_v43, 0.0  ;;  %v359_v51 = vadd.f32 %v863_v6, %v323_v44  ;;  %v630_v52 = vunpack.c.l.bf16 %v735_v40 }
  0x29   : > { %v687_v54 = vpack.c.bf16 %v386_v45, %v385_v41  ;;  %v389_v55 = vmax.f32 %v357_v46, 0.0  ;;  %v390_v56 = vmax.f32 %v358_v47, 0.0  ;;  %v360_v57 = vadd.f32 %v863_v6, %v324_v48 }
  0x2a   : > { %v692_v59 = vpack.c.bf16 %v388_v50, %v387_v49  ;;  %v391_v60 = vmax.f32 %v359_v51, 0.0  ;;  %v631_v61 = vunpack.c.h.bf16 %v735_v40  ;;  %v325_v62 = vmul.f32 %v855_v0, %v630_v52 }
  0x2b   : > { %746 = vst [vmem:[%s889_s27 + $0x40] sm:$0xff] %v687_v54   ;;  %v697_v1 = vpack.c.bf16 %v390_v56, %v389_v55  ;;  %v392_v2 = vmax.f32 %v360_v57, 0.0  ;;  %v634_v3 = vunpack.c.l.bf16 %v736_v53  ;;  %v635_v4 = vunpack.c.h.bf16 %v736_v53 }
  0x2c   : > { %747 = vst [vmem:[%s889_s27 + $0x48] sm:$0xff] %v692_v59   ;;  %v326_v5 = vmul.f32 %v855_v0, %v631_v61  ;;  %v361_v7 = vadd.f32 %v863_v6, %v325_v62  ;;  %v638_v8 = vunpack.c.l.bf16 %v737_v58  ;;  %v639_v9 = vunpack.c.h.bf16 %v737_v58 }
  0x2d   : > { %748 = vst [vmem:[%s889_s27 + $0x50] sm:$0xff] %v697_v1   ;;  %v702_v10 = vpack.c.bf16 %v392_v2, %v391_v60  ;;  %v327_v11 = vmul.f32 %v855_v0, %v634_v3  ;;  %v328_v12 = vmul.f32 %v855_v0, %v635_v4  ;;  %v642_v13 = vunpack.c.l.bf16 %v738_v63 }
  0x2e   : > { %v362_v14 = vadd.f32 %v863_v6, %v326_v5  ;;  %v393_v15 = vmax.f32 %v361_v7, 0.0  ;;  %v329_v16 = vmul.f32 %v855_v0, %v638_v8  ;;  %v330_v17 = vmul.f32 %v855_v0, %v639_v9 }
  0x2f   : > { %749 = vst [vmem:[%s889_s27 + $0x58] sm:$0xff] %v702_v10   ;;  %v363_v18 = vadd.f32 %v863_v6, %v327_v11  ;;  %v364_v19 = vadd.f32 %v863_v6, %v328_v12  ;;  %v643_v20 = vunpack.c.h.bf16 %v738_v63  ;;  %v331_v21 = vmul.f32 %v855_v0, %v642_v13 }
  0x30   : > { %v394_v22 = vmax.f32 %v362_v14, 0.0  ;;  %v365_v23 = vadd.f32 %v863_v6, %v329_v16  ;;  %v366_v24 = vadd.f32 %v863_v6, %v330_v17 }
  0x31   : > { %v395_v25 = vmax.f32 %v363_v18, 0.0  ;;  %v396_v26 = vmax.f32 %v364_v19, 0.0  ;;  %v332_v27 = vmul.f32 %v855_v0, %v643_v20  ;;  %v367_v28 = vadd.f32 %v863_v6, %v331_v21 }
  0x32   : > { %v707_v29 = vpack.c.bf16 %v394_v22, %v393_v15  ;;  %v397_v30 = vmax.f32 %v365_v23, 0.0  ;;  %v398_v31 = vmax.f32 %v366_v24, 0.0 }
  0x33   : > { %v712_v32 = vpack.c.bf16 %v396_v26, %v395_v25  ;;  %v368_v33 = vadd.f32 %v863_v6, %v332_v27  ;;  %v399_v34 = vmax.f32 %v367_v28, 0.0 }
  0x34   : > { %750 = vst [vmem:[%s889_s27 + $0x60] sm:$0xff] %v707_v29   ;;  %v717_v35 = vpack.c.bf16 %v398_v31, %v397_v30 }
  0x35   : > { %751 = vst [vmem:[%s889_s27 + $0x68] sm:$0xff] %v712_v32   ;;  %v400_v36 = vmax.f32 %v368_v33, 0.0 }
  0x36   : > { %752 = vst [vmem:[%s889_s27 + $0x70] sm:$0xff] %v717_v35  }
  0x37   : > { %v722_v37 = vpack.c.bf16 %v400_v36, %v399_v34 }
  0x39   : > { %753 = vst [vmem:[%s889_s27 + $0x78] sm:$0xff] %v722_v37  }
  0x3a PF: > { %s13_s14 = sadd.s32 1, %s802_s14   ;;  %s978_s12 = smov %s798_s13 }
  0x3b   : > { %p10_p5 = scmp.ge.s32.totalorder %s13_s14, 4   ;;  %s979_s13 = smov %s981_s15 }
  0x3d   :  { %12 = sbr.rel (!%p10_p5) target bundleno = 2 (0x2), region = 68 }

// kernel: _lambda_.21
= control target key start
LH: loop header
LB: loop body
LE: loop exit
PB: predicated region body
PF: predicated region fallthrough
CT: control target
= control target key end

     0   :  { %s1686_s12 = smov 0   ;;  %s1688_s13 = smov 0   ;;  %s1959_s0 = inlined_call_operand.vmem [shape: bf16[512,256], index: 0, kind: input, shape index: {}]   ;;  %s1960_s1 = inlined_call_operand.vmem [shape: bf16[256,128], index: 1, kind: input, shape index: {}]   ;;  %s1961_s2 = inlined_call_operand.vmem [shape: bf16[512,128], index: 2, kind: output, shape index: {0}]   ;;  %s1962_s3 = inlined_call_operand.vmem [shape: f32[2,8,128], index: 3, kind: output, shape index: {1}]  }
   0x1   :  { %s1690_s14 = smov 0  }
   0x2 LB: > { %s33_s15 = sadd.s32 1, %s1660_s13  ;;  %p1257_p0 = scmp.ge.s32.totalorder %s1664_s14, 1  ;;  %s1664_s14 = sphi %s1690_s14, %s14_s14   ;;  %s1660_s13 = sphi %s1688_s13, %s1964_s13   ;;  %s1656_s12 = sphi %s1686_s12, %s1963_s12  }
   0x3   : > { %p35_p1 = scmp.ge.s32.totalorder %s33_s15, 2  ;;  %p188_p2 = scmp.lt.s32.totalorder %s1664_s14, 3 }
   0x5   : > { %s1966_s15 = smov (%p35_p1, %s33_s15), 0  ;;  %p189_p3 = pnand %p1257_p0, %p188_p2 }
   0x6   : > { %s1258_s28 = sshll.u32 (!%p189_p3), %s1656_s12, 5  ;;  %p265_p5 = scmp.lt.s32.totalorder (!%p189_p3), %s1656_s12, 1 }
   0x7   : > { %192 = sbr.rel (%p189_p3) target bundleno = 342 (0x156), region = 28  ;;  %p237_p4 = scmp.lt.s32.totalorder (!%p189_p3), %s1258_s28, 63 }
   0xc   : > { %v1498_v0 = vld [vmem:[%s1960_s1 + $0x38] sm:$0xff]  ;;  %v1497_v2 = vld [vmem:[%s1960_s1 + $0x30] sm:$0xff]  ;;  %v1496_v4 = vld [vmem:[%s1960_s1 + $0x28] sm:$0xff]  ;;  %s1968_s28 = smov (!%p237_p4, %s1258_s28), 63  ;;  %s1970_s12 = smov (!%p265_p5, %s1656_s12), 1 }
   0xd   : > { %v1506_v1 = vld [vmem:[%s1960_s1 + $0x78] sm:$0xff]  ;;  %660 = vmatpush.bf16.msra.mxu0 %v1498_v0  ;;  %v1505_v3 = vld [vmem:[%s1960_s1 + $0x70] sm:$0xff]  ;;  %1602 = vmatpush.bf16.msra.mxu2 %v1498_v0  ;;  %v1504_v5 = vld [vmem:[%s1960_s1 + $0x68] sm:$0xff]  ;;  %s1458_s18 = sshll.u32 %s1968_s28, 3  ;;  %s1262_s4 = sshll.u32 %s1968_s28, 2 }
   0xe   : > { %749 = vmatpush.bf16.msra.mxu1 %v1506_v1  ;;  %1610 = vmatpush.bf16.msra.mxu3 %v1506_v1  ;;  %v1495_v6 = vld [vmem:[%s1960_s1 + $0x20] sm:$0xff]  ;;  %v1494_v8 = vld [vmem:[%s1960_s1 + $0x18] sm:$0xff]  ;;  %v1493_v10 = vld [vmem:[%s1960_s1 + $0x10] sm:$0xff]  ;;  %s1755_s25 = scalar_lea.vmem %s1959_s0, %s1458_s18  ;;  %s1831_s7 = scalar_lea.vmem %s1961_s2, %s1262_s4 }
   0xf   : > { %v1503_v7 = vld [vmem:[%s1960_s1 + $0x60] sm:$0xff]  ;;  %v1502_v9 = vld [vmem:[%s1960_s1 + $0x58] sm:$0xff]  ;;  %v1501_v11 = vld [vmem:[%s1960_s1 + $0x50] sm:$0xff]  ;;  %s1263_s28 = sshll.u32 %s1970_s12, 3 }
  0x10   : > { %v1492_v12 = vld [vmem:[%s1960_s1 + $0x8] sm:$0xff]  ;;  %v1491_v14 = vld [vmem:[%s1960_s1] sm:$0xff]  ;;  %v1274_v28 = vld [vmem:[%s1755_s25 + $0x10] sm:$0xf]  ;;  %s271_s10 = scalar_lea.vmem %s1962_s3, %s1263_s28 }
  0x11   : > { %661 = vmatpush.bf16.msra.mxu0 %v1497_v2  ;;  %1603 = vmatpush.bf16.msra.mxu2 %v1497_v2  ;;  %v1500_v13 = vld [vmem:[%s1960_s1 + $0x48] sm:$0xff]  ;;  %v1499_v15 = vld [vmem:[%s1960_s1 + $0x40] sm:$0xff]  ;;  %v1462_v29 = vld [vmem:[%s1755_s25 + $0x14] sm:$0xf0] }
  0x12   : > { %750 = vmatpush.bf16.msra.mxu1 %v1505_v3  ;;  %1611 = vmatpush.bf16.msra.mxu3 %v1505_v3  ;;  %v1266_v16 = vld [vmem:[%s1755_s25] sm:$0xf]  ;;  %v1460_v17 = vld [vmem:[%s1755_s25 + $0x4] sm:$0xf0]  ;;  %v1459_v18 = vld [vmem:[%s1755_s25 + $0x4] sm:$0xf]  ;;  %v1275_v36 = vor.u32 %v1462_v29, %v1274_v28 }
  0x13   : > { %v1268_v19 = vld [vmem:[%s1755_s25 + $0x8] sm:$0xf0]  ;;  %v1330_v20 = vld [vmem:[%s1755_s25 + $0x80] sm:$0xf]  ;;  %v1476_v21 = vld [vmem:[%s1755_s25 + $0x84] sm:$0xf0]  ;;  %v1267_v24 = vor.u32 %v1460_v17, %v1266_v16 }
  0x14   : > { %v1475_v22 = vld [vmem:[%s1755_s25 + $0x84] sm:$0xf]  ;;  %v1332_v23 = vld [vmem:[%s1755_s25 + $0x88] sm:$0xf0]  ;;  %v1271_v25 = vor.u32 %v1459_v18, %v1268_v19  ;;  %v1331_v26 = vor.u32 %v1476_v21, %v1330_v20  ;;  %v1461_v30 = vld [vmem:[%s1755_s25 + $0x14] sm:$0xf] }
  0x15   : > { %662 = vmatpush.bf16.msra.mxu0 %v1496_v4  ;;  %1604 = vmatpush.bf16.msra.mxu2 %v1496_v4  ;;  %v1335_v27 = vor.u32 %v1475_v22, %v1332_v23  ;;  %v1276_v31 = vld [vmem:[%s1755_s25 + $0x18] sm:$0xf0]  ;;  %v1338_v32 = vld [vmem:[%s1755_s25 + $0x90] sm:$0xf]  ;;  %v1478_v33 = vld [vmem:[%s1755_s25 + $0x94] sm:$0xf0] }
  0x16   : > { %751 = vmatpush.bf16.msra.mxu1 %v1504_v5  ;;  %1612 = vmatpush.bf16.msra.mxu3 %v1504_v5  ;;  %v1477_v34 = vld [vmem:[%s1755_s25 + $0x94] sm:$0xf]  ;;  %v1340_v35 = vld [vmem:[%s1755_s25 + $0x98] sm:$0xf0]  ;;  %v1279_v37 = vor.u32 %v1461_v30, %v1276_v31  ;;  %v1339_v38 = vor.u32 %v1478_v33, %v1338_v32  ;;  %v1282_v40 = vld [vmem:[%s1755_s25 + $0x20] sm:$0xf] }
  0x17   : > { %v1343_v39 = vor.u32 %v1477_v34, %v1340_v35  ;;  %v1464_v41 = vld [vmem:[%s1755_s25 + $0x24] sm:$0xf0]  ;;  %v1463_v42 = vld [vmem:[%s1755_s25 + $0x24] sm:$0xf]  ;;  %v1284_v43 = vld [vmem:[%s1755_s25 + $0x28] sm:$0xf0] }
  0x18   : > { %v1346_v44 = vld [vmem:[%s1755_s25 + $0xa0] sm:$0xf]  ;;  %v1480_v45 = vld [vmem:[%s1755_s25 + $0xa4] sm:$0xf0]  ;;  %v1479_v46 = vld [vmem:[%s1755_s25 + $0xa4] sm:$0xf]  ;;  %v1283_v48 = vor.u32 %v1464_v41, %v1282_v40  ;;  %v1287_v49 = vor.u32 %v1463_v42, %v1284_v43 }
  0x19   : > { %663 = vmatpush.bf16.msra.mxu0 %v1495_v6  ;;  %1605 = vmatpush.bf16.msra.mxu2 %v1495_v6  ;;  %v1348_v47 = vld [vmem:[%s1755_s25 + $0xa8] sm:$0xf0]  ;;  %v1347_v50 = vor.u32 %v1480_v45, %v1346_v44  ;;  %v1290_v52 = vld [vmem:[%s1755_s25 + $0x30] sm:$0xf]  ;;  %v1466_v53 = vld [vmem:[%s1755_s25 + $0x34] sm:$0xf0] }
  0x1a   : > { %752 = vmatpush.bf16.msra.mxu1 %v1503_v7  ;;  %1613 = vmatpush.bf16.msra.mxu3 %v1503_v7  ;;  %v1351_v51 = vor.u32 %v1479_v46, %v1348_v47  ;;  %v1465_v54 = vld [vmem:[%s1755_s25 + $0x34] sm:$0xf]  ;;  %v1292_v55 = vld [vmem:[%s1755_s25 + $0x38] sm:$0xf0]  ;;  %v1354_v56 = vld [vmem:[%s1755_s25 + $0xb0] sm:$0xf]  ;;  %v1291_v60 = vor.u32 %v1466_v53, %v1290_v52 }
  0x1b   : > { %v1482_v57 = vld [vmem:[%s1755_s25 + $0xb4] sm:$0xf0]  ;;  %v1481_v58 = vld [vmem:[%s1755_s25 + $0xb4] sm:$0xf]  ;;  %v1356_v59 = vld [vmem:[%s1755_s25 + $0xb8] sm:$0xf0]  ;;  %v1295_v61 = vor.u32 %v1465_v54, %v1292_v55 }
  0x1c   : > { %v1355_v62 = vor.u32 %v1482_v57, %v1354_v56  ;;  %v1359_v63 = vor.u32 %v1481_v58, %v1356_v59  ;;  %v1298_v0 = vld [vmem:[%s1755_s25 + $0x40] sm:$0xf]  ;;  %v1468_v1 = vld [vmem:[%s1755_s25 + $0x44] sm:$0xf0]  ;;  %v1467_v2 = vld [vmem:[%s1755_s25 + $0x44] sm:$0xf] }
  0x1d   : > { %664 = vmatpush.bf16.msra.mxu0 %v1494_v8  ;;  %1606 = vmatpush.bf16.msra.mxu2 %v1494_v8  ;;  %v1300_v3 = vld [vmem:[%s1755_s25 + $0x48] sm:$0xf0]  ;;  %v1362_v4 = vld [vmem:[%s1755_s25 + $0xc0] sm:$0xf]  ;;  %v1484_v5 = vld [vmem:[%s1755_s25 + $0xc4] sm:$0xf0]  ;;  %v1299_v8 = vor.u32 %v1468_v1, %v1298_v0 }
  0x1e   : > { %753 = vmatpush.bf16.msra.mxu1 %v1502_v9  ;;  %1614 = vmatpush.bf16.msra.mxu3 %v1502_v9  ;;  %v1483_v6 = vld [vmem:[%s1755_s25 + $0xc4] sm:$0xf]  ;;  %v1364_v7 = vld [vmem:[%s1755_s25 + $0xc8] sm:$0xf0]  ;;  %v1303_v9 = vor.u32 %v1467_v2, %v1300_v3  ;;  %v1370_v16 = vld [vmem:[%s1755_s25 + $0xd0] sm:$0xf] }
  0x1f   : > { %v1486_v17 = vld [vmem:[%s1755_s25 + $0xd4] sm:$0xf0]  ;;  %v1485_v18 = vld [vmem:[%s1755_s25 + $0xd4] sm:$0xf]  ;;  %v1372_v19 = vld [vmem:[%s1755_s25 + $0xd8] sm:$0xf0] }
  0x20   : > { %v1371_v22 = vor.u32 %v1486_v17, %v1370_v16  ;;  %v1375_v23 = vor.u32 %v1485_v18, %v1372_v19  ;;  %v1378_v28 = vld [vmem:[%s1755_s25 + $0xe0] sm:$0xf]  ;;  %v1488_v29 = vld [vmem:[%s1755_s25 + $0xe4] sm:$0xf0]  ;;  %v1487_v30 = vld [vmem:[%s1755_s25 + $0xe4] sm:$0xf] }
  0x21   : > { %665 = vmatpush.bf16.msra.mxu0 %v1493_v10  ;;  %1607 = vmatpush.bf16.msra.mxu2 %v1493_v10  ;;  %v1363_v10 = vor.u32 %v1484_v5, %v1362_v4  ;;  %v1380_v31 = vld [vmem:[%s1755_s25 + $0xe8] sm:$0xf0]  ;;  %v1379_v34 = vor.u32 %v1488_v29, %v1378_v28  ;;  %v1386_v40 = vld [vmem:[%s1755_s25 + $0xf0] sm:$0xf]  ;;  %v1490_v41 = vld [vmem:[%s1755_s25 + $0xf4] sm:$0xf0] }
  0x22   : > { %754 = vmatpush.bf16.msra.mxu1 %v1501_v11  ;;  %1615 = vmatpush.bf16.msra.mxu3 %v1501_v11  ;;  %v1367_v11 = vor.u32 %v1483_v6, %v1364_v7  ;;  %v1383_v35 = vor.u32 %v1487_v30, %v1380_v31  ;;  %v1489_v42 = vld [vmem:[%s1755_s25 + $0xf4] sm:$0xf]  ;;  %v1388_v43 = vld [vmem:[%s1755_s25 + $0xf8] sm:$0xf0]  ;;  %v1387_v46 = vor.u32 %v1490_v41, %v1386_v40 }
  0x23   : > { %v1391_v47 = vor.u32 %v1489_v42, %v1388_v43 }
  0x25   : > { %666 = vmatpush.bf16.msra.mxu0 %v1492_v12  ;;  %1608 = vmatpush.bf16.msra.mxu2 %v1492_v12  ;;  %v1306_v12 = vld [vmem:[%s1755_s25 + $0x50] sm:$0xf] }
  0x26   : > { %755 = vmatpush.bf16.msra.mxu1 %v1500_v13  ;;  %1616 = vmatpush.bf16.msra.mxu3 %v1500_v13  ;;  %v1470_v13 = vld [vmem:[%s1755_s25 + $0x54] sm:$0xf0] }
  0x27   : > { %v1307_v20 = vor.u32 %v1470_v13, %v1306_v12 }
  0x29   : > { %667 = vmatpush.bf16.msra.mxu0 %v1491_v14  ;;  %1609 = vmatpush.bf16.msra.mxu2 %v1491_v14  ;;  %v1469_v14 = vld [vmem:[%s1755_s25 + $0x54] sm:$0xf] }
  0x2a   : > { %756 = vmatpush.bf16.msra.mxu1 %v1499_v15  ;;  %1617 = vmatpush.bf16.msra.mxu3 %v1499_v15  ;;  %v1308_v15 = vld [vmem:[%s1755_s25 + $0x58] sm:$0xf0] }
  0x2b   : > { %v1311_v21 = vor.u32 %v1469_v14, %v1308_v15 }
  0x2c   : > { %668 = vmatmul.bf16.vlgmr.msra.gmra.mxu0 %v1267_v24  ;;  %708 = vmatmul.bf16.vlgmr.msra.gmra.mxu2 %v1331_v26  ;;  %v1314_v24 = vld [vmem:[%s1755_s25 + $0x60] sm:$0xf]  ;;  %v1471_v26 = vld [vmem:[%s1755_s25 + $0x64] sm:$0xf] }
  0x2d   : > { %757 = vmatmul.bf16.vlgmr.msra.gmra.mxu1 %v1271_v25  ;;  %797 = vmatmul.bf16.vlgmr.msra.gmra.mxu3 %v1335_v27  ;;  %v1472_v25 = vld [vmem:[%s1755_s25 + $0x64] sm:$0xf0]  ;;  %v1316_v27 = vld [vmem:[%s1755_s25 + $0x68] sm:$0xf0] }
  0x2e   : > { %v1315_v32 = vor.u32 %v1472_v25, %v1314_v24  ;;  %v1319_v33 = vor.u32 %v1471_v26, %v1316_v27 }
  0x3c   : > { %673 = vmatmul.bf16.gmra.mxu0 %v1275_v36  ;;  %713 = vmatmul.bf16.gmra.mxu2 %v1339_v38  ;;  %v1322_v36 = vld [vmem:[%s1755_s25 + $0x70] sm:$0xf]  ;;  %v1473_v38 = vld [vmem:[%s1755_s25 + $0x74] sm:$0xf] }
  0x3d   : > { %762 = vmatmul.bf16.gmra.mxu1 %v1279_v37  ;;  %802 = vmatmul.bf16.gmra.mxu3 %v1343_v39  ;;  %v1474_v37 = vld [vmem:[%s1755_s25 + $0x74] sm:$0xf0]  ;;  %v1324_v39 = vld [vmem:[%s1755_s25 + $0x78] sm:$0xf0] }
  0x3e   : > { %v1323_v44 = vor.u32 %v1474_v37, %v1322_v36  ;;  %v1327_v45 = vor.u32 %v1473_v38, %v1324_v39 }
  0x4c   : > { %678 = vmatmul.bf16.gmra.mxu0 %v1283_v48  ;;  %718 = vmatmul.bf16.gmra.mxu2 %v1347_v50 }
  0x4d   : > { %767 = vmatmul.bf16.gmra.mxu1 %v1287_v49  ;;  %807 = vmatmul.bf16.gmra.mxu3 %v1351_v51 }
  0x5c   : > { %683 = vmatmul.bf16.gmra.mxu0 %v1291_v60  ;;  %723 = vmatmul.bf16.gmra.mxu2 %v1355_v62 }
  0x5d   : > { %772 = vmatmul.bf16.gmra.mxu1 %v1295_v61  ;;  %812 = vmatmul.bf16.gmra.mxu3 %v1359_v63 }
  0x6c   : > { %688 = vmatmul.bf16.gmra.mxu0 %v1299_v8  ;;  %728 = vmatmul.bf16.gmra.mxu2 %v1363_v10 }
  0x6d   : > { %777 = vmatmul.bf16.gmra.mxu1 %v1303_v9  ;;  %817 = vmatmul.bf16.gmra.mxu3 %v1367_v11 }
  0x7c   : > { %693 = vmatmul.bf16.gmra.mxu0 %v1307_v20  ;;  %733 = vmatmul.bf16.gmra.mxu2 %v1371_v22 }
  0x7d   : > { %782 = vmatmul.bf16.gmra.mxu1 %v1311_v21  ;;  %822 = vmatmul.bf16.gmra.mxu3 %v1375_v23 }
  0x8c   : > { %698 = vmatmul.bf16.gmra.mxu0 %v1315_v32  ;;  %738 = vmatmul.bf16.gmra.mxu2 %v1379_v34 }
  0x8d   : > { %787 = vmatmul.bf16.gmra.mxu1 %v1319_v33  ;;  %827 = vmatmul.bf16.gmra.mxu3 %v1383_v35 }
  0x9c   : > { %703 = vmatmul.bf16.gmra.mxu0 %v1323_v44  ;;  %743 = vmatmul.bf16.gmra.mxu2 %v1387_v46 }
  0x9d   : > { %792 = vmatmul.bf16.gmra.mxu1 %v1327_v45  ;;  %832 = vmatmul.bf16.gmra.mxu3 %v1391_v47 }
  0xa9   : > { %v669_v48 = vpop.f32.mrf.mxu0 }
  0xaa   : > { %v758_v49 = vpop.f32.mrf.mxu1 }
  0xab   : > { %v759_v50 = vadd.f32 %v758_v49, %v669_v48 }
  0xad   : > { %v1039_v56 = vmul.f32 %v759_v50, %v759_v50 }
  0xaf   : > { %v709_v51 = vpop.f32.mrf.mxu2 }
  0xb0   : > { %v798_v52 = vpop.f32.mrf.mxu3 }
  0xb1   : > { %v671_v53 = vpop.f32.mrf.mxu0  ;;  %v1834_v61 = vadd.f32 %v798_v52, %v709_v51 }
  0xb2   : > { %v760_v54 = vpop.f32.mrf.mxu1 }
  0xb3   : > { %v761_v55 = vadd.f32 %v760_v54, %v671_v53 }
  0xb5   : > { %v1510_v57 = vpack.c.bf16 %v761_v55, %v759_v50  ;;  %v1001_v58 = vadd.f32 %v761_v55, %v759_v50  ;;  %v1040_v59 = vmul.f32 %v761_v55, %v761_v55 }
  0xb7   : > { %1511 = vst [vmem:[%s1831_s7] sm:$0xff] %v1510_v57   ;;  %v1071_v60 = vadd.f32 %v1040_v59, %v1039_v56  ;;  %v711_v62 = vpop.f32.mrf.mxu2 }
  0xb8   : > { %v800_v63 = vpop.f32.mrf.mxu3 }
  0xb9   : > { %v674_v0 = vpop.f32.mrf.mxu0  ;;  %v1836_v2 = vadd.f32 %v800_v63, %v711_v62 }
  0xba   : > { %v763_v1 = vpop.f32.mrf.mxu1 }
  0xbb   : > { %v764_v3 = vadd.f32 %v763_v1, %v674_v0  ;;  %v1550_v4 = vpack.c.bf16 %v1836_v2, %v1834_v61 }
  0xbd   : > { %v1002_v5 = vadd.f32 %v1001_v58, %v764_v3  ;;  %v1041_v6 = vmul.f32 %v764_v3, %v764_v3  ;;  %1594 = vst [vmem:[%s1831_s7 + $0x40] sm:$0xff] %v1550_v4  }
  0xbf   : > { %v1072_v7 = vadd.f32 %v1071_v60, %v1041_v6  ;;  %v714_v8 = vpop.f32.mrf.mxu2 }
  0xc0   : > { %v803_v9 = vpop.f32.mrf.mxu3 }
  0xc1   : > { %v676_v10 = vpop.f32.mrf.mxu0  ;;  %v1846_v17 = vadd.f32 %v803_v9, %v714_v8 }
  0xc2   : > { %v765_v11 = vpop.f32.mrf.mxu1 }
  0xc3   : > { %v766_v12 = vadd.f32 %v765_v11, %v676_v10 }
  0xc5   : > { %v1515_v13 = vpack.c.bf16 %v766_v12, %v764_v3  ;;  %v1841_v14 = vadd.f32 %v1002_v5, %v766_v12  ;;  %v1042_v15 = vmul.f32 %v766_v12, %v766_v12 }
  0xc7   : > { %1587 = vst [vmem:[%s1831_s7 + $0x8] sm:$0xff] %v1515_v13   ;;  %v1844_v16 = vadd.f32 %v1072_v7, %v1042_v15  ;;  %v716_v18 = vpop.f32.mrf.mxu2 }
  0xc8   : > { %v805_v19 = vpop.f32.mrf.mxu3 }
  0xc9   : > { %v679_v20 = vpop.f32.mrf.mxu0  ;;  %v1848_v22 = vadd.f32 %v805_v19, %v716_v18 }
  0xca   : > { %v768_v21 = vpop.f32.mrf.mxu1 }
  0xcb   : > { %v1555_v23 = vpack.c.bf16 %v1848_v22, %v1846_v17  ;;  %v769_v28 = vadd.f32 %v768_v21, %v679_v20 }
  0xcd   : > { %1595 = vst [vmem:[%s1831_s7 + $0x48] sm:$0xff] %v1555_v23   ;;  %v1043_v20 = vmul.f32 %v769_v28, %v769_v28 }
  0xcf   : > { %v719_v24 = vpop.f32.mrf.mxu2 }
  0xd0   : > { %v808_v25 = vpop.f32.mrf.mxu3 }
  0xd1   : > { %v681_v26 = vpop.f32.mrf.mxu0  ;;  %v1857_v31 = vadd.f32 %v808_v25, %v719_v24  ;;  %v1004_v24 = vadd.f32 %v1841_v14, %v769_v28  ;;  %v1074_v25 = vadd.f32 %v1844_v16, %v1043_v20 }
  0xd2   : > { %v770_v27 = vpop.f32.mrf.mxu1 }
  0xd3   : > { %v1853_v29 = vadd.f32 %v770_v27, %v681_v26 }
  0xd5   : > { %v1520_v30 = vpack.c.bf16 %v1853_v29, %v769_v28  ;;  %v1044_v23 = vmul.f32 %v1853_v29, %v1853_v29  ;;  %v1005_v26 = vadd.f32 %v1004_v24, %v1853_v29 }
  0xd7   : > { %1588 = vst [vmem:[%s1831_s7 + $0x10] sm:$0xff] %v1520_v30   ;;  %v721_v32 = vpop.f32.mrf.mxu2 }
  0xd8   : > { %v810_v33 = vpop.f32.mrf.mxu3 }
  0xd9   : > { %v684_v34 = vpop.f32.mrf.mxu0  ;;  %v1859_v36 = vadd.f32 %v810_v33, %v721_v32  ;;  %v1075_v33 = vadd.f32 %v1074_v25, %v1044_v23 }
  0xda   : > { %v773_v35 = vpop.f32.mrf.mxu1 }
  0xdb   : > { %v1560_v37 = vpack.c.bf16 %v1859_v36, %v1857_v31  ;;  %v774_v42 = vadd.f32 %v773_v35, %v684_v34 }
  0xdd   : > { %1596 = vst [vmem:[%s1831_s7 + $0x50] sm:$0xff] %v1560_v37   ;;  %v1045_v27 = vmul.f32 %v774_v42, %v774_v42  ;;  %v1006_v37 = vadd.f32 %v1005_v26, %v774_v42  ;;  %v1055_v26 = vmul.f32 %v1834_v61, %v1834_v61 }
  0xdf   : > { %v724_v38 = vpop.f32.mrf.mxu2 }
  0xe0   : > { %v813_v39 = vpop.f32.mrf.mxu3 }
  0xe1   : > { %v686_v40 = vpop.f32.mrf.mxu0  ;;  %v1865_v45 = vadd.f32 %v813_v39, %v724_v38 }
  0xe2   : > { %v775_v41 = vpop.f32.mrf.mxu1 }
  0xe3   : > { %v776_v43 = vadd.f32 %v775_v41, %v686_v40  ;;  %v1076_v41 = vadd.f32 %v1075_v33, %v1045_v27  ;;  %v1056_v33 = vmul.f32 %v1836_v2, %v1836_v2 }
  0xe5   : > { %v1525_v44 = vpack.c.bf16 %v776_v43, %v774_v42  ;;  %v1046_v38 = vmul.f32 %v776_v43, %v776_v43 }
  0xe7   : > { %1589 = vst [vmem:[%s1831_s7 + $0x18] sm:$0xff] %v1525_v44   ;;  %v726_v46 = vpop.f32.mrf.mxu2  ;;  %v1007_v44 = vadd.f32 %v1006_v37, %v776_v43  ;;  %v1077_v14 = vadd.f32 %v1076_v41, %v1046_v38 }
  0xe8   : > { %v815_v47 = vpop.f32.mrf.mxu3 }
  0xe9   : > { %v689_v48 = vpop.f32.mrf.mxu0  ;;  %v1867_v50 = vadd.f32 %v815_v47, %v726_v46 }
  0xea   : > { %v778_v49 = vpop.f32.mrf.mxu1 }
  0xeb   : > { %v1565_v51 = vpack.c.bf16 %v1867_v50, %v1865_v45  ;;  %v779_v56 = vadd.f32 %v778_v49, %v689_v48 }
  0xed   : > { %1597 = vst [vmem:[%s1831_s7 + $0x58] sm:$0xff] %v1565_v51   ;;  %v1047_v46 = vmul.f32 %v779_v56, %v779_v56  ;;  %v1008_v28 = vadd.f32 %v1007_v44, %v779_v56 }
  0xef   : > { %v729_v52 = vpop.f32.mrf.mxu2  ;;  %v1078_v48 = vadd.f32 %v1077_v14, %v1047_v46 }
  0xf0   : > { %v818_v53 = vpop.f32.mrf.mxu3 }
  0xf1   : > { %v691_v54 = vpop.f32.mrf.mxu0  ;;  %v1873_v59 = vadd.f32 %v818_v53, %v729_v52 }
  0xf2   : > { %v780_v55 = vpop.f32.mrf.mxu1 }
  0xf3   : > { %v781_v57 = vadd.f32 %v780_v55, %v691_v54 }
  0xf5   : > { %v1530_v58 = vpack.c.bf16 %v781_v57, %v779_v56  ;;  %v1048_v16 = vmul.f32 %v781_v57, %v781_v57  ;;  %v1009_v49 = vadd.f32 %v1008_v28, %v781_v57 }
  0xf7   : > { %1590 = vst [vmem:[%s1831_s7 + $0x20] sm:$0xff] %v1530_v58   ;;  %v731_v60 = vpop.f32.mrf.mxu2  ;;  %v1079_v58 = vadd.f32 %v1078_v48, %v1048_v16  ;;  %v1060_v48 = vmul.f32 %v1859_v36, %v1859_v36 }
  0xf8   : > { %v820_v62 = vpop.f32.mrf.mxu3 }
  0xf9   : > { %v694_v63 = vpop.f32.mrf.mxu0  ;;  %v1875_v1 = vadd.f32 %v820_v62, %v731_v60 }
  0xfa   : > { %v783_v0 = vpop.f32.mrf.mxu1 }
  0xfb   : > { %v1570_v3 = vpack.c.bf16 %v1875_v1, %v1873_v59  ;;  %v784_v8 = vadd.f32 %v783_v0, %v694_v63 }
  0xfd   : > { %1598 = vst [vmem:[%s1831_s7 + $0x60] sm:$0xff] %v1570_v3   ;;  %v1049_v51 = vmul.f32 %v784_v8, %v784_v8  ;;  %v1010_v43 = vadd.f32 %v1009_v49, %v784_v8 }
  0xff   : > { %v734_v4 = vpop.f32.mrf.mxu2  ;;  %v1080_v62 = vadd.f32 %v1079_v58, %v1049_v51  ;;  %v1061_v51 = vmul.f32 %v1865_v45, %v1865_v45 }
 0x100   : > { %v823_v5 = vpop.f32.mrf.mxu3 }
 0x101   : > { %v696_v6 = vpop.f32.mrf.mxu0  ;;  %v1881_v11 = vadd.f32 %v823_v5, %v734_v4 }
 0x102   : > { %v785_v7 = vpop.f32.mrf.mxu1 }
 0x103   : > { %v786_v9 = vadd.f32 %v785_v7, %v696_v6 }
 0x105   : > { %v1535_v10 = vpack.c.bf16 %v786_v9, %v784_v8  ;;  %v1050_v60 = vmul.f32 %v786_v9, %v786_v9  ;;  %v1011_v63 = vadd.f32 %v1010_v43, %v786_v9 }
 0x107   : > { %1591 = vst [vmem:[%s1831_s7 + $0x28] sm:$0xff] %v1535_v10   ;;  %v736_v12 = vpop.f32.mrf.mxu2  ;;  %v1081_v4 = vadd.f32 %v1080_v62, %v1050_v60 }
 0x108   : > { %v825_v13 = vpop.f32.mrf.mxu3 }
 0x109   : > { %v699_v15 = vpop.f32.mrf.mxu0  ;;  %v1883_v19 = vadd.f32 %v825_v13, %v736_v12 }
 0x10a   : > { %v788_v18 = vpop.f32.mrf.mxu1 }
 0x10b   : > { %v1575_v21 = vpack.c.bf16 %v1883_v19, %v1881_v11  ;;  %v789_v39 = vadd.f32 %v788_v18, %v699_v15 }
 0x10d   : > { %1599 = vst [vmem:[%s1831_s7 + $0x68] sm:$0xff] %v1575_v21   ;;  %v1051_v0 = vmul.f32 %v789_v39, %v789_v39  ;;  %v1012_v57 = vadd.f32 %v1011_v63, %v789_v39  ;;  %v1066_v63 = vmul.f32 %v1883_v19, %v1883_v19 }
 0x10f   : > { %v739_v30 = vpop.f32.mrf.mxu2  ;;  %v1082_v6 = vadd.f32 %v1081_v4, %v1051_v0 }
 0x110   : > { %v828_v32 = vpop.f32.mrf.mxu3 }
 0x111   : > { %v701_v34 = vpop.f32.mrf.mxu0  ;;  %v1894_v29 = vadd.f32 %v828_v32, %v739_v30 }
 0x112   : > { %v790_v35 = vpop.f32.mrf.mxu1 }
 0x113   : > { %v791_v40 = vadd.f32 %v790_v35, %v701_v34 }
 0x115   : > { %v1540_v47 = vpack.c.bf16 %v791_v40, %v789_v39  ;;  %v1052_v5 = vmul.f32 %v791_v40, %v791_v40  ;;  %v1013_v7 = vadd.f32 %v1012_v57, %v791_v40  ;;  %v1057_v40 = vmul.f32 %v1846_v17, %v1846_v17 }
 0x117   : > { %1592 = vst [vmem:[%s1831_s7 + $0x30] sm:$0xff] %v1540_v47   ;;  %v741_v52 = vpop.f32.mrf.mxu2  ;;  %v1083_v18 = vadd.f32 %v1082_v6, %v1052_v5 }
 0x118   : > { %v830_v53 = vpop.f32.mrf.mxu3 }
 0x119   : > { %v704_v42 = vpop.f32.mrf.mxu0  ;;  %v1896_v55 = vadd.f32 %v830_v53, %v741_v52  ;;  %v1062_v53 = vmul.f32 %v1867_v50, %v1867_v50 }
 0x11a   : > { %v793_v54 = vpop.f32.mrf.mxu1 }
 0x11b   : > { %v1580_v56 = vpack.c.bf16 %v1896_v55, %v1894_v29  ;;  %v794_v3 = vadd.f32 %v793_v54, %v704_v42 }
 0x11d   : > { %1600 = vst [vmem:[%s1831_s7 + $0x70] sm:$0xff] %v1580_v56   ;;  %v1053_v10 = vmul.f32 %v794_v3, %v794_v3  ;;  %v1014_v20 = vadd.f32 %v1013_v7, %v794_v3 }
 0x11f   : > { %v744_v12 = vpop.f32.mrf.mxu2  ;;  %v1084_v23 = vadd.f32 %v1083_v18, %v1053_v10 }
 0x120   : > { %v833_v13 = vpop.f32.mrf.mxu3 }
 0x121   : > { %v706_v15 = vpop.f32.mrf.mxu0  ;;  %v834_v32 = vadd.f32 %v833_v13, %v744_v12 }
 0x122   : > { %v795_v8 = vpop.f32.mrf.mxu1 }
 0x123   : > { %v796_v21 = vadd.f32 %v795_v8, %v706_v15  ;;  %v1069_v10 = vmul.f32 %v834_v32, %v834_v32 }
 0x125   : > { %v1545_v24 = vpack.c.bf16 %v796_v21, %v794_v3  ;;  %v1015_v9 = vadd.f32 %v1014_v20, %v796_v21  ;;  %v1054_v25 = vmul.f32 %v796_v21, %v796_v21 }
 0x127   : > { %1593 = vst [vmem:[%s1831_s7 + $0x38] sm:$0xff] %v1545_v24   ;;  %v1016_v27 = vadd.f32 %v1015_v9, %v1834_v61  ;;  %v1085_v30 = vadd.f32 %v1084_v23, %v1054_v25  ;;  %v746_v37 = vpop.f32.mrf.mxu2  ;;  %v1058_v61 = vmul.f32 %v1848_v22, %v1848_v22 }
 0x128   : > { %v835_v38 = vpop.f32.mrf.mxu3 }
 0x129   : > { %v1017_v34 = vadd.f32 %v1016_v27, %v1836_v2  ;;  %v1086_v35 = vadd.f32 %v1085_v30, %v1055_v26  ;;  %v836_v39 = vadd.f32 %v835_v38, %v746_v37  ;;  %v1059_v2 = vmul.f32 %v1857_v31, %v1857_v31 }
 0x12b   : > { %v1018_v41 = vadd.f32 %v1017_v34, %v1846_v17  ;;  %v1087_v44 = vadd.f32 %v1086_v35, %v1056_v33  ;;  %v1585_v46 = vpack.c.bf16 %v836_v39, %v834_v32  ;;  %v1070_v13 = vmul.f32 %v836_v39, %v836_v39 }
 0x12d   : > { %v1019_v47 = vadd.f32 %v1018_v41, %v1848_v22  ;;  %v1088_v14 = vadd.f32 %v1087_v44, %v1057_v40  ;;  %1601 = vst [vmem:[%s1831_s7 + $0x78] sm:$0xff] %v1585_v46  }
 0x12f   : > { %v1020_v28 = vadd.f32 %v1019_v47, %v1857_v31  ;;  %v1089_v16 = vadd.f32 %v1088_v14, %v1058_v61  ;;  %v1063_v31 = vmul.f32 %v1873_v59, %v1873_v59 }
 0x131   : > { %v1021_v17 = vadd.f32 %v1020_v28, %v1859_v36  ;;  %v1090_v49 = vadd.f32 %v1089_v16, %v1059_v2  ;;  %v1064_v36 = vmul.f32 %v1875_v1, %v1875_v1 }
 0x133   : > { %v1091_v52 = vadd.f32 %v1090_v49, %v1060_v48  ;;  %v1022_v22 = vadd.f32 %v1021_v17, %v1865_v45  ;;  %v1065_v45 = vmul.f32 %v1881_v11, %v1881_v11 }
 0x135   : > { %v1023_v42 = vadd.f32 %v1022_v22, %v1867_v50  ;;  %v1092_v54 = vadd.f32 %v1091_v52, %v1061_v51 }
 0x137   : > { %v1024_v58 = vadd.f32 %v1023_v42, %v1873_v59  ;;  %v1093_v43 = vadd.f32 %v1092_v54, %v1062_v53 }
 0x139   : > { %v1025_v60 = vadd.f32 %v1024_v58, %v1875_v1  ;;  %v1094_v56 = vadd.f32 %v1093_v43, %v1063_v31  ;;  %v1067_v1 = vmul.f32 %v1894_v29, %v1894_v29 }
 0x13b   : > { %v1026_v62 = vadd.f32 %v1025_v60, %v1881_v11  ;;  %v1095_v50 = vadd.f32 %v1094_v56, %v1064_v36  ;;  %v1068_v11 = vmul.f32 %v1896_v55, %v1896_v55 }
 0x13d   : > { %v1027_v0 = vadd.f32 %v1026_v62, %v1883_v19  ;;  %v1096_v59 = vadd.f32 %v1095_v50, %v1065_v45 }
 0x13f   : > { %v1028_v3 = vadd.f32 %v1027_v0, %v1894_v29  ;;  %v1097_v4 = vadd.f32 %v1096_v59, %v1066_v63 }
 0x141   : > { %v1098_v57 = vadd.f32 %v1097_v4, %v1067_v1  ;;  %v1029_v5 = vadd.f32 %v1028_v3, %v1896_v55 }
 0x143   : > { %v1099_v6 = vadd.f32 %v1098_v57, %v1068_v11  ;;  %v1030_v7 = vadd.f32 %v1029_v5, %v834_v32 }
 0x145   : > { %v1100_v12 = vadd.f32 %v1099_v6, %v1069_v10  ;;  %v1031_v19 = vadd.f32 %v1030_v7, %v836_v39 }
 0x147   : > { %v1032_v15 = vrot.slane %v1031_v19, 4  ;;  %v1101_v8 = vadd.f32 %v1100_v12, %v1070_v13 }
 0x149   : > { %v1033_v18 = vadd.f32 %v1032_v15, %v1031_v19  ;;  %v1102_v20 = vrot.slane %v1101_v8, 4 }
 0x14b   : > { %v1034_v29 = vrot.slane %v1033_v18, 2  ;;  %v1103_v21 = vadd.f32 %v1102_v20, %v1101_v8 }
 0x14d   : > { %v1035_v23 = vadd.f32 %v1034_v29, %v1033_v18  ;;  %v1104_v24 = vrot.slane %v1103_v21, 2 }
 0x14f   : > { %v1036_v9 = vrot.slane %v1035_v23, 1  ;;  %v1105_v25 = vadd.f32 %v1104_v24, %v1103_v21 }
 0x151   : > { %v1037_v55 = vadd.f32 %v1036_v9, %v1035_v23  ;;  %v1106_v26 = vrot.slane %v1105_v25, 1 }
 0x153   : > { %1038 = vst [vmem:[%s271_s10] sm:$0x1] %v1037_v55  ;;  %v1107_v27 = vadd.f32 %v1106_v26, %v1105_v25 }
 0x155   : > { %1108 = vst [vmem:[%s271_s10 + $0x1] sm:$0x1] %v1107_v27 }
 0x156 PF: > { %s14_s14 = sadd.s32 1, %s1664_s14   ;;  %s1963_s12 = smov %s1660_s13 }
 0x157   : > { %p11_p6 = scmp.ge.s32.totalorder %s14_s14, 4   ;;  %s1964_s13 = smov %s1966_s15 }
 0x159   :  { %13 = sbr.rel (!%p11_p6) target bundleno = 2 (0x2), region = 81 }

// kernel: _lambda_.24
= control target key start
LH: loop header
LB: loop body
LE: loop exit
PB: predicated region body
PF: predicated region fallthrough
CT: control target
= control target key end

     0   :  { %s524_s12 = smov 0   ;;  %s526_s13 = smov 0   ;;  %s570_s0 = inlined_call_operand.vmem [shape: bf16[128,128], index: 0, kind: input, shape index: {}]   ;;  %s571_s1 = inlined_call_operand.vmem [shape: f32[1,128], index: 1, kind: input, shape index: {}]   ;;  %s572_s2 = inlined_call_operand.vmem [shape: f32[1,128], index: 2, kind: input, shape index: {}]   ;;  %s573_s3 = inlined_call_operand.vmem [shape: bf16[128,128], index: 3, kind: output, shape index: {}]  }
   0x1   :  { %s528_s14 = smov 0  }
   0x2 LB: > { %s25_s15 = sadd.s32 1, %s498_s13  ;;  %p405_p0 = scmp.ge.s32.totalorder %s502_s14, 1  ;;  %s502_s14 = sphi %s528_s14, %s13_s14   ;;  %s498_s13 = sphi %s526_s13, %s575_s13   ;;  %s494_s12 = sphi %s524_s12, %s574_s12  }
   0x3   : > { %p27_p1 = scmp.ge.s32.totalorder %s25_s15, 2  ;;  %p173_p2 = scmp.lt.s32.totalorder %s502_s14, 3 }
   0x5   : > { %s577_s15 = smov (%p27_p1, %s25_s15), 0  ;;  %p174_p3 = pnand %p405_p0, %p173_p2 }
   0x6   : > { %s406_s16 = sshll.u32 (!%p174_p3), %s494_s12, 3 }
   0x7   : > { %177 = sbr.rel (%p174_p3) target bundleno = 30 (0x1e), region = 32  ;;  %p210_p4 = scmp.lt.s32.totalorder (!%p174_p3), %s406_s16, 15 }
   0xc   : > { %s579_s16 = smov (!%p210_p4, %s406_s16), 15  ;;  %v478_v0 = vld [vmem:[%s571_s1] ss:$0 sm:$0xff] }
   0xd   : > { %s407_s17 = sshll.u32 %s579_s16, 2  ;;  %v479_v6 = vld [vmem:[%s572_s2] ss:$0 sm:$0xff] }
   0xe   : > { %s216_s20 = scalar_lea.vmem %s570_s0, %s407_s17  ;;  %s231_s27 = scalar_lea.vmem %s573_s3, %s407_s17 }
   0xf   : > { %v413_v1 = vld [vmem:[%s216_s20] sm:$0xff]   ;;  %v448_v2 = vld [vmem:[%s216_s20 + $0x8] sm:$0xff]   ;;  %v449_v3 = vld [vmem:[%s216_s20 + $0x10] sm:$0xff]  }
  0x10   : > { %v414_v4 = vunpack.c.l.bf16 %v413_v1  ;;  %v415_v5 = vunpack.c.h.bf16 %v413_v1  ;;  %v418_v7 = vunpack.c.l.bf16 %v448_v2  ;;  %v419_v8 = vunpack.c.h.bf16 %v448_v2  ;;  %v450_v9 = vld [vmem:[%s216_s20 + $0x18] sm:$0xff]  }
  0x11   : > { %v422_v10 = vunpack.c.l.bf16 %v449_v3  ;;  %v423_v11 = vunpack.c.h.bf16 %v449_v3  ;;  %v426_v12 = vunpack.c.l.bf16 %v450_v9  ;;  %v427_v13 = vunpack.c.h.bf16 %v450_v9 }
  0x12   : > { %v253_v14 = vmul.f32 %v478_v0, %v414_v4  ;;  %v254_v15 = vmul.f32 %v478_v0, %v415_v5  ;;  %v255_v16 = vmul.f32 %v478_v0, %v418_v7  ;;  %v256_v17 = vmul.f32 %v478_v0, %v419_v8 }
  0x13   : > { %v257_v18 = vmul.f32 %v478_v0, %v422_v10  ;;  %v258_v19 = vmul.f32 %v478_v0, %v423_v11  ;;  %v259_v20 = vmul.f32 %v478_v0, %v426_v12  ;;  %v260_v21 = vmul.f32 %v478_v0, %v427_v13 }
  0x14   : > { %v265_v22 = vadd.f32 %v479_v6, %v253_v14  ;;  %v266_v23 = vadd.f32 %v479_v6, %v254_v15  ;;  %v267_v24 = vadd.f32 %v479_v6, %v255_v16  ;;  %v268_v25 = vadd.f32 %v479_v6, %v256_v17 }
  0x15   : > { %v269_v26 = vadd.f32 %v479_v6, %v257_v18  ;;  %v270_v27 = vadd.f32 %v479_v6, %v258_v19  ;;  %v271_v28 = vadd.f32 %v479_v6, %v259_v20  ;;  %v272_v29 = vadd.f32 %v479_v6, %v260_v21 }
  0x16   : > { %v273_v30 = vmax.f32 %v265_v22, 0.0  ;;  %v274_v31 = vmax.f32 %v266_v23, 0.0  ;;  %v275_v32 = vmax.f32 %v267_v24, 0.0  ;;  %v276_v33 = vmax.f32 %v268_v25, 0.0 }
  0x17   : > { %v277_v34 = vmax.f32 %v269_v26, 0.0  ;;  %v278_v35 = vmax.f32 %v270_v27, 0.0  ;;  %v279_v36 = vmax.f32 %v271_v28, 0.0  ;;  %v280_v37 = vmax.f32 %v272_v29, 0.0 }
  0x18   : > { %v431_v38 = vpack.c.bf16 %v274_v31, %v273_v30  ;;  %v436_v39 = vpack.c.bf16 %v276_v33, %v275_v32 }
  0x19   : > { %v441_v40 = vpack.c.bf16 %v278_v35, %v277_v34  ;;  %v446_v41 = vpack.c.bf16 %v280_v37, %v279_v36 }
  0x1a   : > { %432 = vst [vmem:[%s231_s27] sm:$0xff] %v431_v38  }
  0x1b   : > { %451 = vst [vmem:[%s231_s27 + $0x8] sm:$0xff] %v436_v39  }
  0x1c   : > { %452 = vst [vmem:[%s231_s27 + $0x10] sm:$0xff] %v441_v40  }
  0x1d   : > { %453 = vst [vmem:[%s231_s27 + $0x18] sm:$0xff] %v446_v41  }
  0x1e PF: > { %s13_s14 = sadd.s32 1, %s502_s14   ;;  %s574_s12 = smov %s498_s13 }
  0x1f   : > { %p10_p5 = scmp.ge.s32.totalorder %s13_s14, 4   ;;  %s575_s13 = smov %s577_s15 }
  0x21   :  { %12 = sbr.rel (!%p10_p5) target bundleno = 2 (0x2), region = 68 }

// kernel: _lambda_.23
= control target key start
LH: loop header
LB: loop body
LE: loop exit
PB: predicated region body
PF: predicated region fallthrough
CT: control target
= control target key end

     0   :  { %s1307_s12 = smov 0   ;;  %s1309_s13 = smov 0   ;;  %s1486_s0 = inlined_call_operand.vmem [shape: bf16[128,1152], index: 0, kind: input, shape index: {}]   ;;  %s1487_s1 = inlined_call_operand.vmem [shape: bf16[1152,128], index: 1, kind: input, shape index: {}]   ;;  %s1488_s2 = inlined_call_operand.vmem [shape: bf16[128,128], index: 2, kind: output, shape index: {0}]   ;;  %s1489_s3 = inlined_call_operand.vmem [shape: f32[2,8,128], index: 3, kind: output, shape index: {1}]  }
   0x1   :  { %s1311_s14 = smov 0   ;;  %s1313_s15 = smov 0  }
   0x2   :  { %s1315_s16 = smov 0   ;;  %s1317_s17 = smov 0  }
   0x3   :  { %s1319_s18 = smov 0  }
   0x4 LB: > { %s26_s19 = sadd.s32 1, %s1276_s16  ;;  %s33_s20 = sadd.s32 1, %s1280_s17  ;;  %s1284_s18 = sphi %s1319_s18, %s14_s18   ;;  %s1280_s17 = sphi %s1317_s17, %s1495_s17   ;;  %s1276_s16 = sphi %s1315_s16, %s1494_s16   ;;  %s1272_s15 = sphi %s1313_s15, %s1493_s15   ;;  %s1268_s14 = sphi %s1311_s14, %s1492_s14   ;;  %s1264_s13 = sphi %s1309_s13, %s1491_s13   ;;  %s1260_s12 = sphi %s1307_s12, %s1490_s12  }
   0x5   : > { %p27_p0 = scmp.ge.s32.totalorder %s26_s19, 3  ;;  %p49_p1 = scmp.ne.s32.totalorder %s1264_s13, %s1260_s12 }
   0x6   : > { %p50_p2 = scmp.eq.s32.totalorder %s1284_s18, 0  ;;  %s42_s24 = sadd.s32 1, %s1264_s13 }
   0x7   : > { %s1497_s19 = smov (%p27_p0, %s26_s19), 0  ;;  %s1499_s20 = smov (!%p27_p0, %s33_s20), %s1280_s17 }
   0x8   : > { %p51_p3 = por %p50_p2, %p49_p1  ;;  %p35_p4 = scmp.ge.s32.totalorder %s1499_s20, 2 }
   0x9   : > { %s38_s21 = ssub.s32 %s1276_s16, %s1497_s19  ;;  %p930_p6 = scmp.ge.s32.totalorder %s1284_s18, 6 }
   0xa   : > { %s1501_s20 = smov (%p35_p4, %s1499_s20), 0 }
   0xb   : > { %s37_s22 = ssub.s32 %s1280_s17, %s1501_s20  ;;  %159 = sbr.rel (%p930_p6) target bundleno = 41 (0x29), region = 16 }
   0xc   : > { %s39_s23 = sor.u32 %s38_s21, %s37_s22 }
   0xd   : > { %p40_p5 = scmp.eq.s32.totalorder %s39_s23, 0 }
   0xf   : > { %s1358_s25 = scalar_select %p40_p5, %s1264_s13, %s42_s24  }
  0x10   : > { %162 = sbr.rel (!%p51_p3) target bundleno = 41 (0x29), region = 20  ;;  %s164_s26 = sand.u32 (%p51_p3), 1, %s1264_s13  }
  0x11   : > { %s168_s27 = smul.u32 (%p51_p3), 3, %s1276_s16 }
  0x12   : > { %s1170_s28 = smul.u32 (%p51_p3), 96, %s164_s26 }
  0x13   : > { %s1171_s29 = smul.u32 (%p51_p3), 72, %s1280_s17 }
  0x14   : > { %s166_s8 = scalar_lea.vmem (%p51_p3), [#allocation3], %s1170_s28 }
  0x15   : > { %s170_s30 = sadd.s32 %s1171_s29, %s168_s27 }
  0x16   : > { %s933_s4 = sshll.u32 %s170_s30, 2 }
  0x17   : > { %s1367_s7 = scalar_lea.vmem %s1486_s0, %s933_s4 }
  0x18   : > { %v187_v0 = vld [vmem:[%s1367_s7] sm:$0xff]  ;;  %v191_v2 = vld [vmem:[%s1367_s7 + $0x48] sm:$0xff]  ;;  %v195_v4 = vld [vmem:[%s1367_s7 + $0x90] sm:$0xff] }
  0x19   : > { %v189_v1 = vld [vmem:[%s1367_s7 + $0x24] sm:$0xff]  ;;  %188 = vst [vmem:[%s166_s8] sm:$0xff] %v187_v0  ;;  %v193_v3 = vld [vmem:[%s1367_s7 + $0x6c] sm:$0xff]  ;;  %v197_v5 = vld [vmem:[%s1367_s7 + $0xb4] sm:$0xff] }
  0x1a   : > { %190 = vst [vmem:[%s166_s8 + $0xc] sm:$0xff] %v189_v1  ;;  %v199_v6 = vld [vmem:[%s1367_s7 + $0xd8] sm:$0xff]  ;;  %v934_v8 = vld [vmem:[%s1367_s7 + $0x8] sm:$0xf]  ;;  %v936_v9 = vld [vmem:[%s1367_s7 + $0x2c] sm:$0xf] }
  0x1b   : > { %192 = vst [vmem:[%s166_s8 + $0x18] sm:$0xff] %v191_v2  ;;  %v201_v7 = vld [vmem:[%s1367_s7 + $0xfc] sm:$0xff]  ;;  %v938_v10 = vld [vmem:[%s1367_s7 + $0x50] sm:$0xf]  ;;  %v940_v11 = vld [vmem:[%s1367_s7 + $0x74] sm:$0xf] }
  0x1c   : > { %194 = vst [vmem:[%s166_s8 + $0x24] sm:$0xff] %v193_v3  ;;  %v942_v12 = vld [vmem:[%s1367_s7 + $0x98] sm:$0xf]  ;;  %v944_v13 = vld [vmem:[%s1367_s7 + $0xbc] sm:$0xf] }
  0x1d   : > { %196 = vst [vmem:[%s166_s8 + $0x30] sm:$0xff] %v195_v4  ;;  %v946_v14 = vld [vmem:[%s1367_s7 + $0xe0] sm:$0xf]  ;;  %v948_v15 = vld [vmem:[%s1367_s7 + $0x104] sm:$0xf] }
  0x1e   : > { %198 = vst [vmem:[%s166_s8 + $0x3c] sm:$0xff] %v197_v5 }
  0x1f   : > { %200 = vst [vmem:[%s166_s8 + $0x48] sm:$0xff] %v199_v6 }
  0x20   : > { %202 = vst [vmem:[%s166_s8 + $0x54] sm:$0xff] %v201_v7 }
  0x21   : > { %935 = vst [vmem:[%s166_s8 + $0x8] sm:$0xf] %v934_v8 }
  0x22   : > { %937 = vst [vmem:[%s166_s8 + $0x14] sm:$0xf] %v936_v9 }
  0x23   : > { %939 = vst [vmem:[%s166_s8 + $0x20] sm:$0xf] %v938_v10 }
  0x24   : > { %941 = vst [vmem:[%s166_s8 + $0x2c] sm:$0xf] %v940_v11 }
  0x25   : > { %943 = vst [vmem:[%s166_s8 + $0x38] sm:$0xf] %v942_v12 }
  0x26   : > { %945 = vst [vmem:[%s166_s8 + $0x44] sm:$0xf] %v944_v13 }
  0x27   : > { %947 = vst [vmem:[%s166_s8 + $0x50] sm:$0xf] %v946_v14 }
  0x28   : > { %949 = vst [vmem:[%s166_s8 + $0x5c] sm:$0xf] %v948_v15 }
  0x29 PF: > { %p950_p7 = scmp.ge.s32.totalorder %s1284_s18, 1  ;;  %p243_p8 = scmp.lt.s32.totalorder %s1284_s18, 7 }
  0x2b   : > { %p244_p9 = pnand %p950_p7, %p243_p8 }
  0x2c   : > { %s250_s9 = sand.u32 (!%p244_p9), 1, %s1260_s12   ;;  %s293_s10 = smul.u32 (!%p244_p9), 48, %s1268_s14 }
  0x2d   : > { %247 = sbr.rel (%p244_p9) target bundleno = 324 (0x144), region = 50  ;;  %s952_s21 = sshll.u32 (!%p244_p9), %s1272_s15, 3 }
  0x2e   : > { %s1172_s11 = smul.u32 (!%p244_p9), 96, %s250_s9  ;;  %p294_p10 = scmp.lt.s32.totalorder (!%p244_p9), %s293_s10, 143 }
  0x2f   : > { %p303_p11 = scmp.lt.s32.totalorder (!%p244_p9), %s952_s21, 15  ;;  %p311_p12 = scmp.lt.s32.totalorder (!%p244_p9), %s1272_s15, 1 }
  0x30   : > { %s1407_s7 = scalar_lea.vmem (!%p244_p9), [#allocation3], %s1172_s11  ;;  %p955_p13 = scmp.ne.s32.totalorder (!%p244_p9), %s1268_s14, 0 }
  0x32   : > { %s1503_s10 = smov (!%p294_p10, %s293_s10), 143  ;;  %s1505_s21 = smov (!%p303_p11, %s952_s21), 15 }
  0x33   : > { %s951_s22 = sshll.u32 %s1503_s10, 2  ;;  %s953_s27 = sshll.u32 %s1505_s21, 2 }
  0x34   : > { %s1394_s26 = scalar_lea.vmem %s1487_s1, %s951_s22  ;;  %s1399_s30 = scalar_lea.vmem %s1488_s2, %s953_s27 }
  0x35   : > { %s1507_s15 = smov (!%p311_p12, %s1272_s15), 1  ;;  %321 = sbr.rel (%p955_p13) target bundleno = 67 (0x43), region = 58 }
  0x36   : > { %s954_s12 = sshll.u32 %s1507_s15, 3 }
  0x37   : > { %s1405_s6 = scalar_lea.vmem %s1489_s3, %s954_s12 }
  0x3a   : > { %v1286_v16 = vmov 0.0  }
  0x3b   : > { %322 = vst [vmem:[#allocation2 + $0x30] sm:$0xff] %v1286_v16 }
  0x3c   : > { %323 = vst [vmem:[#allocation2] sm:$0xff] %v1286_v16 }
  0x3d   : > { %324 = vst [vmem:[#allocation2 + $0x18] sm:$0xff] %v1286_v16 }
  0x3e   : > { %325 = vst [vmem:[#allocation2 + $0x10] sm:$0xff] %v1286_v16 }
  0x3f   : > { %326 = vst [vmem:[#allocation2 + $0x8] sm:$0xff] %v1286_v16 }
  0x40   : > { %327 = vst [vmem:[#allocation2 + $0x20] sm:$0xff] %v1286_v16 }
  0x41   : > { %328 = vst [vmem:[#allocation2 + $0x28] sm:$0xff] %v1286_v16 }
  0x42   : > { %329 = vst [vmem:[#allocation2 + $0x38] sm:$0xff] %v1286_v16 }
  0x43 PF: > { %v1122_v17 = vld [vmem:[%s1394_s26 + $0x38] sm:$0xff]  ;;  %v1121_v20 = vld [vmem:[%s1394_s26 + $0x30] sm:$0xff]  ;;  %v1120_v23 = vld [vmem:[%s1394_s26 + $0x28] sm:$0xff]  ;;  %p1100_p0 = scmp.ne.s32.totalorder %s1268_s14, 2 }
  0x44   : > { %v1130_v18 = vld [vmem:[%s1394_s26 + $0x78] sm:$0xff]  ;;  %610 = vmatpush.bf16.msra.mxu0 %v1122_v17  ;;  %v1129_v21 = vld [vmem:[%s1394_s26 + $0x70] sm:$0xff]  ;;  %1162 = vmatpush.bf16.msra.mxu3 %v1122_v17  ;;  %v1128_v24 = vld [vmem:[%s1394_s26 + $0x68] sm:$0xff] }
  0x45   : > { %v1138_v19 = vld [vmem:[%s1394_s26 + $0xb8] sm:$0xff]  ;;  %639 = vmatpush.bf16.msra.mxu1 %v1130_v18  ;;  %v1137_v22 = vld [vmem:[%s1394_s26 + $0xb0] sm:$0xff]  ;;  %v1136_v25 = vld [vmem:[%s1394_s26 + $0xa8] sm:$0xff] }
  0x46   : > { %668 = vmatpush.bf16.msra.mxu2 %v1138_v19  ;;  %v1119_v26 = vld [vmem:[%s1394_s26 + $0x20] sm:$0xff]  ;;  %v1118_v29 = vld [vmem:[%s1394_s26 + $0x18] sm:$0xff]  ;;  %v1117_v32 = vld [vmem:[%s1394_s26 + $0x10] sm:$0xff] }
  0x47   : > { %v1127_v27 = vld [vmem:[%s1394_s26 + $0x60] sm:$0xff]  ;;  %v1126_v30 = vld [vmem:[%s1394_s26 + $0x58] sm:$0xff]  ;;  %v1125_v33 = vld [vmem:[%s1394_s26 + $0x50] sm:$0xff] }
  0x48   : > { %611 = vmatpush.bf16.msra.mxu0 %v1121_v20  ;;  %1163 = vmatpush.bf16.msra.mxu3 %v1121_v20  ;;  %v1135_v28 = vld [vmem:[%s1394_s26 + $0xa0] sm:$0xff]  ;;  %v1134_v31 = vld [vmem:[%s1394_s26 + $0x98] sm:$0xff]  ;;  %v1133_v34 = vld [vmem:[%s1394_s26 + $0x90] sm:$0xff] }
  0x49   : > { %640 = vmatpush.bf16.msra.mxu1 %v1129_v21  ;;  %v1116_v35 = vld [vmem:[%s1394_s26 + $0x8] sm:$0xff]  ;;  %v1115_v38 = vld [vmem:[%s1394_s26] sm:$0xff]  ;;  %v960_v44 = vld [vmem:[%s1407_s7 + $0xc] sm:$0xf0] }
  0x4a   : > { %669 = vmatpush.bf16.msra.mxu2 %v1137_v22  ;;  %v1124_v36 = vld [vmem:[%s1394_s26 + $0x48] sm:$0xff]  ;;  %v1123_v39 = vld [vmem:[%s1394_s26 + $0x40] sm:$0xff]  ;;  %v1105_v46 = vld [vmem:[%s1407_s7 + $0x10] sm:$0xf0] }
  0x4b   : > { %v1132_v37 = vld [vmem:[%s1394_s26 + $0x88] sm:$0xff]  ;;  %v1131_v40 = vld [vmem:[%s1394_s26 + $0x80] sm:$0xff]  ;;  %v970_v47 = vld [vmem:[%s1407_s7 + $0x18] sm:$0xf] }
  0x4c   : > { %612 = vmatpush.bf16.msra.mxu0 %v1120_v23  ;;  %1164 = vmatpush.bf16.msra.mxu3 %v1120_v23  ;;  %v958_v41 = vld [vmem:[%s1407_s7] sm:$0xf]  ;;  %v1104_v42 = vld [vmem:[%s1407_s7 + $0x8] sm:$0xf0]  ;;  %v1103_v43 = vld [vmem:[%s1407_s7 + $0x4] sm:$0xf] }
  0x4d   : > { %641 = vmatpush.bf16.msra.mxu1 %v1128_v24  ;;  %v966_v45 = vld [vmem:[%s1407_s7 + $0x8] sm:$0xf]  ;;  %v1107_v48 = vld [vmem:[%s1407_s7 + $0x20] sm:$0xf0]  ;;  %v959_v49 = vor.u32 %v1104_v42, %v958_v41  ;;  %v963_v50 = vor.u32 %v1103_v43, %v960_v44  ;;  %v1106_v53 = vld [vmem:[%s1407_s7 + $0x1c] sm:$0xf] }
  0x4e   : > { %670 = vmatpush.bf16.msra.mxu2 %v1136_v25  ;;  %v967_v51 = vor.u32 %v1105_v46, %v966_v45  ;;  %v971_v52 = vor.u32 %v1107_v48, %v970_v47  ;;  %v972_v54 = vld [vmem:[%s1407_s7 + $0x24] sm:$0xf0]  ;;  %v978_v55 = vld [vmem:[%s1407_s7 + $0x20] sm:$0xf]  ;;  %v1108_v56 = vld [vmem:[%s1407_s7 + $0x28] sm:$0xf0] }
  0x4f   : > { %v982_v57 = vld [vmem:[%s1407_s7 + $0x30] sm:$0xf]  ;;  %v1110_v58 = vld [vmem:[%s1407_s7 + $0x38] sm:$0xf0]  ;;  %v975_v59 = vor.u32 %v1106_v53, %v972_v54  ;;  %v979_v60 = vor.u32 %v1108_v56, %v978_v55  ;;  %v1109_v62 = vld [vmem:[%s1407_s7 + $0x34] sm:$0xf] }
  0x50   : > { %613 = vmatpush.bf16.msra.mxu0 %v1119_v26  ;;  %1165 = vmatpush.bf16.msra.mxu3 %v1119_v26  ;;  %v983_v61 = vor.u32 %v1110_v58, %v982_v57  ;;  %v984_v63 = vld [vmem:[%s1407_s7 + $0x3c] sm:$0xf0]  ;;  %v990_v0 = vld [vmem:[%s1407_s7 + $0x38] sm:$0xf]  ;;  %v1111_v1 = vld [vmem:[%s1407_s7 + $0x40] sm:$0xf0] }
  0x51   : > { %642 = vmatpush.bf16.msra.mxu1 %v1127_v27  ;;  %v994_v2 = vld [vmem:[%s1407_s7 + $0x48] sm:$0xf]  ;;  %v1113_v3 = vld [vmem:[%s1407_s7 + $0x50] sm:$0xf0]  ;;  %v987_v4 = vor.u32 %v1109_v62, %v984_v63  ;;  %v991_v5 = vor.u32 %v1111_v1, %v990_v0  ;;  %v1112_v7 = vld [vmem:[%s1407_s7 + $0x4c] sm:$0xf] }
  0x52   : > { %671 = vmatpush.bf16.msra.mxu2 %v1135_v28  ;;  %v995_v6 = vor.u32 %v1113_v3, %v994_v2  ;;  %v996_v8 = vld [vmem:[%s1407_s7 + $0x54] sm:$0xf0]  ;;  %v1002_v9 = vld [vmem:[%s1407_s7 + $0x50] sm:$0xf]  ;;  %v1114_v10 = vld [vmem:[%s1407_s7 + $0x58] sm:$0xf0] }
  0x53   : > { %v999_v11 = vor.u32 %v1112_v7, %v996_v8  ;;  %v1003_v12 = vor.u32 %v1114_v10, %v1002_v9  ;;  %v330_v16 = vld [vmem:[#allocation2 + $0x30] sm:$0xff]  ;;  %v331_v24 = vld [vmem:[#allocation2] sm:$0xff]  ;;  %v334_v44 = vld [vmem:[#allocation2 + $0x8] sm:$0xff] }
  0x54   : > { %614 = vmatpush.bf16.msra.mxu0 %v1118_v29  ;;  %1166 = vmatpush.bf16.msra.mxu3 %v1118_v29  ;;  %v336_v58 = vld [vmem:[#allocation2 + $0x28] sm:$0xff]  ;;  %v337_v1 = vld [vmem:[#allocation2 + $0x38] sm:$0xff] }
  0x55   : > { %643 = vmatpush.bf16.msra.mxu1 %v1126_v30 }
  0x56   : > { %672 = vmatpush.bf16.msra.mxu2 %v1134_v31  ;;  %v332_v31 = vld [vmem:[#allocation2 + $0x18] sm:$0xff] }
  0x58   : > { %615 = vmatpush.bf16.msra.mxu0 %v1117_v32  ;;  %1167 = vmatpush.bf16.msra.mxu3 %v1117_v32 }
  0x59   : > { %644 = vmatpush.bf16.msra.mxu1 %v1125_v33 }
  0x5a   : > { %673 = vmatpush.bf16.msra.mxu2 %v1133_v34 }
  0x5c   : > { %616 = vmatpush.bf16.msra.mxu0 %v1116_v35  ;;  %1168 = vmatpush.bf16.msra.mxu3 %v1116_v35 }
  0x5d   : > { %645 = vmatpush.bf16.msra.mxu1 %v1124_v36 }
  0x5e   : > { %674 = vmatpush.bf16.msra.mxu2 %v1132_v37 }
  0x60   : > { %617 = vmatpush.bf16.msra.mxu0 %v1115_v38  ;;  %1169 = vmatpush.bf16.msra.mxu3 %v1115_v38  ;;  %v333_v38 = vld [vmem:[#allocation2 + $0x10] sm:$0xff] }
  0x61   : > { %646 = vmatpush.bf16.msra.mxu1 %v1123_v39 }
  0x62   : > { %675 = vmatpush.bf16.msra.mxu2 %v1131_v40 }
  0x63   : > { %618 = vmatmul.bf16.vlgmr.msra.gmra.mxu0 %v959_v49  ;;  %623 = vmatmul.bf16.vlgmr.msra.gmra.mxu3 %v971_v52 }
  0x64   : > { %647 = vmatmul.bf16.vlgmr.msra.gmra.mxu1 %v963_v50 }
  0x65   : > { %676 = vmatmul.bf16.vlgmr.msra.gmra.mxu2 %v967_v51  ;;  %v335_v51 = vld [vmem:[#allocation2 + $0x20] sm:$0xff] }
  0x73   : > { %628 = vmatmul.bf16.gmra.mxu3 %v983_v61 }
  0x74   : > { %652 = vmatmul.bf16.gmra.mxu1 %v975_v59 }
  0x75   : > { %681 = vmatmul.bf16.gmra.mxu2 %v979_v60 }
  0x83   : > { %633 = vmatmul.bf16.gmra.mxu3 %v995_v6 }
  0x84   : > { %657 = vmatmul.bf16.gmra.mxu1 %v987_v4 }
  0x85   : > { %686 = vmatmul.bf16.gmra.mxu2 %v991_v5 }
  0x94   : > { %662 = vmatmul.bf16.gmra.mxu1 %v999_v11 }
  0x95   : > { %691 = vmatmul.bf16.gmra.mxu2 %v1003_v12 }
  0xe0   : > { %v619_v14 = vpop.f32.mrf.mxu0 }
  0xe1   : > { %v648_v13 = vpop.f32.mrf.mxu1 }
  0xe2   : > { %v649_v15 = vadd.f32 %v648_v13, %v619_v14 }
  0xe6   : > { %v624_v22 = vpop.f32.mrf.mxu3 }
  0xe8   : > { %v677_v17 = vpop.f32.mrf.mxu2  ;;  %v621_v21 = vpop.f32.mrf.mxu0 }
  0xe9   : > { %v678_v18 = vadd.f32 %v677_v17, %v649_v15  ;;  %v650_v19 = vpop.f32.mrf.mxu1 }
  0xea   : > { %v651_v23 = vadd.f32 %v650_v19, %v621_v21 }
  0xeb   : > { %v697_v20 = vadd.f32 %v678_v18, %v330_v16 }
  0xed   : > { %705 = vst [vmem:[#allocation2 + $0x30] sm:$0xff] %v697_v20 }
  0xee   : > { %v626_v30 = vpop.f32.mrf.mxu3 }
  0xf0   : > { %v679_v25 = vpop.f32.mrf.mxu2 }
  0xf1   : > { %v680_v26 = vadd.f32 %v679_v25, %v651_v23  ;;  %v653_v27 = vpop.f32.mrf.mxu1 }
  0xf2   : > { %v654_v29 = vadd.f32 %v653_v27, %v624_v22 }
  0xf3   : > { %v698_v28 = vadd.f32 %v680_v26, %v331_v24 }
  0xf5   : > { %706 = vst [vmem:[#allocation2] sm:$0xff] %v698_v28 }
  0xf6   : > { %v629_v37 = vpop.f32.mrf.mxu3 }
  0xf8   : > { %v682_v32 = vpop.f32.mrf.mxu2 }
  0xf9   : > { %v683_v33 = vadd.f32 %v682_v32, %v654_v29  ;;  %v655_v34 = vpop.f32.mrf.mxu1 }
  0xfa   : > { %v656_v36 = vadd.f32 %v655_v34, %v626_v30 }
  0xfb   : > { %v699_v35 = vadd.f32 %v683_v33, %v332_v31 }
  0xfd   : > { %707 = vst [vmem:[#allocation2 + $0x18] sm:$0xff] %v699_v35 }
  0xfe   : > { %v631_v48 = vpop.f32.mrf.mxu3 }
 0x100   : > { %v684_v39 = vpop.f32.mrf.mxu2 }
 0x101   : > { %v685_v40 = vadd.f32 %v684_v39, %v656_v36  ;;  %v658_v41 = vpop.f32.mrf.mxu1 }
 0x102   : > { %v659_v43 = vadd.f32 %v658_v41, %v629_v37 }
 0x103   : > { %v700_v42 = vadd.f32 %v685_v40, %v333_v38 }
 0x105   : > { %708 = vst [vmem:[#allocation2 + $0x10] sm:$0xff] %v700_v42 }
 0x106   : > { %v634_v56 = vpop.f32.mrf.mxu3 }
 0x108   : > { %v687_v45 = vpop.f32.mrf.mxu2 }
 0x109   : > { %v688_v46 = vadd.f32 %v687_v45, %v659_v43  ;;  %v660_v47 = vpop.f32.mrf.mxu1 }
 0x10a   : > { %v661_v50 = vadd.f32 %v660_v47, %v631_v48 }
 0x10b   : > { %v701_v49 = vadd.f32 %v688_v46, %v334_v44 }
 0x10d   : > { %709 = vst [vmem:[#allocation2 + $0x8] sm:$0xff] %v701_v49 }
 0x10e   : > { %v636_v63 = vpop.f32.mrf.mxu3 }
 0x110   : > { %v689_v52 = vpop.f32.mrf.mxu2 }
 0x111   : > { %v690_v53 = vadd.f32 %v689_v52, %v661_v50  ;;  %v663_v54 = vpop.f32.mrf.mxu1 }
 0x112   : > { %v664_v57 = vadd.f32 %v663_v54, %v634_v56 }
 0x113   : > { %v702_v55 = vadd.f32 %v690_v53, %v335_v51 }
 0x115   : > { %710 = vst [vmem:[#allocation2 + $0x20] sm:$0xff] %v702_v55 }
 0x118   : > { %v692_v59 = vpop.f32.mrf.mxu2 }
 0x119   : > { %v693_v60 = vadd.f32 %v692_v59, %v664_v57  ;;  %v665_v62 = vpop.f32.mrf.mxu1 }
 0x11a   : > { %v666_v0 = vadd.f32 %v665_v62, %v636_v63 }
 0x11b   : > { %v703_v61 = vadd.f32 %v693_v60, %v336_v58 }
 0x11d   : > { %711 = vst [vmem:[#allocation2 + $0x28] sm:$0xff] %v703_v61 }
 0x120   : > { %v694_v2 = vpop.f32.mrf.mxu2 }
 0x121   : > { %v695_v3 = vadd.f32 %v694_v2, %v666_v0  ;;  %716 = sbr.rel (%p1100_p0) target bundleno = 324 (0x144), region = 62 }
 0x123   : > { %v704_v4 = vadd.f32 %v695_v3, %v337_v1 }
 0x125   : > { %712 = vst [vmem:[#allocation2 + $0x38] sm:$0xff] %v704_v4 }
 0x126   : > { %v717_v5 = vld [vmem:[#allocation2 + $0x30] sm:$0xff]  ;;  %v718_v6 = vld [vmem:[#allocation2] sm:$0xff]  ;;  %v719_v7 = vld [vmem:[#allocation2 + $0x18] sm:$0xff] }
 0x127   : > { %v1142_v8 = vpack.c.bf16 %v718_v6, %v717_v5  ;;  %v741_v9 = vadd.f32 %v718_v6, %v717_v5  ;;  %v755_v10 = vmul.f32 %v717_v5, %v717_v5  ;;  %v756_v11 = vmul.f32 %v718_v6, %v718_v6  ;;  %v720_v12 = vld [vmem:[#allocation2 + $0x10] sm:$0xff]  ;;  %v721_v13 = vld [vmem:[#allocation2 + $0x8] sm:$0xff]  ;;  %v722_v14 = vld [vmem:[#allocation2 + $0x20] sm:$0xff] }
 0x128   : > { %v1147_v15 = vpack.c.bf16 %v720_v12, %v719_v7  ;;  %v757_v16 = vmul.f32 %v719_v7, %v719_v7  ;;  %v1152_v17 = vpack.c.bf16 %v722_v14, %v721_v13  ;;  %v758_v20 = vmul.f32 %v720_v12, %v720_v12  ;;  %v723_v21 = vld [vmem:[#allocation2 + $0x28] sm:$0xff] }
 0x129   : > { %1143 = vst [vmem:[%s1399_s30] sm:$0xff] %v1142_v8   ;;  %v763_v18 = vadd.f32 %v756_v11, %v755_v10  ;;  %v742_v19 = vadd.f32 %v741_v9, %v719_v7  ;;  %v759_v26 = vmul.f32 %v721_v13, %v721_v13  ;;  %v760_v29 = vmul.f32 %v722_v14, %v722_v14 }
 0x12a   : > { %1159 = vst [vmem:[%s1399_s30 + $0x8] sm:$0xff] %v1147_v15   ;;  %v761_v32 = vmul.f32 %v723_v21, %v723_v21 }
 0x12b   : > { %v743_v24 = vadd.f32 %v742_v19, %v720_v12  ;;  %v764_v25 = vadd.f32 %v763_v18, %v757_v16  ;;  %1160 = vst [vmem:[%s1399_s30 + $0x10] sm:$0xff] %v1152_v17  }
 0x12c   : > { %v724_v22 = vld [vmem:[#allocation2 + $0x38] sm:$0xff] }
 0x12d   : > { %v1157_v23 = vpack.c.bf16 %v724_v22, %v723_v21  ;;  %v765_v27 = vadd.f32 %v764_v25, %v758_v20  ;;  %v744_v28 = vadd.f32 %v743_v24, %v721_v13  ;;  %v762_v35 = vmul.f32 %v724_v22, %v724_v22 }
 0x12f   : > { %1161 = vst [vmem:[%s1399_s30 + $0x18] sm:$0xff] %v1157_v23   ;;  %v745_v30 = vadd.f32 %v744_v28, %v722_v14  ;;  %v766_v31 = vadd.f32 %v765_v27, %v759_v26 }
 0x131   : > { %v767_v33 = vadd.f32 %v766_v31, %v760_v29  ;;  %v746_v34 = vadd.f32 %v745_v30, %v723_v21 }
 0x133   : > { %v747_v36 = vadd.f32 %v746_v34, %v724_v22  ;;  %v768_v37 = vadd.f32 %v767_v33, %v761_v32 }
 0x135   : > { %v748_v38 = vrot.slane %v747_v36, 4  ;;  %v769_v39 = vadd.f32 %v768_v37, %v762_v35 }
 0x137   : > { %v749_v40 = vadd.f32 %v748_v38, %v747_v36  ;;  %v770_v41 = vrot.slane %v769_v39, 4 }
 0x139   : > { %v750_v42 = vrot.slane %v749_v40, 2  ;;  %v771_v43 = vadd.f32 %v770_v41, %v769_v39 }
 0x13b   : > { %v751_v44 = vadd.f32 %v750_v42, %v749_v40  ;;  %v772_v45 = vrot.slane %v771_v43, 2 }
 0x13d   : > { %v752_v46 = vrot.slane %v751_v44, 1  ;;  %v773_v47 = vadd.f32 %v772_v45, %v771_v43 }
 0x13f   : > { %v753_v48 = vadd.f32 %v752_v46, %v751_v44  ;;  %v774_v49 = vrot.slane %v773_v47, 1 }
 0x141   : > { %754 = vst [vmem:[%s1405_s6] sm:$0x1] %v753_v48  ;;  %v775_v50 = vadd.f32 %v774_v49, %v773_v47 }
 0x143   : > { %776 = vst [vmem:[%s1405_s6 + $0x1] sm:$0x1] %v775_v50 }
 0x144 PF: > { %s14_s18 = sadd.s32 1, %s1284_s18   ;;  %s1490_s12 = smov %s1264_s13 }
 0x145   : > { %p11_p1 = scmp.ge.s32.totalorder %s14_s18, 8   ;;  %s1491_s13 = smov %s1358_s25 }
 0x146   : > { %s1492_s14 = smov %s1276_s16  ;;  %s1493_s15 = smov %s1280_s17 }
 0x147   : > { %s1494_s16 = smov %s1497_s19  ;;  %s1495_s17 = smov %s1501_s20 }
 0x148   :  { %13 = sbr.rel (!%p11_p1) target bundleno = 4 (0x4), region = 118 }

// kernel: _lambda_.33
= control target key start
LH: loop header
LB: loop body
LE: loop exit
PB: predicated region body
PF: predicated region fallthrough
CT: control target
= control target key end

     0   :  { %s660_s12 = smov 0   ;;  %s662_s13 = smov 0   ;;  %s725_s0 = inlined_call_operand.vmem [shape: bf16[32,128], index: 0, kind: input, shape index: {}]   ;;  %s726_s1 = inlined_call_operand.vmem [shape: bf16[128,128], index: 1, kind: input, shape index: {}]   ;;  %s727_s2 = inlined_call_operand.vmem [shape: bf16[32,128], index: 2, kind: output, shape index: {0}]   ;;  %s728_s3 = inlined_call_operand.vmem [shape: f32[2,8,128], index: 3, kind: output, shape index: {1}]  }
   0x1   :  { %s664_s14 = smov 0  }
   0x2 LB: > { %s33_s15 = sadd.s32 1, %s634_s13  ;;  %p534_p0 = scmp.ge.s32.totalorder %s638_s14, 1  ;;  %s638_s14 = sphi %s664_s14, %s14_s14   ;;  %s634_s13 = sphi %s662_s13, %s730_s13   ;;  %s630_s12 = sphi %s660_s12, %s729_s12  }
   0x3   : > { %p35_p1 = scmp.ge.s32.totalorder %s33_s15, 2  ;;  %p185_p2 = scmp.lt.s32.totalorder %s638_s14, 3 }
   0x5   : > { %s732_s15 = smov (%p35_p1, %s33_s15), 0  ;;  %p186_p3 = pnand %p534_p0, %p185_p2 }
   0x6   : > { %s535_s24 = sshll.u32 (!%p186_p3), %s630_s12, 1  ;;  %p257_p5 = scmp.lt.s32.totalorder (!%p186_p3), %s630_s12, 1 }
   0x7   : > { %189 = sbr.rel (%p186_p3) target bundleno = 195 (0xc3), region = 28  ;;  %p231_p4 = scmp.lt.s32.totalorder (!%p186_p3), %s535_s24, 3 }
   0xc   : > { %v586_v0 = vld [vmem:[%s726_s1 + $0x38] sm:$0xff]  ;;  %v585_v1 = vld [vmem:[%s726_s1 + $0x30] sm:$0xff]  ;;  %v584_v2 = vld [vmem:[%s726_s1 + $0x28] sm:$0xff]  ;;  %s734_s24 = smov (!%p231_p4, %s535_s24), 3  ;;  %s736_s12 = smov (!%p257_p5, %s630_s12), 1 }
   0xd   : > { %344 = vmatpush.bf16.msra.mxu0 %v586_v0  ;;  %v583_v3 = vld [vmem:[%s726_s1 + $0x20] sm:$0xff]  ;;  %v582_v4 = vld [vmem:[%s726_s1 + $0x18] sm:$0xff]  ;;  %v581_v5 = vld [vmem:[%s726_s1 + $0x10] sm:$0xff]  ;;  %s536_s4 = sshll.u32 %s734_s24, 2  ;;  %s539_s17 = sshll.u32 %s736_s12, 3 }
   0xe   : > { %v580_v6 = vld [vmem:[%s726_s1 + $0x8] sm:$0xff]  ;;  %v579_v7 = vld [vmem:[%s726_s1] sm:$0xff]  ;;  %s237_s9 = scalar_lea.vmem %s725_s0, %s536_s4  ;;  %s255_s16 = scalar_lea.vmem %s727_s2, %s536_s4 }
   0xf   : > { %v578_v8 = vld [vmem:[%s237_s9] sm:$0xff]  ;;  %s263_s20 = scalar_lea.vmem %s728_s3, %s539_s17 }
  0x11   : > { %345 = vmatpush.bf16.msra.mxu0 %v585_v1 }
  0x15   : > { %346 = vmatpush.bf16.msra.mxu0 %v584_v2 }
  0x19   : > { %347 = vmatpush.bf16.msra.mxu0 %v583_v3 }
  0x1d   : > { %348 = vmatpush.bf16.msra.mxu0 %v582_v4 }
  0x21   : > { %349 = vmatpush.bf16.msra.mxu0 %v581_v5 }
  0x25   : > { %350 = vmatpush.bf16.msra.mxu0 %v580_v6 }
  0x29   : > { %351 = vmatpush.bf16.msra.mxu0 %v579_v7 }
  0x2c   : > { %352 = vmatmul.bf16.vlgmr.msra.gmra.mxu0 %v578_v8 }
  0xa9   : > { %v353_v9 = vpop.f32.mrf.mxu0 }
  0xaa   : > { %v379_v11 = vmul.f32 %v353_v9, %v353_v9 }
  0xb1   : > { %v355_v10 = vpop.f32.mrf.mxu0 }
  0xb2   : > { %v590_v12 = vpack.c.bf16 %v355_v10, %v353_v9  ;;  %v371_v13 = vadd.f32 %v355_v10, %v353_v9  ;;  %v380_v14 = vmul.f32 %v355_v10, %v355_v10 }
  0xb4   : > { %591 = vst [vmem:[%s255_s16] sm:$0xff] %v590_v12   ;;  %v372_v15 = vrot.slane %v371_v13, 4  ;;  %v381_v16 = vadd.f32 %v380_v14, %v379_v11 }
  0xb6   : > { %v373_v17 = vadd.f32 %v372_v15, %v371_v13  ;;  %v382_v18 = vrot.slane %v381_v16, 4 }
  0xb8   : > { %v374_v19 = vrot.slane %v373_v17, 2  ;;  %v383_v20 = vadd.f32 %v382_v18, %v381_v16 }
  0xba   : > { %v375_v21 = vadd.f32 %v374_v19, %v373_v17  ;;  %v384_v22 = vrot.slane %v383_v20, 2 }
  0xbc   : > { %v376_v23 = vrot.slane %v375_v21, 1  ;;  %v385_v24 = vadd.f32 %v384_v22, %v383_v20 }
  0xbe   : > { %v377_v25 = vadd.f32 %v376_v23, %v375_v21  ;;  %v386_v26 = vrot.slane %v385_v24, 1 }
  0xc0   : > { %378 = vst [vmem:[%s263_s20] sm:$0x1] %v377_v25  ;;  %v387_v27 = vadd.f32 %v386_v26, %v385_v24 }
  0xc2   : > { %388 = vst [vmem:[%s263_s20 + $0x1] sm:$0x1] %v387_v27 }
  0xc3 PF: > { %s14_s14 = sadd.s32 1, %s638_s14   ;;  %s729_s12 = smov %s634_s13 }
  0xc4   : > { %p11_p6 = scmp.ge.s32.totalorder %s14_s14, 4   ;;  %s730_s13 = smov %s732_s15 }
  0xc6   :  { %13 = sbr.rel (!%p11_p6) target bundleno = 2 (0x2), region = 81 }

// kernel: _lambda_.26
= control target key start
LH: loop header
LB: loop body
LE: loop exit
PB: predicated region body
PF: predicated region fallthrough
CT: control target
= control target key end

     0   :  { %s649_s15 = smov 0   ;;  %s651_s16 = smov 0   ;;  %s702_s0 = inlined_call_operand.vmem [shape: bf16[128,128], index: 0, kind: input, shape index: {}]   ;;  %s703_s1 = inlined_call_operand.vmem [shape: f32[1,128], index: 1, kind: input, shape index: {}]   ;;  %s704_s2 = inlined_call_operand.vmem [shape: f32[1,128], index: 2, kind: input, shape index: {}]   ;;  %s705_s3 = inlined_call_operand.vmem [shape: bf16[128,128], index: 3, kind: input, shape index: {}]   ;;  %s706_s4 = inlined_call_operand.vmem [shape: bf16[128,128], index: 4, kind: output, shape index: {}]  }
   0x1   :  { %s653_s17 = smov 0  }
   0x2 LB: > { %s26_s18 = sadd.s32 1, %s618_s16  ;;  %p504_p0 = scmp.ge.s32.totalorder %s622_s17, 1  ;;  %s622_s17 = sphi %s653_s17, %s14_s17   ;;  %s618_s16 = sphi %s651_s16, %s708_s16   ;;  %s614_s15 = sphi %s649_s15, %s707_s15  }
   0x3   : > { %p28_p1 = scmp.ge.s32.totalorder %s26_s18, 2  ;;  %p214_p2 = scmp.lt.s32.totalorder %s622_s17, 3 }
   0x5   : > { %s710_s18 = smov (%p28_p1, %s26_s18), 0  ;;  %p215_p3 = pnand %p504_p0, %p214_p2 }
   0x6   : > { %s505_s19 = sshll.u32 (!%p215_p3), %s614_s15, 3 }
   0x7   : > { %218 = sbr.rel (%p215_p3) target bundleno = 36 (0x24), region = 36  ;;  %p261_p4 = scmp.lt.s32.totalorder (!%p215_p3), %s505_s19, 15 }
   0xc   : > { %s712_s19 = smov (!%p261_p4, %s505_s19), 15  ;;  %v598_v0 = vld [vmem:[%s703_s1] ss:$0 sm:$0xff] }
   0xd   : > { %s667_s20 = sshll.u32 %s712_s19, 2  ;;  %v599_v1 = vld [vmem:[%s704_s2] ss:$0 sm:$0xff] }
   0xe   : > { %s267_s23 = scalar_lea.vmem %s702_s0, %s667_s20  ;;  %s677_s26 = scalar_lea.vmem %s705_s3, %s667_s20 }
   0xf   : > { %v514_v2 = vld [vmem:[%s267_s23] sm:$0xff]   ;;  %v565_v4 = vld [vmem:[%s267_s23 + $0x8] sm:$0xff]   ;;  %v566_v10 = vld [vmem:[%s267_s23 + $0x10] sm:$0xff]   ;;  %s291_s7 = scalar_lea.vmem %s706_s4, %s667_s20 }
  0x10   : > { %v530_v3 = vld [vmem:[%s677_s26] sm:$0xff]   ;;  %v515_v5 = vunpack.c.l.bf16 %v514_v2  ;;  %v516_v6 = vunpack.c.h.bf16 %v514_v2  ;;  %v568_v9 = vld [vmem:[%s677_s26 + $0x8] sm:$0xff]   ;;  %v569_v11 = vld [vmem:[%s677_s26 + $0x10] sm:$0xff]   ;;  %v519_v12 = vunpack.c.l.bf16 %v565_v4  ;;  %v520_v13 = vunpack.c.h.bf16 %v565_v4 }
  0x11   : > { %v531_v7 = vunpack.c.l.bf16 %v530_v3  ;;  %v532_v8 = vunpack.c.h.bf16 %v530_v3  ;;  %v535_v14 = vunpack.c.l.bf16 %v568_v9  ;;  %v536_v15 = vunpack.c.h.bf16 %v568_v9  ;;  %v567_v20 = vld [vmem:[%s267_s23 + $0x18] sm:$0xff]  }
  0x12   : > { %v313_v16 = vmul.f32 %v598_v0, %v515_v5  ;;  %v314_v17 = vmul.f32 %v598_v0, %v516_v6  ;;  %v523_v18 = vunpack.c.l.bf16 %v566_v10  ;;  %v524_v19 = vunpack.c.h.bf16 %v566_v10  ;;  %v570_v41 = vld [vmem:[%s677_s26 + $0x18] sm:$0xff]  }
  0x13   : > { %v315_v21 = vmul.f32 %v598_v0, %v519_v12  ;;  %v316_v22 = vmul.f32 %v598_v0, %v520_v13  ;;  %v539_v23 = vunpack.c.l.bf16 %v569_v11  ;;  %v540_v24 = vunpack.c.h.bf16 %v569_v11 }
  0x14   : > { %v325_v25 = vadd.f32 %v599_v1, %v313_v16  ;;  %v326_v26 = vadd.f32 %v599_v1, %v314_v17  ;;  %v317_v27 = vmul.f32 %v598_v0, %v523_v18  ;;  %v318_v28 = vmul.f32 %v598_v0, %v524_v19 }
  0x15   : > { %v327_v29 = vadd.f32 %v599_v1, %v315_v21  ;;  %v328_v30 = vadd.f32 %v599_v1, %v316_v22  ;;  %v527_v31 = vunpack.c.l.bf16 %v567_v20  ;;  %v528_v32 = vunpack.c.h.bf16 %v567_v20 }
  0x16   : > { %v349_v33 = vadd.f32 %v531_v7, %v325_v25  ;;  %v350_v34 = vadd.f32 %v532_v8, %v326_v26  ;;  %v329_v35 = vadd.f32 %v599_v1, %v317_v27  ;;  %v330_v36 = vadd.f32 %v599_v1, %v318_v28 }
  0x17   : > { %v351_v37 = vadd.f32 %v535_v14, %v327_v29  ;;  %v352_v38 = vadd.f32 %v536_v15, %v328_v30  ;;  %v319_v39 = vmul.f32 %v598_v0, %v527_v31  ;;  %v320_v40 = vmul.f32 %v598_v0, %v528_v32 }
  0x18   : > { %v357_v42 = vmax.f32 %v349_v33, 0.0  ;;  %v358_v43 = vmax.f32 %v350_v34, 0.0  ;;  %v353_v44 = vadd.f32 %v539_v23, %v329_v35  ;;  %v354_v45 = vadd.f32 %v540_v24, %v330_v36 }
  0x19   : > { %v359_v46 = vmax.f32 %v351_v37, 0.0  ;;  %v360_v47 = vmax.f32 %v352_v38, 0.0  ;;  %v331_v48 = vadd.f32 %v599_v1, %v319_v39  ;;  %v332_v49 = vadd.f32 %v599_v1, %v320_v40 }
  0x1a   : > { %v548_v50 = vpack.c.bf16 %v358_v43, %v357_v42  ;;  %v361_v51 = vmax.f32 %v353_v44, 0.0  ;;  %v362_v52 = vmax.f32 %v354_v45, 0.0  ;;  %v543_v53 = vunpack.c.l.bf16 %v570_v41 }
  0x1b   : > { %v553_v54 = vpack.c.bf16 %v360_v47, %v359_v46  ;;  %v544_v55 = vunpack.c.h.bf16 %v570_v41 }
  0x1c   : > { %549 = vst [vmem:[%s291_s7] sm:$0xff] %v548_v50   ;;  %v558_v56 = vpack.c.bf16 %v362_v52, %v361_v51  ;;  %v355_v57 = vadd.f32 %v543_v53, %v331_v48 }
  0x1d   : > { %571 = vst [vmem:[%s291_s7 + $0x8] sm:$0xff] %v553_v54   ;;  %v356_v58 = vadd.f32 %v544_v55, %v332_v49 }
  0x1e   : > { %572 = vst [vmem:[%s291_s7 + $0x10] sm:$0xff] %v558_v56   ;;  %v363_v59 = vmax.f32 %v355_v57, 0.0 }
  0x1f   : > { %v364_v60 = vmax.f32 %v356_v58, 0.0 }
  0x21   : > { %v563_v61 = vpack.c.bf16 %v364_v60, %v363_v59 }
  0x23   : > { %573 = vst [vmem:[%s291_s7 + $0x18] sm:$0xff] %v563_v61  }
  0x24 PF: > { %s14_s17 = sadd.s32 1, %s622_s17   ;;  %s707_s15 = smov %s618_s16 }
  0x25   : > { %p11_p5 = scmp.ge.s32.totalorder %s14_s17, 4   ;;  %s708_s16 = smov %s710_s18 }
  0x27   :  { %13 = sbr.rel (!%p11_p5) target bundleno = 2 (0x2), region = 75 }

// kernel: _lambda_.34
= control target key start
LH: loop header
LB: loop body
LE: loop exit
PB: predicated region body
PF: predicated region fallthrough
CT: control target
= control target key end

     0   :  { %s447_s12 = smov 0   ;;  %s449_s13 = smov 0   ;;  %s479_s0 = inlined_call_operand.vmem [shape: bf16[32,128], index: 0, kind: input, shape index: {}]   ;;  %s480_s1 = inlined_call_operand.vmem [shape: f32[1,128], index: 1, kind: input, shape index: {}]   ;;  %s481_s2 = inlined_call_operand.vmem [shape: f32[1,128], index: 2, kind: input, shape index: {}]   ;;  %s482_s3 = inlined_call_operand.vmem [shape: bf16[32,128], index: 3, kind: output, shape index: {}]  }
   0x1   :  { %s451_s14 = smov 0  }
   0x2 LB: > { %s25_s15 = sadd.s32 1, %s421_s13  ;;  %p361_p0 = scmp.ge.s32.totalorder %s425_s14, 1  ;;  %s425_s14 = sphi %s451_s14, %s13_s14   ;;  %s421_s13 = sphi %s449_s13, %s484_s13   ;;  %s417_s12 = sphi %s447_s12, %s483_s12  }
   0x3   : > { %p27_p1 = scmp.ge.s32.totalorder %s25_s15, 2  ;;  %p173_p2 = scmp.lt.s32.totalorder %s425_s14, 3 }
   0x5   : > { %s486_s15 = smov (%p27_p1, %s25_s15), 0  ;;  %p174_p3 = pnand %p361_p0, %p173_p2 }
   0x6   : > { %s362_s16 = sshll.u32 (!%p174_p3), %s417_s12, 1 }
   0x7   : > { %177 = sbr.rel (%p174_p3) target bundleno = 25 (0x19), region = 32  ;;  %p210_p4 = scmp.lt.s32.totalorder (!%p174_p3), %s362_s16, 3 }
   0xc   : > { %s488_s16 = smov (!%p210_p4, %s362_s16), 3  ;;  %v401_v0 = vld [vmem:[%s480_s1] ss:$0 sm:$0xff] }
   0xd   : > { %s363_s17 = sshll.u32 %s488_s16, 2  ;;  %v402_v4 = vld [vmem:[%s481_s2] ss:$0 sm:$0xff] }
   0xe   : > { %s216_s20 = scalar_lea.vmem %s479_s0, %s363_s17  ;;  %s231_s27 = scalar_lea.vmem %s482_s3, %s363_s17 }
   0xf   : > { %v369_v1 = vld [vmem:[%s216_s20] sm:$0xff]  }
  0x10   : > { %v370_v2 = vunpack.c.l.bf16 %v369_v1  ;;  %v371_v3 = vunpack.c.h.bf16 %v369_v1 }
  0x12   : > { %v241_v5 = vmul.f32 %v401_v0, %v370_v2  ;;  %v242_v6 = vmul.f32 %v401_v0, %v371_v3 }
  0x14   : > { %v247_v7 = vadd.f32 %v402_v4, %v241_v5  ;;  %v248_v8 = vadd.f32 %v402_v4, %v242_v6 }
  0x16   : > { %v375_v9 = vpack.c.bf16 %v248_v8, %v247_v7 }
  0x18   : > { %376 = vst [vmem:[%s231_s27] sm:$0xff] %v375_v9  }
  0x19 PF: > { %s13_s14 = sadd.s32 1, %s425_s14   ;;  %s483_s12 = smov %s421_s13 }
  0x1a   : > { %p10_p5 = scmp.ge.s32.totalorder %s13_s14, 4   ;;  %s484_s13 = smov %s486_s15 }
  0x1c   :  { %12 = sbr.rel (!%p10_p5) target bundleno = 2 (0x2), region = 68 }

// kernel: _lambda_.32
= control target key start
LH: loop header
LB: loop body
LE: loop exit
PB: predicated region body
PF: predicated region fallthrough
CT: control target
= control target key end

     0   :  { %s449_s12 = smov 0   ;;  %s451_s13 = smov 0   ;;  %s485_s0 = inlined_call_operand.vmem [shape: bf16[32,128], index: 0, kind: input, shape index: {}]   ;;  %s486_s1 = inlined_call_operand.vmem [shape: f32[1,128], index: 1, kind: input, shape index: {}]   ;;  %s487_s2 = inlined_call_operand.vmem [shape: f32[1,128], index: 2, kind: input, shape index: {}]   ;;  %s488_s3 = inlined_call_operand.vmem [shape: bf16[32,128], index: 3, kind: output, shape index: {}]  }
   0x1   :  { %s453_s14 = smov 0  }
   0x2 LB: > { %s25_s15 = sadd.s32 1, %s423_s13  ;;  %p363_p0 = scmp.ge.s32.totalorder %s427_s14, 1  ;;  %s427_s14 = sphi %s453_s14, %s13_s14   ;;  %s423_s13 = sphi %s451_s13, %s490_s13   ;;  %s419_s12 = sphi %s449_s12, %s489_s12  }
   0x3   : > { %p27_p1 = scmp.ge.s32.totalorder %s25_s15, 2  ;;  %p173_p2 = scmp.lt.s32.totalorder %s427_s14, 3 }
   0x5   : > { %s492_s15 = smov (%p27_p1, %s25_s15), 0  ;;  %p174_p3 = pnand %p363_p0, %p173_p2 }
   0x6   : > { %s364_s16 = sshll.u32 (!%p174_p3), %s419_s12, 1 }
   0x7   : > { %177 = sbr.rel (%p174_p3) target bundleno = 27 (0x1b), region = 32  ;;  %p210_p4 = scmp.lt.s32.totalorder (!%p174_p3), %s364_s16, 3 }
   0xc   : > { %s494_s16 = smov (!%p210_p4, %s364_s16), 3  ;;  %v403_v0 = vld [vmem:[%s486_s1] ss:$0 sm:$0xff] }
   0xd   : > { %s365_s17 = sshll.u32 %s494_s16, 2  ;;  %v404_v4 = vld [vmem:[%s487_s2] ss:$0 sm:$0xff] }
   0xe   : > { %s216_s20 = scalar_lea.vmem %s485_s0, %s365_s17  ;;  %s231_s27 = scalar_lea.vmem %s488_s3, %s365_s17 }
   0xf   : > { %v371_v1 = vld [vmem:[%s216_s20] sm:$0xff]  }
  0x10   : > { %v372_v2 = vunpack.c.l.bf16 %v371_v1  ;;  %v373_v3 = vunpack.c.h.bf16 %v371_v1 }
  0x12   : > { %v241_v5 = vmul.f32 %v403_v0, %v372_v2  ;;  %v242_v6 = vmul.f32 %v403_v0, %v373_v3 }
  0x14   : > { %v247_v7 = vadd.f32 %v404_v4, %v241_v5  ;;  %v248_v8 = vadd.f32 %v404_v4, %v242_v6 }
  0x16   : > { %v249_v9 = vmax.f32 %v247_v7, 0.0  ;;  %v250_v10 = vmax.f32 %v248_v8, 0.0 }
  0x18   : > { %v377_v11 = vpack.c.bf16 %v250_v10, %v249_v9 }
  0x1a   : > { %378 = vst [vmem:[%s231_s27] sm:$0xff] %v377_v11  }
  0x1b PF: > { %s13_s14 = sadd.s32 1, %s427_s14   ;;  %s489_s12 = smov %s423_s13 }
  0x1c   : > { %p10_p5 = scmp.ge.s32.totalorder %s13_s14, 4   ;;  %s490_s13 = smov %s492_s15 }
  0x1e   :  { %12 = sbr.rel (!%p10_p5) target bundleno = 2 (0x2), region = 68 }

// kernel: _lambda_.31
= control target key start
LH: loop header
LB: loop body
LE: loop exit
PB: predicated region body
PF: predicated region fallthrough
CT: control target
= control target key end

     0   :  { %s1035_s12 = smov 0   ;;  %s1037_s13 = smov 0   ;;  %s1175_s0 = inlined_call_operand.vmem [shape: bf16[32,1152], index: 0, kind: input, shape index: {}]   ;;  %s1176_s1 = inlined_call_operand.vmem [shape: bf16[1152,128], index: 1, kind: input, shape index: {}]   ;;  %s1177_s2 = inlined_call_operand.vmem [shape: bf16[32,128], index: 2, kind: output, shape index: {0}]   ;;  %s1178_s3 = inlined_call_operand.vmem [shape: f32[2,8,128], index: 3, kind: output, shape index: {1}]  }
   0x1   :  { %s1039_s14 = smov 0   ;;  %s1041_s15 = smov 0  }
   0x2   :  { %s1043_s16 = smov 0   ;;  %s1045_s17 = smov 0  }
   0x3   :  { %s1047_s18 = smov 0  }
   0x4 LB: > { %s26_s19 = sadd.s32 1, %s1004_s16  ;;  %s33_s20 = sadd.s32 1, %s1008_s17  ;;  %s1012_s18 = sphi %s1047_s18, %s14_s18   ;;  %s1008_s17 = sphi %s1045_s17, %s1184_s17   ;;  %s1004_s16 = sphi %s1043_s16, %s1183_s16   ;;  %s1000_s15 = sphi %s1041_s15, %s1182_s15   ;;  %s996_s14 = sphi %s1039_s14, %s1181_s14   ;;  %s992_s13 = sphi %s1037_s13, %s1180_s13   ;;  %s988_s12 = sphi %s1035_s12, %s1179_s12  }
   0x5   : > { %p27_p0 = scmp.ge.s32.totalorder %s26_s19, 3  ;;  %p49_p1 = scmp.ne.s32.totalorder %s992_s13, %s988_s12 }
   0x6   : > { %p50_p2 = scmp.eq.s32.totalorder %s1012_s18, 0  ;;  %s42_s24 = sadd.s32 1, %s992_s13 }
   0x7   : > { %s1186_s19 = smov (%p27_p0, %s26_s19), 0  ;;  %s1188_s20 = smov (!%p27_p0, %s33_s20), %s1008_s17 }
   0x8   : > { %p51_p3 = por %p50_p2, %p49_p1  ;;  %p35_p4 = scmp.ge.s32.totalorder %s1188_s20, 2 }
   0x9   : > { %s38_s21 = ssub.s32 %s1004_s16, %s1186_s19  ;;  %p741_p6 = scmp.ge.s32.totalorder %s1012_s18, 6 }
   0xa   : > { %s1190_s20 = smov (%p35_p4, %s1188_s20), 0 }
   0xb   : > { %s37_s22 = ssub.s32 %s1008_s17, %s1190_s20  ;;  %159 = sbr.rel (%p741_p6) target bundleno = 29 (0x1d), region = 16 }
   0xc   : > { %s39_s23 = sor.u32 %s38_s21, %s37_s22 }
   0xd   : > { %p40_p5 = scmp.eq.s32.totalorder %s39_s23, 0 }
   0xf   : > { %s1086_s25 = scalar_select %p40_p5, %s992_s13, %s42_s24  }
  0x10   : > { %162 = sbr.rel (!%p51_p3) target bundleno = 29 (0x1d), region = 20  ;;  %s164_s26 = sand.u32 (%p51_p3), 1, %s992_s13  }
  0x11   : > { %s168_s27 = smul.u32 (%p51_p3), 3, %s1004_s16 }
  0x12   : > { %s898_s28 = smul.u32 (%p51_p3), 24, %s164_s26 }
  0x13   : > { %s899_s29 = smul.u32 (%p51_p3), 18, %s1008_s17 }
  0x14   : > { %s166_s8 = scalar_lea.vmem (%p51_p3), [#allocation3], %s898_s28 }
  0x15   : > { %s170_s30 = sadd.s32 %s899_s29, %s168_s27 }
  0x16   : > { %s744_s4 = sshll.u32 %s170_s30, 2 }
  0x17   : > { %s172_s7 = scalar_lea.vmem %s1175_s0, %s744_s4 }
  0x18   : > { %v187_v0 = vld [vmem:[%s172_s7] sm:$0xff]  ;;  %v745_v2 = vld [vmem:[%s172_s7 + $0x8] sm:$0xf]  ;;  %v747_v3 = vld [vmem:[%s172_s7 + $0x2c] sm:$0xf] }
  0x19   : > { %v189_v1 = vld [vmem:[%s172_s7 + $0x24] sm:$0xff]  ;;  %188 = vst [vmem:[%s166_s8] sm:$0xff] %v187_v0 }
  0x1a   : > { %190 = vst [vmem:[%s166_s8 + $0xc] sm:$0xff] %v189_v1 }
  0x1b   : > { %746 = vst [vmem:[%s166_s8 + $0x8] sm:$0xf] %v745_v2 }
  0x1c   : > { %748 = vst [vmem:[%s166_s8 + $0x14] sm:$0xf] %v747_v3 }
  0x1d PF: > { %p749_p7 = scmp.ge.s32.totalorder %s1012_s18, 1  ;;  %p219_p8 = scmp.lt.s32.totalorder %s1012_s18, 7 }
  0x1f   : > { %p220_p9 = pnand %p749_p7, %p219_p8 }
  0x20   : > { %s226_s9 = sand.u32 (!%p220_p9), 1, %s988_s12   ;;  %s269_s10 = smul.u32 (!%p220_p9), 48, %s996_s14 }
  0x21   : > { %223 = sbr.rel (%p220_p9) target bundleno = 252 (0xfc), region = 50  ;;  %s751_s21 = sshll.u32 (!%p220_p9), %s1000_s15, 1 }
  0x22   : > { %s900_s11 = smul.u32 (!%p220_p9), 24, %s226_s9  ;;  %p270_p10 = scmp.lt.s32.totalorder (!%p220_p9), %s269_s10, 143 }
  0x23   : > { %p279_p11 = scmp.lt.s32.totalorder (!%p220_p9), %s751_s21, 3  ;;  %p287_p12 = scmp.lt.s32.totalorder (!%p220_p9), %s1000_s15, 1 }
  0x24   : > { %s1117_s7 = scalar_lea.vmem (!%p220_p9), [#allocation3], %s900_s11  ;;  %p754_p13 = scmp.ne.s32.totalorder (!%p220_p9), %s996_s14, 0 }
  0x26   : > { %s1192_s10 = smov (!%p270_p10, %s269_s10), 143  ;;  %s1194_s21 = smov (!%p279_p11, %s751_s21), 3 }
  0x27   : > { %s750_s22 = sshll.u32 %s1192_s10, 2  ;;  %s752_s27 = sshll.u32 %s1194_s21, 2 }
  0x28   : > { %s1104_s26 = scalar_lea.vmem %s1176_s1, %s750_s22  ;;  %s1109_s30 = scalar_lea.vmem %s1177_s2, %s752_s27 }
  0x29   : > { %s1196_s15 = smov (!%p287_p12, %s1000_s15), 1  ;;  %297 = sbr.rel (%p754_p13) target bundleno = 49 (0x31), region = 58 }
  0x2a   : > { %s753_s12 = sshll.u32 %s1196_s15, 3 }
  0x2b   : > { %s1115_s6 = scalar_lea.vmem %s1178_s3, %s753_s12 }
  0x2e   : > { %v1014_v4 = vmov 0.0  }
  0x2f   : > { %298 = vst [vmem:[#allocation2] sm:$0xff] %v1014_v4 }
  0x30   : > { %299 = vst [vmem:[#allocation2 + $0x8] sm:$0xff] %v1014_v4 }
  0x31 PF: > { %v876_v5 = vld [vmem:[%s1104_s26 + $0x38] sm:$0xff]  ;;  %v875_v8 = vld [vmem:[%s1104_s26 + $0x30] sm:$0xff]  ;;  %v874_v11 = vld [vmem:[%s1104_s26 + $0x28] sm:$0xff]  ;;  %p863_p0 = scmp.ne.s32.totalorder %s996_s14, 2 }
  0x32   : > { %v884_v6 = vld [vmem:[%s1104_s26 + $0x78] sm:$0xff]  ;;  %514 = vmatpush.bf16.msra.mxu0 %v876_v5  ;;  %v883_v9 = vld [vmem:[%s1104_s26 + $0x70] sm:$0xff]  ;;  %v882_v12 = vld [vmem:[%s1104_s26 + $0x68] sm:$0xff] }
  0x33   : > { %v892_v7 = vld [vmem:[%s1104_s26 + $0xb8] sm:$0xff]  ;;  %528 = vmatpush.bf16.msra.mxu1 %v884_v6  ;;  %v891_v10 = vld [vmem:[%s1104_s26 + $0xb0] sm:$0xff]  ;;  %v890_v13 = vld [vmem:[%s1104_s26 + $0xa8] sm:$0xff] }
  0x34   : > { %542 = vmatpush.bf16.msra.mxu2 %v892_v7  ;;  %v873_v14 = vld [vmem:[%s1104_s26 + $0x20] sm:$0xff]  ;;  %v872_v17 = vld [vmem:[%s1104_s26 + $0x18] sm:$0xff]  ;;  %v871_v20 = vld [vmem:[%s1104_s26 + $0x10] sm:$0xff] }
  0x35   : > { %v881_v15 = vld [vmem:[%s1104_s26 + $0x60] sm:$0xff]  ;;  %v880_v18 = vld [vmem:[%s1104_s26 + $0x58] sm:$0xff]  ;;  %v879_v21 = vld [vmem:[%s1104_s26 + $0x50] sm:$0xff] }
  0x36   : > { %515 = vmatpush.bf16.msra.mxu0 %v875_v8  ;;  %v889_v16 = vld [vmem:[%s1104_s26 + $0xa0] sm:$0xff]  ;;  %v888_v19 = vld [vmem:[%s1104_s26 + $0x98] sm:$0xff]  ;;  %v887_v22 = vld [vmem:[%s1104_s26 + $0x90] sm:$0xff] }
  0x37   : > { %529 = vmatpush.bf16.msra.mxu1 %v883_v9  ;;  %v870_v23 = vld [vmem:[%s1104_s26 + $0x8] sm:$0xff]  ;;  %v869_v26 = vld [vmem:[%s1104_s26] sm:$0xff]  ;;  %v867_v29 = vld [vmem:[%s1117_s7 + $0x8] sm:$0xf0] }
  0x38   : > { %543 = vmatpush.bf16.msra.mxu2 %v891_v10  ;;  %v878_v24 = vld [vmem:[%s1104_s26 + $0x48] sm:$0xff]  ;;  %v877_v27 = vld [vmem:[%s1104_s26 + $0x40] sm:$0xff]  ;;  %v765_v33 = vld [vmem:[%s1117_s7 + $0x8] sm:$0xf] }
  0x39   : > { %v886_v25 = vld [vmem:[%s1104_s26 + $0x88] sm:$0xff]  ;;  %v759_v31 = vld [vmem:[%s1117_s7 + $0xc] sm:$0xf0]  ;;  %v868_v34 = vld [vmem:[%s1117_s7 + $0x10] sm:$0xf0] }
  0x3a   : > { %516 = vmatpush.bf16.msra.mxu0 %v874_v11  ;;  %v757_v28 = vld [vmem:[%s1117_s7] sm:$0xf]  ;;  %v866_v30 = vld [vmem:[%s1117_s7 + $0x4] sm:$0xf]  ;;  %v885_v32 = vld [vmem:[%s1104_s26 + $0x80] sm:$0xff]  ;;  %v766_v37 = vor.u32 %v868_v34, %v765_v33 }
  0x3b   : > { %530 = vmatpush.bf16.msra.mxu1 %v882_v12  ;;  %v758_v35 = vor.u32 %v867_v29, %v757_v28  ;;  %v762_v36 = vor.u32 %v866_v30, %v759_v31  ;;  %v300_v41 = vld [vmem:[#allocation2] sm:$0xff]  ;;  %v301_v48 = vld [vmem:[#allocation2 + $0x8] sm:$0xff] }
  0x3c   : > { %544 = vmatpush.bf16.msra.mxu2 %v890_v13 }
  0x3e   : > { %517 = vmatpush.bf16.msra.mxu0 %v873_v14 }
  0x3f   : > { %531 = vmatpush.bf16.msra.mxu1 %v881_v15 }
  0x40   : > { %545 = vmatpush.bf16.msra.mxu2 %v889_v16 }
  0x42   : > { %518 = vmatpush.bf16.msra.mxu0 %v872_v17 }
  0x43   : > { %532 = vmatpush.bf16.msra.mxu1 %v880_v18 }
  0x44   : > { %546 = vmatpush.bf16.msra.mxu2 %v888_v19 }
  0x46   : > { %519 = vmatpush.bf16.msra.mxu0 %v871_v20 }
  0x47   : > { %533 = vmatpush.bf16.msra.mxu1 %v879_v21 }
  0x48   : > { %547 = vmatpush.bf16.msra.mxu2 %v887_v22 }
  0x4a   : > { %520 = vmatpush.bf16.msra.mxu0 %v870_v23 }
  0x4b   : > { %534 = vmatpush.bf16.msra.mxu1 %v878_v24 }
  0x4c   : > { %548 = vmatpush.bf16.msra.mxu2 %v886_v25 }
  0x4e   : > { %521 = vmatpush.bf16.msra.mxu0 %v869_v26 }
  0x4f   : > { %535 = vmatpush.bf16.msra.mxu1 %v877_v27 }
  0x50   : > { %549 = vmatpush.bf16.msra.mxu2 %v885_v32 }
  0x51   : > { %522 = vmatmul.bf16.vlgmr.msra.gmra.mxu0 %v758_v35 }
  0x52   : > { %536 = vmatmul.bf16.vlgmr.msra.gmra.mxu1 %v762_v36 }
  0x53   : > { %550 = vmatmul.bf16.vlgmr.msra.gmra.mxu2 %v766_v37 }
  0xce   : > { %v523_v38 = vpop.f32.mrf.mxu0 }
  0xcf   : > { %v537_v39 = vpop.f32.mrf.mxu1 }
  0xd0   : > { %v538_v40 = vadd.f32 %v537_v39, %v523_v38 }
  0xd6   : > { %v551_v42 = vpop.f32.mrf.mxu2  ;;  %v525_v45 = vpop.f32.mrf.mxu0 }
  0xd7   : > { %v552_v43 = vadd.f32 %v551_v42, %v538_v40  ;;  %v539_v46 = vpop.f32.mrf.mxu1 }
  0xd8   : > { %v540_v47 = vadd.f32 %v539_v46, %v525_v45 }
  0xd9   : > { %v556_v44 = vadd.f32 %v552_v43, %v300_v41 }
  0xdb   : > { %558 = vst [vmem:[#allocation2] sm:$0xff] %v556_v44 }
  0xde   : > { %v553_v49 = vpop.f32.mrf.mxu2 }
  0xdf   : > { %v554_v50 = vadd.f32 %v553_v49, %v540_v47  ;;  %563 = sbr.rel (%p863_p0) target bundleno = 252 (0xfc), region = 62 }
  0xe1   : > { %v557_v51 = vadd.f32 %v554_v50, %v301_v48 }
  0xe3   : > { %559 = vst [vmem:[#allocation2 + $0x8] sm:$0xff] %v557_v51 }
  0xe4   : > { %v564_v52 = vld [vmem:[#allocation2] sm:$0xff] }
  0xe5   : > { %v578_v56 = vmul.f32 %v564_v52, %v564_v52 }
  0xea   : > { %v565_v53 = vld [vmem:[#allocation2 + $0x8] sm:$0xff] }
  0xeb   : > { %v896_v54 = vpack.c.bf16 %v565_v53, %v564_v52  ;;  %v570_v55 = vadd.f32 %v565_v53, %v564_v52  ;;  %v579_v57 = vmul.f32 %v565_v53, %v565_v53 }
  0xed   : > { %897 = vst [vmem:[%s1109_s30] sm:$0xff] %v896_v54   ;;  %v571_v58 = vrot.slane %v570_v55, 4  ;;  %v580_v59 = vadd.f32 %v579_v57, %v578_v56 }
  0xef   : > { %v572_v60 = vadd.f32 %v571_v58, %v570_v55  ;;  %v581_v61 = vrot.slane %v580_v59, 4 }
  0xf1   : > { %v573_v62 = vrot.slane %v572_v60, 2  ;;  %v582_v63 = vadd.f32 %v581_v61, %v580_v59 }
  0xf3   : > { %v574_v0 = vadd.f32 %v573_v62, %v572_v60  ;;  %v583_v1 = vrot.slane %v582_v63, 2 }
  0xf5   : > { %v575_v2 = vrot.slane %v574_v0, 1  ;;  %v584_v3 = vadd.f32 %v583_v1, %v582_v63 }
  0xf7   : > { %v576_v4 = vadd.f32 %v575_v2, %v574_v0  ;;  %v585_v5 = vrot.slane %v584_v3, 1 }
  0xf9   : > { %577 = vst [vmem:[%s1115_s6] sm:$0x1] %v576_v4  ;;  %v586_v6 = vadd.f32 %v585_v5, %v584_v3 }
  0xfb   : > { %587 = vst [vmem:[%s1115_s6 + $0x1] sm:$0x1] %v586_v6 }
  0xfc PF: > { %s14_s18 = sadd.s32 1, %s1012_s18   ;;  %s1179_s12 = smov %s992_s13 }
  0xfd   : > { %p11_p1 = scmp.ge.s32.totalorder %s14_s18, 8   ;;  %s1180_s13 = smov %s1086_s25 }
  0xfe   : > { %s1181_s14 = smov %s1004_s16  ;;  %s1182_s15 = smov %s1008_s17 }
  0xff   : > { %s1183_s16 = smov %s1186_s19  ;;  %s1184_s17 = smov %s1190_s20 }
 0x100   :  { %13 = sbr.rel (!%p11_p1) target bundleno = 4 (0x4), region = 118 }

// kernel: _lambda_.36
= control target key start
LH: loop header
LB: loop body
LE: loop exit
PB: predicated region body
PF: predicated region fallthrough
CT: control target
= control target key end

     0   :  { %s541_s15 = smov 0   ;;  %s543_s16 = smov 0   ;;  %s583_s0 = inlined_call_operand.vmem [shape: bf16[32,128], index: 0, kind: input, shape index: {}]   ;;  %s584_s1 = inlined_call_operand.vmem [shape: f32[1,128], index: 1, kind: input, shape index: {}]   ;;  %s585_s2 = inlined_call_operand.vmem [shape: f32[1,128], index: 2, kind: input, shape index: {}]   ;;  %s586_s3 = inlined_call_operand.vmem [shape: bf16[32,128], index: 3, kind: input, shape index: {}]   ;;  %s587_s4 = inlined_call_operand.vmem [shape: bf16[32,128], index: 4, kind: output, shape index: {}]  }
   0x1   :  { %s545_s17 = smov 0  }
   0x2 LB: > { %s26_s18 = sadd.s32 1, %s510_s16  ;;  %p444_p0 = scmp.ge.s32.totalorder %s514_s17, 1  ;;  %s514_s17 = sphi %s545_s17, %s14_s17   ;;  %s510_s16 = sphi %s543_s16, %s589_s16   ;;  %s506_s15 = sphi %s541_s15, %s588_s15  }
   0x3   : > { %p28_p1 = scmp.ge.s32.totalorder %s26_s18, 2  ;;  %p214_p2 = scmp.lt.s32.totalorder %s514_s17, 3 }
   0x5   : > { %s591_s18 = smov (%p28_p1, %s26_s18), 0  ;;  %p215_p3 = pnand %p444_p0, %p214_p2 }
   0x6   : > { %s445_s19 = sshll.u32 (!%p215_p3), %s506_s15, 1 }
   0x7   : > { %218 = sbr.rel (%p215_p3) target bundleno = 29 (0x1d), region = 36  ;;  %p261_p4 = scmp.lt.s32.totalorder (!%p215_p3), %s445_s19, 3 }
   0xc   : > { %s593_s19 = smov (!%p261_p4, %s445_s19), 3  ;;  %v490_v0 = vld [vmem:[%s584_s1] ss:$0 sm:$0xff] }
   0xd   : > { %s446_s20 = sshll.u32 %s593_s19, 2  ;;  %v491_v5 = vld [vmem:[%s585_s2] ss:$0 sm:$0xff] }
   0xe   : > { %s267_s23 = scalar_lea.vmem %s583_s0, %s446_s20  ;;  %s282_s26 = scalar_lea.vmem %s586_s3, %s446_s20 }
   0xf   : > { %v454_v1 = vld [vmem:[%s267_s23] sm:$0xff]   ;;  %s291_s7 = scalar_lea.vmem %s587_s4, %s446_s20 }
  0x10   : > { %v458_v2 = vld [vmem:[%s282_s26] sm:$0xff]   ;;  %v455_v3 = vunpack.c.l.bf16 %v454_v1  ;;  %v456_v4 = vunpack.c.h.bf16 %v454_v1 }
  0x11   : > { %v459_v8 = vunpack.c.l.bf16 %v458_v2  ;;  %v460_v9 = vunpack.c.h.bf16 %v458_v2 }
  0x12   : > { %v301_v6 = vmul.f32 %v490_v0, %v455_v3  ;;  %v302_v7 = vmul.f32 %v490_v0, %v456_v4 }
  0x14   : > { %v307_v10 = vadd.f32 %v491_v5, %v301_v6  ;;  %v308_v11 = vadd.f32 %v491_v5, %v302_v7 }
  0x16   : > { %v313_v12 = vadd.f32 %v459_v8, %v307_v10  ;;  %v314_v13 = vadd.f32 %v460_v9, %v308_v11 }
  0x18   : > { %v315_v14 = vmax.f32 %v313_v12, 0.0  ;;  %v316_v15 = vmax.f32 %v314_v13, 0.0 }
  0x1a   : > { %v464_v16 = vpack.c.bf16 %v316_v15, %v315_v14 }
  0x1c   : > { %465 = vst [vmem:[%s291_s7] sm:$0xff] %v464_v16  }
  0x1d PF: > { %s14_s17 = sadd.s32 1, %s514_s17   ;;  %s588_s15 = smov %s510_s16 }
  0x1e   : > { %p11_p5 = scmp.ge.s32.totalorder %s14_s17, 4   ;;  %s589_s16 = smov %s591_s18 }
  0x20   :  { %13 = sbr.rel (!%p11_p5) target bundleno = 2 (0x2), region = 75 }

// kernel: _lambda_.41
= control target key start
LH: loop header
LB: loop body
LE: loop exit
PB: predicated region body
PF: predicated region fallthrough
CT: control target
= control target key end

     0   :  { %s212_s1 = inlined_call_operand.vmem [shape: bf16[128,128], index: 1, kind: input, shape index: {}]   ;;  %s213_s2 = inlined_call_operand.vmem [shape: f32[1,128], index: 2, kind: input, shape index: {}]   ;;  %s214_s0 = inlined_call_operand.vmem [shape: bf16[16,128], index: 0, kind: input, shape index: {}]   ;;  %s215_s3 = inlined_call_operand.vmem [shape: f32[16,128], index: 3, kind: output, shape index: {}]  }
   0x1   :  { %v154_v0 = vld [vmem:[%s212_s1 + $0x38] sm:$0xff]  ;;  %v153_v1 = vld [vmem:[%s212_s1 + $0x30] sm:$0xff]  ;;  %v152_v2 = vld [vmem:[%s212_s1 + $0x28] sm:$0xff] }
   0x2   :  { %90 = vmatpush.bf16.msra.mxu0 %v154_v0  ;;  %v151_v3 = vld [vmem:[%s212_s1 + $0x20] sm:$0xff]  ;;  %v150_v4 = vld [vmem:[%s212_s1 + $0x18] sm:$0xff]  ;;  %v149_v5 = vld [vmem:[%s212_s1 + $0x10] sm:$0xff] }
   0x3   :  { %v148_v6 = vld [vmem:[%s212_s1 + $0x8] sm:$0xff]  ;;  %v147_v7 = vld [vmem:[%s212_s1] sm:$0xff] }
   0x4   :  { %v146_v8 = vld [vmem:[%s214_s0] sm:$0xff] }
   0x5   :  { %v155_v9 = vld [vmem:[%s213_s2] ss:$0 sm:$0xff] }
   0x6   :  { %91 = vmatpush.bf16.msra.mxu0 %v153_v1 }
   0xa   :  { %92 = vmatpush.bf16.msra.mxu0 %v152_v2 }
   0xe   :  { %93 = vmatpush.bf16.msra.mxu0 %v151_v3 }
  0x12   :  { %94 = vmatpush.bf16.msra.mxu0 %v150_v4 }
  0x16   :  { %95 = vmatpush.bf16.msra.mxu0 %v149_v5 }
  0x1a   :  { %96 = vmatpush.bf16.msra.mxu0 %v148_v6 }
  0x1e   :  { %97 = vmatpush.bf16.msra.mxu0 %v147_v7 }
  0x21   :  { %98 = vmatmul.bf16.vlgmr.msra.gmra.mxu0 %v146_v8 }
  0x9e   :  { %v99_v10 = vpop.f32.mrf.mxu0 }
  0x9f   :  { %v100_v11 = vadd.f32 %v155_v9, %v99_v10 }
  0xa1   :  { %104 = vst [vmem:[%s215_s3] sm:$0xff] %v100_v11 }
  0xa6   :  { %v101_v12 = vpop.f32.mrf.mxu0 }
  0xa7   :  { %v102_v13 = vadd.f32 %v155_v9, %v101_v12 }
  0xa9   :  { %105 = vst [vmem:[%s215_s3 + $0x8] sm:$0xff] %v102_v13 }

</bundles_post_ra>
